<compile_context>
chip_gen: v7x
topology: tpu7x:2x2x1
jax: 0.10.0
libtpu: 0.0.40
codegen_flags: <defaults>
</compile_context>

<pallas_src>
import functools

import numpy as np
import jax
import jax.numpy as jnp
from jax import lax
from jax.experimental import pallas as pl
from jax.experimental.pallas import tpu as pltpu

H_LSTM = 80          # reference LSTM hidden size
HP = 128             # lane-aligned padded hidden size (gates -> 4*128 = 512)
NUM_CLASSES = 8


# --------------------------- conv (+bias+ReLU) kernel ------------------------

def _conv3x3_relu_kernel(x_ref, w_ref, b_ref, o_ref, *, cin, cout, ho, wo):
    """3x3 VALID conv + bias + ReLU for one frame, NCHW, VPU shift-MAC.

    x_ref : (1, cin, ho+2, wo+2)  VMEM
    w_ref : (cout*cin*9,)         SMEM  (flattened OIHW weights)
    b_ref : (cout,)               SMEM
    o_ref : (1, cout, ho, wo)     VMEM
    """
    accs = [jnp.zeros((ho, wo), jnp.float32) for _ in range(cout)]
    for ci in range(cin):
        for kh in range(3):
            for kw in range(3):
                patch = x_ref[0, ci, kh:kh + ho, kw:kw + wo]
                k = ci * 9 + kh * 3 + kw
                for co in range(cout):
                    accs[co] = accs[co] + w_ref[co * cin * 9 + k] * patch
    for co in range(cout):
        o_ref[0, co, :, :] = jnp.maximum(accs[co] + b_ref[co], 0.0)


def conv3x3_relu(x, w_flat, b, *, cin, cout):
    """x: (F, cin, H, W) f32 NCHW -> (F, cout, H-2, W-2) f32 (bias+ReLU fused)."""
    f, _, h, w = x.shape
    ho, wo = h - 2, w - 2
    return pl.pallas_call(
        functools.partial(_conv3x3_relu_kernel, cin=cin, cout=cout, ho=ho, wo=wo),
        out_shape=jax.ShapeDtypeStruct((f, cout, ho, wo), jnp.float32),
        grid=(f,),
        in_specs=[
            pl.BlockSpec((1, cin, h, w), lambda i: (i, 0, 0, 0)),
            pl.BlockSpec(memory_space=pltpu.MemorySpace.SMEM),
            pl.BlockSpec(memory_space=pltpu.MemorySpace.SMEM),
        ],
        out_specs=pl.BlockSpec((1, cout, ho, wo), lambda i: (i, 0, 0, 0)),
        compiler_params=pltpu.CompilerParams(dimension_semantics=("parallel",)),
    )(x, w_flat, b)


def maxpool2x2_nchw(x):
    # TODO(synk): 2x2 max-pool stays as a single XLA reshape+max pass (no clean
    # lane-strided pooling primitive in Mosaic); this is one read + one write
    # of the conv output and replaces the previous 4 strided-slice copies plus
    # a standalone pool pallas_call.
    n, c, h, w = x.shape
    return x.reshape(n, c, h // 2, 2, w // 2, 2).max(axis=(3, 5))


# ------------------- fused fc1 + ReLU + LSTM input projection ----------------

def _fc1_gates_kernel(x_ref, w1_ref, b1_ref, wg_ref, bg_ref, o_ref):
    """o = relu(x @ W1 + b1) @ Wg + bg.  bf16 operands, f32 accumulation."""
    h1 = jnp.dot(x_ref[...], w1_ref[...], preferred_element_type=jnp.float32)
    h1 = jnp.maximum(h1 + b1_ref[...], 0.0)
    g = jnp.dot(h1.astype(jnp.bfloat16), wg_ref[...],
                preferred_element_type=jnp.float32)
    o_ref[...] = g + bg_ref[...]


def fc1_gate_proj(x_flat, prep):
    """x_flat: (M, 800) f32  ->  (M, 4*HP) f32 gate pre-activations."""
    m, k = x_flat.shape
    n1 = prep["fc1_w"].shape[1]
    g4 = prep["w_gates"].shape[1]
    tm = 512 if m >= 512 else int(((m + 15) // 16) * 16)   # bf16 sublane packing
    mp = int(((m + tm - 1) // tm) * tm)
    xp = jnp.pad(x_flat, ((0, mp - m), (0, 0))).astype(jnp.bfloat16)
    out = pl.pallas_call(
        _fc1_gates_kernel,
        out_shape=jax.ShapeDtypeStruct((mp, g4), jnp.float32),
        grid=(mp // tm,),
        in_specs=[
            pl.BlockSpec((tm, k), lambda i: (i, 0)),
            pl.BlockSpec((k, n1), lambda i: (0, 0)),
            pl.BlockSpec((1, n1), lambda i: (0, 0)),
            pl.BlockSpec((n1, g4), lambda i: (0, 0)),
            pl.BlockSpec((1, g4), lambda i: (0, 0)),
        ],
        out_specs=pl.BlockSpec((tm, g4), lambda i: (i, 0)),
        compiler_params=pltpu.CompilerParams(dimension_semantics=("parallel",)),
    )(xp, prep["fc1_w"], prep["fc1_b"], prep["w_gates"], prep["b_gates"])
    return out[:m]


# ------------------------- LSTM recurrence + fc2 kernel -----------------------

def _lstm_fc2_kernel(xg_ref, whh_ref, lens_ref, w2_ref, b2_ref, out_ref,
                     h_scr, c_scr, *, hp):
    """LSTM over T steps with pack_padded_sequence masking, fc2 fused at the end.

    xg_ref  : (T, Bp, 4*hp) f32   precomputed x @ W_ih (padded, lane-aligned)
    whh_ref : (hp, 4*hp)    bf16  padded recurrent weights
    lens_ref: (Bp, 1)       i32   sequence lengths (0 for padded batch rows)
    w2_ref  : (hp, C)       bf16  padded fc2 weights
    b2_ref  : (1, C)        f32
    out_ref : (Bp, C)       f32   logits
    """
    t_total = xg_ref.shape[0]
    h_scr[...] = jnp.zeros_like(h_scr)
    c_scr[...] = jnp.zeros_like(c_scr)
    lens_v = lens_ref[...]                                   # hoisted load

    def step(t, carry):
        gates = xg_ref[t] + jnp.dot(h_scr[...].astype(jnp.bfloat16), whh_ref[...],
                                    preferred_element_type=jnp.float32)
        i = jax.nn.sigmoid(gates[:, 0:hp])                   # 128-lane aligned slices
        f = jax.nn.sigmoid(gates[:, hp:2 * hp])
        g = jnp.tanh(gates[:, 2 * hp:3 * hp])
        o = jax.nn.sigmoid(gates[:, 3 * hp:4 * hp])
        c_new = f * c_scr[...] + i * g
        h_new = o * jnp.tanh(c_new)
        mask = lens_v > t                                    # emulate pack_padded_sequence
        c_scr[...] = jnp.where(mask, c_new, c_scr[...])
        h_scr[...] = jnp.where(mask, h_new, h_scr[...])
        return carry

    lax.fori_loop(0, t_total, step, 0)
    logits = jnp.dot(h_scr[...].astype(jnp.bfloat16), w2_ref[...],
                     preferred_element_type=jnp.float32) + b2_ref[...]
    out_ref[...] = logits


def lstm_fc2(xg, whh, lens, w2, b2):
    t, bp, g4 = xg.shape
    hp = whh.shape[0]
    nc = w2.shape[1]
    return pl.pallas_call(
        functools.partial(_lstm_fc2_kernel, hp=hp),
        out_shape=jax.ShapeDtypeStruct((bp, nc), jnp.float32),
        grid=(1,),
        in_specs=[
            pl.BlockSpec((t, bp, g4), lambda i: (0, 0, 0)),
            pl.BlockSpec((hp, g4), lambda i: (0, 0)),
            pl.BlockSpec((bp, 1), lambda i: (0, 0)),
            pl.BlockSpec((hp, nc), lambda i: (0, 0)),
            pl.BlockSpec((1, nc), lambda i: (0, 0)),
        ],
        out_specs=pl.BlockSpec((bp, nc), lambda i: (0, 0)),
        scratch_shapes=[pltpu.VMEM((bp, hp), jnp.float32),
                        pltpu.VMEM((bp, hp), jnp.float32)],
    )(xg, whh, lens, w2, b2)


# ------------------------------ parameters -----------------------------------

def init_params(key):
    ks = jax.random.split(key, 12)

    def u(k, shape, fan_in):
        s = 1.0 / np.sqrt(fan_in)
        return jax.random.uniform(k, shape, jnp.float32, -s, s)

    return {
        "conv1_w": u(ks[0], (8, 1, 3, 3), 9),    "conv1_b": u(ks[1], (8,), 9),
        "conv2_w": u(ks[2], (8, 8, 3, 3), 72),   "conv2_b": u(ks[3], (8,), 72),
        "fc1_w":   u(ks[4], (320, 800), 800),    "fc1_b":   u(ks[5], (320,), 800),
        "w_ih":    u(ks[6], (320, 320), 80),     "w_hh":    u(ks[7], (320, 80), 80),
        "b_ih":    u(ks[8], (320,), 80),         "b_hh":    u(ks[9], (320,), 80),
        "fc2_w":   u(ks[10], (8, 80), 80),       "fc2_b":   u(ks[11], (8,), 80),
    }


def prepare_params(params):
    """One-time weight prep: transposes, gate padding (80->128), bf16 casts."""
    bf = jnp.bfloat16
    g4 = 4 * HP
    w_ih_t = params["w_ih"].T                                # (320, 4H)
    w_hh_t = params["w_hh"].T                                # (H, 4H)
    b_gate = params["b_ih"] + params["b_hh"]                 # (4H,)

    wg = jnp.zeros((320, g4), jnp.float32)
    bg = jnp.zeros((g4,), jnp.float32)
    whh = jnp.zeros((HP, g4), jnp.float32)
    for g in range(4):
        wg = wg.at[:, g * HP:g * HP + H_LSTM].set(w_ih_t[:, g * H_LSTM:(g + 1) * H_LSTM])
        bg = bg.at[g * HP:g * HP + H_LSTM].set(b_gate[g * H_LSTM:(g + 1) * H_LSTM])
        whh = whh.at[:H_LSTM, g * HP:g * HP + H_LSTM].set(
            w_hh_t[:, g * H_LSTM:(g + 1) * H_LSTM])
    w2 = jnp.zeros((HP, NUM_CLASSES), jnp.float32).at[:H_LSTM].set(params["fc2_w"].T)

    return {
        "conv1_w": params["conv1_w"].reshape(-1),            # (72,)  f32 SMEM scalars
        "conv1_b": params["conv1_b"],                        # (8,)
        "conv2_w": params["conv2_w"].reshape(-1),            # (576,)
        "conv2_b": params["conv2_b"],
        "fc1_w":   params["fc1_w"].T.astype(bf),             # (800, 320) bf16
        "fc1_b":   params["fc1_b"].reshape(1, -1),           # (1, 320)  f32
        "w_gates": wg.astype(bf),                            # (320, 512) bf16
        "b_gates": bg.reshape(1, -1),                        # (1, 512)  f32
        "w_hh":    whh.astype(bf),                           # (128, 512) bf16
        "fc2_w":   w2.astype(bf),                            # (128, 8)  bf16
        "fc2_b":   params["fc2_b"].reshape(1, -1),           # (1, 8)    f32
    }


# ------------------------------ forward pass ----------------------------------

def sfer_lstm_forward(seq_list, prep):
    """seq_list: list of (len_i, 1, 46, 46) NCHW arrays.  Returns (out, sorted_idx)."""
    # TODO(synk): Dropout2d is treated as identity (inference / eval-mode semantics).
    lens = [int(s.shape[0]) for s in seq_list]
    b = len(seq_list)
    x = jnp.concatenate(seq_list, axis=0)                    # (F, 1, 46, 46) f32
    f_total = x.shape[0]

    x = conv3x3_relu(x, prep["conv1_w"], prep["conv1_b"], cin=1, cout=8)   # (F,8,44,44)
    x = maxpool2x2_nchw(x)                                                  # (F,8,22,22)
    x = conv3x3_relu(x, prep["conv2_w"], prep["conv2_b"], cin=8, cout=8)   # (F,8,20,20)
    x = maxpool2x2_nchw(x)                                                  # (F,8,10,10)
    x = x.reshape(f_total, 8 * 10 * 10)                      # torch view(-1, 800) order

    # pad_tensor_batch + pack_padded_sequence bookkeeping (host glue).
    sorted_idx = np.argsort(-np.asarray(lens))
    starts = np.concatenate([[0], np.cumsum(lens)]).astype(np.int64)
    t_max = max(lens)
    padded = []
    for idx in sorted_idx:
        s0 = int(starts[idx])
        li = lens[idx]
        padded.append(jnp.pad(x[s0:s0 + li], ((0, t_max - li), (0, 0))))
    padded = jnp.stack(padded)                               # (B, T, 800), sorted order
    sorted_lens = np.asarray([lens[i] for i in sorted_idx], dtype=np.int32)

    # fused fc1 + ReLU + LSTM input projection (bf16 MXU, lane-dense 512 output).
    xg = fc1_gate_proj(padded.reshape(b * t_max, 800), prep)           # (B*T, 512)
    xg = xg.reshape(b, t_max, 4 * HP).transpose(1, 0, 2)               # (T, B, 512)

    # pad batch to 8 sublanes; padded rows get length 0 (never updated).
    bp = max(8, int(((b + 7) // 8) * 8))
    xg = jnp.pad(xg, ((0, 0), (0, bp - b), (0, 0)))
    lens_arr = jnp.zeros((bp, 1), jnp.int32).at[:b, 0].set(
        jnp.asarray(sorted_lens, jnp.int32))

    out = lstm_fc2(xg, prep["w_hh"], lens_arr, prep["fc2_w"], prep["fc2_b"])  # (Bp, 8)
    return out[:b], sorted_idx


# ----------------------------- pure-JAX reference ----------------------------

def ref_forward(seq_list, params):
    """Same math as the kernel path (bf16 GEMM operands, f32 accumulation)."""
    bf = jnp.bfloat16
    lens = [int(s.shape[0]) for s in seq_list]
    b = len(seq_list)
    x = jnp.concatenate(seq_list, axis=0)
    f_total = x.shape[0]

    def conv(x, w, bias):
        y = lax.conv_general_dilated(x, w, (1, 1), "VALID",
                                     dimension_numbers=("NCHW", "OIHW", "NCHW"),
                                     precision=lax.Precision.HIGHEST)
        return jax.nn.relu(y + bias.reshape(1, -1, 1, 1))

    x = maxpool2x2_nchw(conv(x, params["conv1_w"], params["conv1_b"]))
    x = maxpool2x2_nchw(conv(x, params["conv2_w"], params["conv2_b"]))
    x = x.reshape(f_total, 800)

    sorted_idx = np.argsort(-np.asarray(lens))
    starts = np.concatenate([[0], np.cumsum(lens)]).astype(np.int64)
    t_max = max(lens)
    padded = []
    for idx in sorted_idx:
        s0 = int(starts[idx])
        li = lens[idx]
        padded.append(jnp.pad(x[s0:s0 + li], ((0, t_max - li), (0, 0))))
    padded = jnp.stack(padded)                               # (B, T, 800)
    sorted_lens = jnp.asarray([lens[i] for i in sorted_idx], jnp.int32)

    feats = jax.nn.relu(
        jnp.dot(padded.reshape(b * t_max, 800).astype(bf),
                params["fc1_w"].T.astype(bf),
                preferred_element_type=jnp.float32) + params["fc1_b"])
    xg = (jnp.dot(feats.astype(bf), params["w_ih"].T.astype(bf),
                  preferred_element_type=jnp.float32)
          + (params["b_ih"] + params["b_hh"]))
    xg = xg.reshape(b, t_max, 4 * H_LSTM)

    whh_t = params["w_hh"].T.astype(bf)
    h = jnp.zeros((b, H_LSTM), jnp.float32)
    c = jnp.zeros((b, H_LSTM), jnp.float32)
    for t in range(t_max):
        gates = xg[:, t, :] + jnp.dot(h.astype(bf), whh_t,
                                      preferred_element_type=jnp.float32)
        i = jax.nn.sigmoid(gates[:, 0:H_LSTM])
        f = jax.nn.sigmoid(gates[:, H_LSTM:2 * H_LSTM])
        g = jnp.tanh(gates[:, 2 * H_LSTM:3 * H_LSTM])
        o = jax.nn.sigmoid(gates[:, 3 * H_LSTM:4 * H_LSTM])
        c_new = f * c + i * g
        h_new = o * jnp.tanh(c_new)
        mask = sorted_lens[:, None] > t
        c = jnp.where(mask, c_new, c)
        h = jnp.where(mask, h_new, h)
    out = jnp.dot(h.astype(bf), params["fc2_w"].T.astype(bf),
                  preferred_element_type=jnp.float32) + params["fc2_b"]
    return out, sorted_idx


# ----------------------------------- main ------------------------------------

if __name__ == "__main__":
    key = jax.random.PRNGKey(0)
    k1, k2, kp = jax.random.split(key, 3)
    # Batch of 2 variable-length sequences of 46x46 single-channel images
    # (46x46 is forced by the 8*10*10 fc1 input of the reference module).
    seq0 = jax.random.normal(k1, (3, 1, 46, 46), jnp.float32)
    seq1 = jax.random.normal(k2, (5, 1, 46, 46), jnp.float32)
    seqs = [seq0, seq1]

    params = init_params(kp)
    prep = prepare_params(params)          # one-time transposes / padding / bf16

    out, sorted_idx = sfer_lstm_forward(seqs, prep)
    out = jax.block_until_ready(out)

    ref_out, ref_idx = ref_forward(seqs, params)
    ref_out = jax.block_until_ready(ref_out)

    np.testing.assert_allclose(np.asarray(out), np.asarray(ref_out),
                               rtol=2e-3, atol=2e-3)
    assert list(sorted_idx) == list(ref_idx)
    print("KERNEL_OK")
</pallas_src>

<mosaic_0001>
module attributes {stable_mosaic.version = 11 : i64} {
  func.func @_conv3x3_relu_kernel(%arg0: i32, %arg1: memref<1x1x46x46xf32, #tpu.memory_space<vmem>>, %arg2: memref<72xf32, #tpu.memory_space<smem>>, %arg3: memref<8xf32, #tpu.memory_space<smem>>, %arg4: memref<1x8x44x44xf32, #tpu.memory_space<vmem>>) attributes {dimension_semantics = [#tpu.dimension_semantics<parallel>], iteration_bounds = array<i64: 8>, scalar_prefetch = 0 : i64, scratch_operands = 0 : i64, tpu.core_type = #tpu.core_type<tc>, window_params = [{transform_indices = @transform_0, window_bounds = array<i64: 1, 1, 46, 46>}, {transform_indices = @transform_1, window_bounds = array<i64: 72>}, {transform_indices = @transform_2, window_bounds = array<i64: 8>}, {transform_indices = @transform_3, window_bounds = array<i64: 1, 8, 44, 44>}]} {
    %cst = arith.constant 0.000000e+00 : f32
    %0 = vector.broadcast %cst : f32 to vector<44x44xf32>
    %cst_0 = arith.constant 0.000000e+00 : f32
    %1 = vector.broadcast %cst_0 : f32 to vector<44x44xf32>
    %cst_1 = arith.constant 0.000000e+00 : f32
    %2 = vector.broadcast %cst_1 : f32 to vector<44x44xf32>
    %cst_2 = arith.constant 0.000000e+00 : f32
    %3 = vector.broadcast %cst_2 : f32 to vector<44x44xf32>
    %cst_3 = arith.constant 0.000000e+00 : f32
    %4 = vector.broadcast %cst_3 : f32 to vector<44x44xf32>
    %cst_4 = arith.constant 0.000000e+00 : f32
    %5 = vector.broadcast %cst_4 : f32 to vector<44x44xf32>
    %cst_5 = arith.constant 0.000000e+00 : f32
    %6 = vector.broadcast %cst_5 : f32 to vector<44x44xf32>
    %cst_6 = arith.constant 0.000000e+00 : f32
    %7 = vector.broadcast %cst_6 : f32 to vector<44x44xf32>
    %c0 = arith.constant 0 : index
    %c0_7 = arith.constant 0 : index
    %c0_8 = arith.constant 0 : index
    %c0_9 = arith.constant 0 : index
    %8 = vector.load %arg1[%c0, %c0_7, %c0_8, %c0_9] : memref<1x1x46x46xf32, #tpu.memory_space<vmem>>, vector<1x1x44x44xf32>
    %9 = vector.shape_cast %8 : vector<1x1x44x44xf32> to vector<44x44xf32>
    %c0_10 = arith.constant 0 : index
    %10 = memref.load %arg2[%c0_10] : memref<72xf32, #tpu.memory_space<smem>>
    %11 = vector.broadcast %10 : f32 to vector<44x44xf32>
    %12 = arith.mulf %11, %9 : vector<44x44xf32>
    %13 = arith.addf %0, %12 : vector<44x44xf32>
    %c9 = arith.constant 9 : index
    %14 = memref.load %arg2[%c9] : memref<72xf32, #tpu.memory_space<smem>>
    %15 = vector.broadcast %14 : f32 to vector<44x44xf32>
    %16 = arith.mulf %15, %9 : vector<44x44xf32>
    %17 = arith.addf %1, %16 : vector<44x44xf32>
    %c18 = arith.constant 18 : index
    %18 = memref.load %arg2[%c18] : memref<72xf32, #tpu.memory_space<smem>>
    %19 = vector.broadcast %18 : f32 to vector<44x44xf32>
    %20 = arith.mulf %19, %9 : vector<44x44xf32>
    %21 = arith.addf %2, %20 : vector<44x44xf32>
    %c27 = arith.constant 27 : index
    %22 = memref.load %arg2[%c27] : memref<72xf32, #tpu.memory_space<smem>>
    %23 = vector.broadcast %22 : f32 to vector<44x44xf32>
    %24 = arith.mulf %23, %9 : vector<44x44xf32>
    %25 = arith.addf %3, %24 : vector<44x44xf32>
    %c36 = arith.constant 36 : index
    %26 = memref.load %arg2[%c36] : memref<72xf32, #tpu.memory_space<smem>>
    %27 = vector.broadcast %26 : f32 to vector<44x44xf32>
    %28 = arith.mulf %27, %9 : vector<44x44xf32>
    %29 = arith.addf %4, %28 : vector<44x44xf32>
    %c45 = arith.constant 45 : index
    %30 = memref.load %arg2[%c45] : memref<72xf32, #tpu.memory_space<smem>>
    %31 = vector.broadcast %30 : f32 to vector<44x44xf32>
    %32 = arith.mulf %31, %9 : vector<44x44xf32>
    %33 = arith.addf %5, %32 : vector<44x44xf32>
    %c54 = arith.constant 54 : index
    %34 = memref.load %arg2[%c54] : memref<72xf32, #tpu.memory_space<smem>>
    %35 = vector.broadcast %34 : f32 to vector<44x44xf32>
    %36 = arith.mulf %35, %9 : vector<44x44xf32>
    %37 = arith.addf %6, %36 : vector<44x44xf32>
    %c63 = arith.constant 63 : index
    %38 = memref.load %arg2[%c63] : memref<72xf32, #tpu.memory_space<smem>>
    %39 = vector.broadcast %38 : f32 to vector<44x44xf32>
    %40 = arith.mulf %39, %9 : vector<44x44xf32>
    %41 = arith.addf %7, %40 : vector<44x44xf32>
    %c0_11 = arith.constant 0 : index
    %c0_12 = arith.constant 0 : index
    %c0_13 = arith.constant 0 : index
    %c1 = arith.constant 1 : index
    %42 = vector.load %arg1[%c0_11, %c0_12, %c0_13, %c1] : memref<1x1x46x46xf32, #tpu.memory_space<vmem>>, vector<1x1x44x44xf32>
    %43 = vector.shape_cast %42 : vector<1x1x44x44xf32> to vector<44x44xf32>
    %c1_14 = arith.constant 1 : index
    %44 = memref.load %arg2[%c1_14] : memref<72xf32, #tpu.memory_space<smem>>
    %45 = vector.broadcast %44 : f32 to vector<44x44xf32>
    %46 = arith.mulf %45, %43 : vector<44x44xf32>
    %47 = arith.addf %13, %46 : vector<44x44xf32>
    %c10 = arith.constant 10 : index
    %48 = memref.load %arg2[%c10] : memref<72xf32, #tpu.memory_space<smem>>
    %49 = vector.broadcast %48 : f32 to vector<44x44xf32>
    %50 = arith.mulf %49, %43 : vector<44x44xf32>
    %51 = arith.addf %17, %50 : vector<44x44xf32>
    %c19 = arith.constant 19 : index
    %52 = memref.load %arg2[%c19] : memref<72xf32, #tpu.memory_space<smem>>
    %53 = vector.broadcast %52 : f32 to vector<44x44xf32>
    %54 = arith.mulf %53, %43 : vector<44x44xf32>
    %55 = arith.addf %21, %54 : vector<44x44xf32>
    %c28 = arith.constant 28 : index
    %56 = memref.load %arg2[%c28] : memref<72xf32, #tpu.memory_space<smem>>
    %57 = vector.broadcast %56 : f32 to vector<44x44xf32>
    %58 = arith.mulf %57, %43 : vector<44x44xf32>
    %59 = arith.addf %25, %58 : vector<44x44xf32>
    %c37 = arith.constant 37 : index
    %60 = memref.load %arg2[%c37] : memref<72xf32, #tpu.memory_space<smem>>
    %61 = vector.broadcast %60 : f32 to vector<44x44xf32>
    %62 = arith.mulf %61, %43 : vector<44x44xf32>
    %63 = arith.addf %29, %62 : vector<44x44xf32>
    %c46 = arith.constant 46 : index
    %64 = memref.load %arg2[%c46] : memref<72xf32, #tpu.memory_space<smem>>
    %65 = vector.broadcast %64 : f32 to vector<44x44xf32>
    %66 = arith.mulf %65, %43 : vector<44x44xf32>
    %67 = arith.addf %33, %66 : vector<44x44xf32>
    %c55 = arith.constant 55 : index
    %68 = memref.load %arg2[%c55] : memref<72xf32, #tpu.memory_space<smem>>
    %69 = vector.broadcast %68 : f32 to vector<44x44xf32>
    %70 = arith.mulf %69, %43 : vector<44x44xf32>
    %71 = arith.addf %37, %70 : vector<44x44xf32>
    %c64 = arith.constant 64 : index
    %72 = memref.load %arg2[%c64] : memref<72xf32, #tpu.memory_space<smem>>
    %73 = vector.broadcast %72 : f32 to vector<44x44xf32>
    %74 = arith.mulf %73, %43 : vector<44x44xf32>
    %75 = arith.addf %41, %74 : vector<44x44xf32>
    %c0_15 = arith.constant 0 : index
    %c0_16 = arith.constant 0 : index
    %c0_17 = arith.constant 0 : index
    %c2 = arith.constant 2 : index
    %76 = vector.load %arg1[%c0_15, %c0_16, %c0_17, %c2] : memref<1x1x46x46xf32, #tpu.memory_space<vmem>>, vector<1x1x44x44xf32>
    %77 = vector.shape_cast %76 : vector<1x1x44x44xf32> to vector<44x44xf32>
    %c2_18 = arith.constant 2 : index
    %78 = memref.load %arg2[%c2_18] : memref<72xf32, #tpu.memory_space<smem>>
    %79 = vector.broadcast %78 : f32 to vector<44x44xf32>
    %80 = arith.mulf %79, %77 : vector<44x44xf32>
    %81 = arith.addf %47, %80 : vector<44x44xf32>
    %c11 = arith.constant 11 : index
    %82 = memref.load %arg2[%c11] : memref<72xf32, #tpu.memory_space<smem>>
    %83 = vector.broadcast %82 : f32 to vector<44x44xf32>
    %84 = arith.mulf %83, %77 : vector<44x44xf32>
    %85 = arith.addf %51, %84 : vector<44x44xf32>
    %c20 = arith.constant 20 : index
    %86 = memref.load %arg2[%c20] : memref<72xf32, #tpu.memory_space<smem>>
    %87 = vector.broadcast %86 : f32 to vector<44x44xf32>
    %88 = arith.mulf %87, %77 : vector<44x44xf32>
    %89 = arith.addf %55, %88 : vector<44x44xf32>
    %c29 = arith.constant 29 : index
    %90 = memref.load %arg2[%c29] : memref<72xf32, #tpu.memory_space<smem>>
    %91 = vector.broadcast %90 : f32 to vector<44x44xf32>
    %92 = arith.mulf %91, %77 : vector<44x44xf32>
    %93 = arith.addf %59, %92 : vector<44x44xf32>
    %c38 = arith.constant 38 : index
    %94 = memref.load %arg2[%c38] : memref<72xf32, #tpu.memory_space<smem>>
    %95 = vector.broadcast %94 : f32 to vector<44x44xf32>
    %96 = arith.mulf %95, %77 : vector<44x44xf32>
    %97 = arith.addf %63, %96 : vector<44x44xf32>
    %c47 = arith.constant 47 : index
    %98 = memref.load %arg2[%c47] : memref<72xf32, #tpu.memory_space<smem>>
    %99 = vector.broadcast %98 : f32 to vector<44x44xf32>
    %100 = arith.mulf %99, %77 : vector<44x44xf32>
    %101 = arith.addf %67, %100 : vector<44x44xf32>
    %c56 = arith.constant 56 : index
    %102 = memref.load %arg2[%c56] : memref<72xf32, #tpu.memory_space<smem>>
    %103 = vector.broadcast %102 : f32 to vector<44x44xf32>
    %104 = arith.mulf %103, %77 : vector<44x44xf32>
    %105 = arith.addf %71, %104 : vector<44x44xf32>
    %c65 = arith.constant 65 : index
    %106 = memref.load %arg2[%c65] : memref<72xf32, #tpu.memory_space<smem>>
    %107 = vector.broadcast %106 : f32 to vector<44x44xf32>
    %108 = arith.mulf %107, %77 : vector<44x44xf32>
    %109 = arith.addf %75, %108 : vector<44x44xf32>
    %c0_19 = arith.constant 0 : index
    %c0_20 = arith.constant 0 : index
    %c1_21 = arith.constant 1 : index
    %c0_22 = arith.constant 0 : index
    %110 = vector.load %arg1[%c0_19, %c0_20, %c1_21, %c0_22] : memref<1x1x46x46xf32, #tpu.memory_space<vmem>>, vector<1x1x44x44xf32>
    %111 = vector.shape_cast %110 : vector<1x1x44x44xf32> to vector<44x44xf32>
    %c3 = arith.constant 3 : index
    %112 = memref.load %arg2[%c3] : memref<72xf32, #tpu.memory_space<smem>>
    %113 = vector.broadcast %112 : f32 to vector<44x44xf32>
    %114 = arith.mulf %113, %111 : vector<44x44xf32>
    %115 = arith.addf %81, %114 : vector<44x44xf32>
    %c12 = arith.constant 12 : index
    %116 = memref.load %arg2[%c12] : memref<72xf32, #tpu.memory_space<smem>>
    %117 = vector.broadcast %116 : f32 to vector<44x44xf32>
    %118 = arith.mulf %117, %111 : vector<44x44xf32>
    %119 = arith.addf %85, %118 : vector<44x44xf32>
    %c21 = arith.constant 21 : index
    %120 = memref.load %arg2[%c21] : memref<72xf32, #tpu.memory_space<smem>>
    %121 = vector.broadcast %120 : f32 to vector<44x44xf32>
    %122 = arith.mulf %121, %111 : vector<44x44xf32>
    %123 = arith.addf %89, %122 : vector<44x44xf32>
    %c30 = arith.constant 30 : index
    %124 = memref.load %arg2[%c30] : memref<72xf32, #tpu.memory_space<smem>>
    %125 = vector.broadcast %124 : f32 to vector<44x44xf32>
    %126 = arith.mulf %125, %111 : vector<44x44xf32>
    %127 = arith.addf %93, %126 : vector<44x44xf32>
    %c39 = arith.constant 39 : index
    %128 = memref.load %arg2[%c39] : memref<72xf32, #tpu.memory_space<smem>>
    %129 = vector.broadcast %128 : f32 to vector<44x44xf32>
    %130 = arith.mulf %129, %111 : vector<44x44xf32>
    %131 = arith.addf %97, %130 : vector<44x44xf32>
    %c48 = arith.constant 48 : index
    %132 = memref.load %arg2[%c48] : memref<72xf32, #tpu.memory_space<smem>>
    %133 = vector.broadcast %132 : f32 to vector<44x44xf32>
    %134 = arith.mulf %133, %111 : vector<44x44xf32>
    %135 = arith.addf %101, %134 : vector<44x44xf32>
    %c57 = arith.constant 57 : index
    %136 = memref.load %arg2[%c57] : memref<72xf32, #tpu.memory_space<smem>>
    %137 = vector.broadcast %136 : f32 to vector<44x44xf32>
    %138 = arith.mulf %137, %111 : vector<44x44xf32>
    %139 = arith.addf %105, %138 : vector<44x44xf32>
    %c66 = arith.constant 66 : index
    %140 = memref.load %arg2[%c66] : memref<72xf32, #tpu.memory_space<smem>>
    %141 = vector.broadcast %140 : f32 to vector<44x44xf32>
    %142 = arith.mulf %141, %111 : vector<44x44xf32>
    %143 = arith.addf %109, %142 : vector<44x44xf32>
    %c0_23 = arith.constant 0 : index
    %c0_24 = arith.constant 0 : index
    %c1_25 = arith.constant 1 : index
    %c1_26 = arith.constant 1 : index
    %144 = vector.load %arg1[%c0_23, %c0_24, %c1_25, %c1_26] : memref<1x1x46x46xf32, #tpu.memory_space<vmem>>, vector<1x1x44x44xf32>
    %145 = vector.shape_cast %144 : vector<1x1x44x44xf32> to vector<44x44xf32>
    %c4 = arith.constant 4 : index
    %146 = memref.load %arg2[%c4] : memref<72xf32, #tpu.memory_space<smem>>
    %147 = vector.broadcast %146 : f32 to vector<44x44xf32>
    %148 = arith.mulf %147, %145 : vector<44x44xf32>
    %149 = arith.addf %115, %148 : vector<44x44xf32>
    %c13 = arith.constant 13 : index
    %150 = memref.load %arg2[%c13] : memref<72xf32, #tpu.memory_space<smem>>
    %151 = vector.broadcast %150 : f32 to vector<44x44xf32>
    %152 = arith.mulf %151, %145 : vector<44x44xf32>
    %153 = arith.addf %119, %152 : vector<44x44xf32>
    %c22 = arith.constant 22 : index
    %154 = memref.load %arg2[%c22] : memref<72xf32, #tpu.memory_space<smem>>
    %155 = vector.broadcast %154 : f32 to vector<44x44xf32>
    %156 = arith.mulf %155, %145 : vector<44x44xf32>
    %157 = arith.addf %123, %156 : vector<44x44xf32>
    %c31 = arith.constant 31 : index
    %158 = memref.load %arg2[%c31] : memref<72xf32, #tpu.memory_space<smem>>
    %159 = vector.broadcast %158 : f32 to vector<44x44xf32>
    %160 = arith.mulf %159, %145 : vector<44x44xf32>
    %161 = arith.addf %127, %160 : vector<44x44xf32>
    %c40 = arith.constant 40 : index
    %162 = memref.load %arg2[%c40] : memref<72xf32, #tpu.memory_space<smem>>
    %163 = vector.broadcast %162 : f32 to vector<44x44xf32>
    %164 = arith.mulf %163, %145 : vector<44x44xf32>
    %165 = arith.addf %131, %164 : vector<44x44xf32>
    %c49 = arith.constant 49 : index
    %166 = memref.load %arg2[%c49] : memref<72xf32, #tpu.memory_space<smem>>
    %167 = vector.broadcast %166 : f32 to vector<44x44xf32>
    %168 = arith.mulf %167, %145 : vector<44x44xf32>
    %169 = arith.addf %135, %168 : vector<44x44xf32>
    %c58 = arith.constant 58 : index
    %170 = memref.load %arg2[%c58] : memref<72xf32, #tpu.memory_space<smem>>
    %171 = vector.broadcast %170 : f32 to vector<44x44xf32>
    %172 = arith.mulf %171, %145 : vector<44x44xf32>
    %173 = arith.addf %139, %172 : vector<44x44xf32>
    %c67 = arith.constant 67 : index
    %174 = memref.load %arg2[%c67] : memref<72xf32, #tpu.memory_space<smem>>
    %175 = vector.broadcast %174 : f32 to vector<44x44xf32>
    %176 = arith.mulf %175, %145 : vector<44x44xf32>
    %177 = arith.addf %143, %176 : vector<44x44xf32>
    %c0_27 = arith.constant 0 : index
    %c0_28 = arith.constant 0 : index
    %c1_29 = arith.constant 1 : index
    %c2_30 = arith.constant 2 : index
    %178 = vector.load %arg1[%c0_27, %c0_28, %c1_29, %c2_30] : memref<1x1x46x46xf32, #tpu.memory_space<vmem>>, vector<1x1x44x44xf32>
    %179 = vector.shape_cast %178 : vector<1x1x44x44xf32> to vector<44x44xf32>
    %c5 = arith.constant 5 : index
    %180 = memref.load %arg2[%c5] : memref<72xf32, #tpu.memory_space<smem>>
    %181 = vector.broadcast %180 : f32 to vector<44x44xf32>
    %182 = arith.mulf %181, %179 : vector<44x44xf32>
    %183 = arith.addf %149, %182 : vector<44x44xf32>
    %c14 = arith.constant 14 : index
    %184 = memref.load %arg2[%c14] : memref<72xf32, #tpu.memory_space<smem>>
    %185 = vector.broadcast %184 : f32 to vector<44x44xf32>
    %186 = arith.mulf %185, %179 : vector<44x44xf32>
    %187 = arith.addf %153, %186 : vector<44x44xf32>
    %c23 = arith.constant 23 : index
    %188 = memref.load %arg2[%c23] : memref<72xf32, #tpu.memory_space<smem>>
    %189 = vector.broadcast %188 : f32 to vector<44x44xf32>
    %190 = arith.mulf %189, %179 : vector<44x44xf32>
    %191 = arith.addf %157, %190 : vector<44x44xf32>
    %c32 = arith.constant 32 : index
    %192 = memref.load %arg2[%c32] : memref<72xf32, #tpu.memory_space<smem>>
    %193 = vector.broadcast %192 : f32 to vector<44x44xf32>
    %194 = arith.mulf %193, %179 : vector<44x44xf32>
    %195 = arith.addf %161, %194 : vector<44x44xf32>
    %c41 = arith.constant 41 : index
    %196 = memref.load %arg2[%c41] : memref<72xf32, #tpu.memory_space<smem>>
    %197 = vector.broadcast %196 : f32 to vector<44x44xf32>
    %198 = arith.mulf %197, %179 : vector<44x44xf32>
    %199 = arith.addf %165, %198 : vector<44x44xf32>
    %c50 = arith.constant 50 : index
    %200 = memref.load %arg2[%c50] : memref<72xf32, #tpu.memory_space<smem>>
    %201 = vector.broadcast %200 : f32 to vector<44x44xf32>
    %202 = arith.mulf %201, %179 : vector<44x44xf32>
    %203 = arith.addf %169, %202 : vector<44x44xf32>
    %c59 = arith.constant 59 : index
    %204 = memref.load %arg2[%c59] : memref<72xf32, #tpu.memory_space<smem>>
    %205 = vector.broadcast %204 : f32 to vector<44x44xf32>
    %206 = arith.mulf %205, %179 : vector<44x44xf32>
    %207 = arith.addf %173, %206 : vector<44x44xf32>
    %c68 = arith.constant 68 : index
    %208 = memref.load %arg2[%c68] : memref<72xf32, #tpu.memory_space<smem>>
    %209 = vector.broadcast %208 : f32 to vector<44x44xf32>
    %210 = arith.mulf %209, %179 : vector<44x44xf32>
    %211 = arith.addf %177, %210 : vector<44x44xf32>
    %c0_31 = arith.constant 0 : index
    %c0_32 = arith.constant 0 : index
    %c2_33 = arith.constant 2 : index
    %c0_34 = arith.constant 0 : index
    %212 = vector.load %arg1[%c0_31, %c0_32, %c2_33, %c0_34] : memref<1x1x46x46xf32, #tpu.memory_space<vmem>>, vector<1x1x44x44xf32>
    %213 = vector.shape_cast %212 : vector<1x1x44x44xf32> to vector<44x44xf32>
    %c6 = arith.constant 6 : index
    %214 = memref.load %arg2[%c6] : memref<72xf32, #tpu.memory_space<smem>>
    %215 = vector.broadcast %214 : f32 to vector<44x44xf32>
    %216 = arith.mulf %215, %213 : vector<44x44xf32>
    %217 = arith.addf %183, %216 : vector<44x44xf32>
    %c15 = arith.constant 15 : index
    %218 = memref.load %arg2[%c15] : memref<72xf32, #tpu.memory_space<smem>>
    %219 = vector.broadcast %218 : f32 to vector<44x44xf32>
    %220 = arith.mulf %219, %213 : vector<44x44xf32>
    %221 = arith.addf %187, %220 : vector<44x44xf32>
    %c24 = arith.constant 24 : index
    %222 = memref.load %arg2[%c24] : memref<72xf32, #tpu.memory_space<smem>>
    %223 = vector.broadcast %222 : f32 to vector<44x44xf32>
    %224 = arith.mulf %223, %213 : vector<44x44xf32>
    %225 = arith.addf %191, %224 : vector<44x44xf32>
    %c33 = arith.constant 33 : index
    %226 = memref.load %arg2[%c33] : memref<72xf32, #tpu.memory_space<smem>>
    %227 = vector.broadcast %226 : f32 to vector<44x44xf32>
    %228 = arith.mulf %227, %213 : vector<44x44xf32>
    %229 = arith.addf %195, %228 : vector<44x44xf32>
    %c42 = arith.constant 42 : index
    %230 = memref.load %arg2[%c42] : memref<72xf32, #tpu.memory_space<smem>>
    %231 = vector.broadcast %230 : f32 to vector<44x44xf32>
    %232 = arith.mulf %231, %213 : vector<44x44xf32>
    %233 = arith.addf %199, %232 : vector<44x44xf32>
    %c51 = arith.constant 51 : index
    %234 = memref.load %arg2[%c51] : memref<72xf32, #tpu.memory_space<smem>>
    %235 = vector.broadcast %234 : f32 to vector<44x44xf32>
    %236 = arith.mulf %235, %213 : vector<44x44xf32>
    %237 = arith.addf %203, %236 : vector<44x44xf32>
    %c60 = arith.constant 60 : index
    %238 = memref.load %arg2[%c60] : memref<72xf32, #tpu.memory_space<smem>>
    %239 = vector.broadcast %238 : f32 to vector<44x44xf32>
    %240 = arith.mulf %239, %213 : vector<44x44xf32>
    %241 = arith.addf %207, %240 : vector<44x44xf32>
    %c69 = arith.constant 69 : index
    %242 = memref.load %arg2[%c69] : memref<72xf32, #tpu.memory_space<smem>>
    %243 = vector.broadcast %242 : f32 to vector<44x44xf32>
    %244 = arith.mulf %243, %213 : vector<44x44xf32>
    %245 = arith.addf %211, %244 : vector<44x44xf32>
    %c0_35 = arith.constant 0 : index
    %c0_36 = arith.constant 0 : index
    %c2_37 = arith.constant 2 : index
    %c1_38 = arith.constant 1 : index
    %246 = vector.load %arg1[%c0_35, %c0_36, %c2_37, %c1_38] : memref<1x1x46x46xf32, #tpu.memory_space<vmem>>, vector<1x1x44x44xf32>
    %247 = vector.shape_cast %246 : vector<1x1x44x44xf32> to vector<44x44xf32>
    %c7 = arith.constant 7 : index
    %248 = memref.load %arg2[%c7] : memref<72xf32, #tpu.memory_space<smem>>
    %249 = vector.broadcast %248 : f32 to vector<44x44xf32>
    %250 = arith.mulf %249, %247 : vector<44x44xf32>
    %251 = arith.addf %217, %250 : vector<44x44xf32>
    %c16 = arith.constant 16 : index
    %252 = memref.load %arg2[%c16] : memref<72xf32, #tpu.memory_space<smem>>
    %253 = vector.broadcast %252 : f32 to vector<44x44xf32>
    %254 = arith.mulf %253, %247 : vector<44x44xf32>
    %255 = arith.addf %221, %254 : vector<44x44xf32>
    %c25 = arith.constant 25 : index
    %256 = memref.load %arg2[%c25] : memref<72xf32, #tpu.memory_space<smem>>
    %257 = vector.broadcast %256 : f32 to vector<44x44xf32>
    %258 = arith.mulf %257, %247 : vector<44x44xf32>
    %259 = arith.addf %225, %258 : vector<44x44xf32>
    %c34 = arith.constant 34 : index
    %260 = memref.load %arg2[%c34] : memref<72xf32, #tpu.memory_space<smem>>
    %261 = vector.broadcast %260 : f32 to vector<44x44xf32>
    %262 = arith.mulf %261, %247 : vector<44x44xf32>
    %263 = arith.addf %229, %262 : vector<44x44xf32>
    %c43 = arith.constant 43 : index
    %264 = memref.load %arg2[%c43] : memref<72xf32, #tpu.memory_space<smem>>
    %265 = vector.broadcast %264 : f32 to vector<44x44xf32>
    %266 = arith.mulf %265, %247 : vector<44x44xf32>
    %267 = arith.addf %233, %266 : vector<44x44xf32>
    %c52 = arith.constant 52 : index
    %268 = memref.load %arg2[%c52] : memref<72xf32, #tpu.memory_space<smem>>
    %269 = vector.broadcast %268 : f32 to vector<44x44xf32>
    %270 = arith.mulf %269, %247 : vector<44x44xf32>
    %271 = arith.addf %237, %270 : vector<44x44xf32>
    %c61 = arith.constant 61 : index
    %272 = memref.load %arg2[%c61] : memref<72xf32, #tpu.memory_space<smem>>
    %273 = vector.broadcast %272 : f32 to vector<44x44xf32>
    %274 = arith.mulf %273, %247 : vector<44x44xf32>
    %275 = arith.addf %241, %274 : vector<44x44xf32>
    %c70 = arith.constant 70 : index
    %276 = memref.load %arg2[%c70] : memref<72xf32, #tpu.memory_space<smem>>
    %277 = vector.broadcast %276 : f32 to vector<44x44xf32>
    %278 = arith.mulf %277, %247 : vector<44x44xf32>
    %279 = arith.addf %245, %278 : vector<44x44xf32>
    %c0_39 = arith.constant 0 : index
    %c0_40 = arith.constant 0 : index
    %c2_41 = arith.constant 2 : index
    %c2_42 = arith.constant 2 : index
    %280 = vector.load %arg1[%c0_39, %c0_40, %c2_41, %c2_42] : memref<1x1x46x46xf32, #tpu.memory_space<vmem>>, vector<1x1x44x44xf32>
    %281 = vector.shape_cast %280 : vector<1x1x44x44xf32> to vector<44x44xf32>
    %c8 = arith.constant 8 : index
    %282 = memref.load %arg2[%c8] : memref<72xf32, #tpu.memory_space<smem>>
    %283 = vector.broadcast %282 : f32 to vector<44x44xf32>
    %284 = arith.mulf %283, %281 : vector<44x44xf32>
    %285 = arith.addf %251, %284 : vector<44x44xf32>
    %c17 = arith.constant 17 : index
    %286 = memref.load %arg2[%c17] : memref<72xf32, #tpu.memory_space<smem>>
    %287 = vector.broadcast %286 : f32 to vector<44x44xf32>
    %288 = arith.mulf %287, %281 : vector<44x44xf32>
    %289 = arith.addf %255, %288 : vector<44x44xf32>
    %c26 = arith.constant 26 : index
    %290 = memref.load %arg2[%c26] : memref<72xf32, #tpu.memory_space<smem>>
    %291 = vector.broadcast %290 : f32 to vector<44x44xf32>
    %292 = arith.mulf %291, %281 : vector<44x44xf32>
    %293 = arith.addf %259, %292 : vector<44x44xf32>
    %c35 = arith.constant 35 : index
    %294 = memref.load %arg2[%c35] : memref<72xf32, #tpu.memory_space<smem>>
    %295 = vector.broadcast %294 : f32 to vector<44x44xf32>
    %296 = arith.mulf %295, %281 : vector<44x44xf32>
    %297 = arith.addf %263, %296 : vector<44x44xf32>
    %c44 = arith.constant 44 : index
    %298 = memref.load %arg2[%c44] : memref<72xf32, #tpu.memory_space<smem>>
    %299 = vector.broadcast %298 : f32 to vector<44x44xf32>
    %300 = arith.mulf %299, %281 : vector<44x44xf32>
    %301 = arith.addf %267, %300 : vector<44x44xf32>
    %c53 = arith.constant 53 : index
    %302 = memref.load %arg2[%c53] : memref<72xf32, #tpu.memory_space<smem>>
    %303 = vector.broadcast %302 : f32 to vector<44x44xf32>
    %304 = arith.mulf %303, %281 : vector<44x44xf32>
    %305 = arith.addf %271, %304 : vector<44x44xf32>
    %c62 = arith.constant 62 : index
    %306 = memref.load %arg2[%c62] : memref<72xf32, #tpu.memory_space<smem>>
    %307 = vector.broadcast %306 : f32 to vector<44x44xf32>
    %308 = arith.mulf %307, %281 : vector<44x44xf32>
    %309 = arith.addf %275, %308 : vector<44x44xf32>
    %c71 = arith.constant 71 : index
    %310 = memref.load %arg2[%c71] : memref<72xf32, #tpu.memory_space<smem>>
    %311 = vector.broadcast %310 : f32 to vector<44x44xf32>
    %312 = arith.mulf %311, %281 : vector<44x44xf32>
    %313 = arith.addf %279, %312 : vector<44x44xf32>
    %c0_43 = arith.constant 0 : index
    %314 = memref.load %arg3[%c0_43] : memref<8xf32, #tpu.memory_space<smem>>
    %315 = vector.broadcast %314 : f32 to vector<44x44xf32>
    %316 = arith.addf %285, %315 : vector<44x44xf32>
    %cst_44 = arith.constant 0.000000e+00 : f32
    %317 = vector.broadcast %cst_44 : f32 to vector<44x44xf32>
    %318 = arith.maximumf %316, %317 : vector<44x44xf32>
    %c0_45 = arith.constant 0 : index
    %c0_46 = arith.constant 0 : index
    %c0_47 = arith.constant 0 : index
    %c0_48 = arith.constant 0 : index
    %319 = vector.load %arg4[%c0_45, %c0_46, %c0_47, %c0_48] : memref<1x8x44x44xf32, #tpu.memory_space<vmem>>, vector<1x1x44x44xf32>
    %320 = vector.shape_cast %319 : vector<1x1x44x44xf32> to vector<44x44xf32>
    %321 = vector.shape_cast %318 : vector<44x44xf32> to vector<1x1x44x44xf32>
    tpu.vector_store %arg4[%c0_45, %c0_46, %c0_47, %c0_48], %321 {strides = array<i32>} : memref<1x8x44x44xf32, #tpu.memory_space<vmem>>, vector<1x1x44x44xf32>,
    %c1_49 = arith.constant 1 : index
    %322 = memref.load %arg3[%c1_49] : memref<8xf32, #tpu.memory_space<smem>>
    %323 = vector.broadcast %322 : f32 to vector<44x44xf32>
    %324 = arith.addf %289, %323 : vector<44x44xf32>
    %cst_50 = arith.constant 0.000000e+00 : f32
    %325 = vector.broadcast %cst_50 : f32 to vector<44x44xf32>
    %326 = arith.maximumf %324, %325 : vector<44x44xf32>
    %c0_51 = arith.constant 0 : index
    %c1_52 = arith.constant 1 : index
    %c0_53 = arith.constant 0 : index
    %c0_54 = arith.constant 0 : index
    %327 = vector.load %arg4[%c0_51, %c1_52, %c0_53, %c0_54] : memref<1x8x44x44xf32, #tpu.memory_space<vmem>>, vector<1x1x44x44xf32>
    %328 = vector.shape_cast %327 : vector<1x1x44x44xf32> to vector<44x44xf32>
    %329 = vector.shape_cast %326 : vector<44x44xf32> to vector<1x1x44x44xf32>
    tpu.vector_store %arg4[%c0_51, %c1_52, %c0_53, %c0_54], %329 {strides = array<i32>} : memref<1x8x44x44xf32, #tpu.memory_space<vmem>>, vector<1x1x44x44xf32>,
    %c2_55 = arith.constant 2 : index
    %330 = memref.load %arg3[%c2_55] : memref<8xf32, #tpu.memory_space<smem>>
    %331 = vector.broadcast %330 : f32 to vector<44x44xf32>
    %332 = arith.addf %293, %331 : vector<44x44xf32>
    %cst_56 = arith.constant 0.000000e+00 : f32
    %333 = vector.broadcast %cst_56 : f32 to vector<44x44xf32>
    %334 = arith.maximumf %332, %333 : vector<44x44xf32>
    %c0_57 = arith.constant 0 : index
    %c2_58 = arith.constant 2 : index
    %c0_59 = arith.constant 0 : index
    %c0_60 = arith.constant 0 : index
    %335 = vector.load %arg4[%c0_57, %c2_58, %c0_59, %c0_60] : memref<1x8x44x44xf32, #tpu.memory_space<vmem>>, vector<1x1x44x44xf32>
    %336 = vector.shape_cast %335 : vector<1x1x44x44xf32> to vector<44x44xf32>
    %337 = vector.shape_cast %334 : vector<44x44xf32> to vector<1x1x44x44xf32>
    tpu.vector_store %arg4[%c0_57, %c2_58, %c0_59, %c0_60], %337 {strides = array<i32>} : memref<1x8x44x44xf32, #tpu.memory_space<vmem>>, vector<1x1x44x44xf32>,
    %c3_61 = arith.constant 3 : index
    %338 = memref.load %arg3[%c3_61] : memref<8xf32, #tpu.memory_space<smem>>
    %339 = vector.broadcast %338 : f32 to vector<44x44xf32>
    %340 = arith.addf %297, %339 : vector<44x44xf32>
    %cst_62 = arith.constant 0.000000e+00 : f32
    %341 = vector.broadcast %cst_62 : f32 to vector<44x44xf32>
    %342 = arith.maximumf %340, %341 : vector<44x44xf32>
    %c0_63 = arith.constant 0 : index
    %c3_64 = arith.constant 3 : index
    %c0_65 = arith.constant 0 : index
    %c0_66 = arith.constant 0 : index
    %343 = vector.load %arg4[%c0_63, %c3_64, %c0_65, %c0_66] : memref<1x8x44x44xf32, #tpu.memory_space<vmem>>, vector<1x1x44x44xf32>
    %344 = vector.shape_cast %343 : vector<1x1x44x44xf32> to vector<44x44xf32>
    %345 = vector.shape_cast %342 : vector<44x44xf32> to vector<1x1x44x44xf32>
    tpu.vector_store %arg4[%c0_63, %c3_64, %c0_65, %c0_66], %345 {strides = array<i32>} : memref<1x8x44x44xf32, #tpu.memory_space<vmem>>, vector<1x1x44x44xf32>,
    %c4_67 = arith.constant 4 : index
    %346 = memref.load %arg3[%c4_67] : memref<8xf32, #tpu.memory_space<smem>>
    %347 = vector.broadcast %346 : f32 to vector<44x44xf32>
    %348 = arith.addf %301, %347 : vector<44x44xf32>
    %cst_68 = arith.constant 0.000000e+00 : f32
    %349 = vector.broadcast %cst_68 : f32 to vector<44x44xf32>
    %350 = arith.maximumf %348, %349 : vector<44x44xf32>
    %c0_69 = arith.constant 0 : index
    %c4_70 = arith.constant 4 : index
    %c0_71 = arith.constant 0 : index
    %c0_72 = arith.constant 0 : index
    %351 = vector.load %arg4[%c0_69, %c4_70, %c0_71, %c0_72] : memref<1x8x44x44xf32, #tpu.memory_space<vmem>>, vector<1x1x44x44xf32>
    %352 = vector.shape_cast %351 : vector<1x1x44x44xf32> to vector<44x44xf32>
    %353 = vector.shape_cast %350 : vector<44x44xf32> to vector<1x1x44x44xf32>
    tpu.vector_store %arg4[%c0_69, %c4_70, %c0_71, %c0_72], %353 {strides = array<i32>} : memref<1x8x44x44xf32, #tpu.memory_space<vmem>>, vector<1x1x44x44xf32>,
    %c5_73 = arith.constant 5 : index
    %354 = memref.load %arg3[%c5_73] : memref<8xf32, #tpu.memory_space<smem>>
    %355 = vector.broadcast %354 : f32 to vector<44x44xf32>
    %356 = arith.addf %305, %355 : vector<44x44xf32>
    %cst_74 = arith.constant 0.000000e+00 : f32
    %357 = vector.broadcast %cst_74 : f32 to vector<44x44xf32>
    %358 = arith.maximumf %356, %357 : vector<44x44xf32>
    %c0_75 = arith.constant 0 : index
    %c5_76 = arith.constant 5 : index
    %c0_77 = arith.constant 0 : index
    %c0_78 = arith.constant 0 : index
    %359 = vector.load %arg4[%c0_75, %c5_76, %c0_77, %c0_78] : memref<1x8x44x44xf32, #tpu.memory_space<vmem>>, vector<1x1x44x44xf32>
    %360 = vector.shape_cast %359 : vector<1x1x44x44xf32> to vector<44x44xf32>
    %361 = vector.shape_cast %358 : vector<44x44xf32> to vector<1x1x44x44xf32>
    tpu.vector_store %arg4[%c0_75, %c5_76, %c0_77, %c0_78], %361 {strides = array<i32>} : memref<1x8x44x44xf32, #tpu.memory_space<vmem>>, vector<1x1x44x44xf32>,
    %c6_79 = arith.constant 6 : index
    %362 = memref.load %arg3[%c6_79] : memref<8xf32, #tpu.memory_space<smem>>
    %363 = vector.broadcast %362 : f32 to vector<44x44xf32>
    %364 = arith.addf %309, %363 : vector<44x44xf32>
    %cst_80 = arith.constant 0.000000e+00 : f32
    %365 = vector.broadcast %cst_80 : f32 to vector<44x44xf32>
    %366 = arith.maximumf %364, %365 : vector<44x44xf32>
    %c0_81 = arith.constant 0 : index
    %c6_82 = arith.constant 6 : index
    %c0_83 = arith.constant 0 : index
    %c0_84 = arith.constant 0 : index
    %367 = vector.load %arg4[%c0_81, %c6_82, %c0_83, %c0_84] : memref<1x8x44x44xf32, #tpu.memory_space<vmem>>, vector<1x1x44x44xf32>
    %368 = vector.shape_cast %367 : vector<1x1x44x44xf32> to vector<44x44xf32>
    %369 = vector.shape_cast %366 : vector<44x44xf32> to vector<1x1x44x44xf32>
    tpu.vector_store %arg4[%c0_81, %c6_82, %c0_83, %c0_84], %369 {strides = array<i32>} : memref<1x8x44x44xf32, #tpu.memory_space<vmem>>, vector<1x1x44x44xf32>,
    %c7_85 = arith.constant 7 : index
    %370 = memref.load %arg3[%c7_85] : memref<8xf32, #tpu.memory_space<smem>>
    %371 = vector.broadcast %370 : f32 to vector<44x44xf32>
    %372 = arith.addf %313, %371 : vector<44x44xf32>
    %cst_86 = arith.constant 0.000000e+00 : f32
    %373 = vector.broadcast %cst_86 : f32 to vector<44x44xf32>
    %374 = arith.maximumf %372, %373 : vector<44x44xf32>
    %c0_87 = arith.constant 0 : index
    %c7_88 = arith.constant 7 : index
    %c0_89 = arith.constant 0 : index
    %c0_90 = arith.constant 0 : index
    %375 = vector.load %arg4[%c0_87, %c7_88, %c0_89, %c0_90] : memref<1x8x44x44xf32, #tpu.memory_space<vmem>>, vector<1x1x44x44xf32>
    %376 = vector.shape_cast %375 : vector<1x1x44x44xf32> to vector<44x44xf32>
    %377 = vector.shape_cast %374 : vector<44x44xf32> to vector<1x1x44x44xf32>
    tpu.vector_store %arg4[%c0_87, %c7_88, %c0_89, %c0_90], %377 {strides = array<i32>} : memref<1x8x44x44xf32, #tpu.memory_space<vmem>>, vector<1x1x44x44xf32>,
    return
  }
  func.func @transform_0(%arg0: i32) -> (i32, i32, i32, i32) {
    %c0_i32 = arith.constant 0 : i32
    %c0_i32_0 = arith.constant 0 : i32
    %c0_i32_1 = arith.constant 0 : i32
    %c0_i32_2 = arith.constant 0 : i32
    return %arg0, %c0_i32, %c0_i32_0, %c0_i32_1 : i32, i32, i32, i32
  }
  func.func @transform_1(%arg0: i32) -> i32 {
    %c0_i32 = arith.constant 0 : i32
    %c0_i32_0 = arith.constant 0 : i32
    return %c0_i32 : i32
  }
  func.func @transform_2(%arg0: i32) -> i32 {
    %c0_i32 = arith.constant 0 : i32
    %c0_i32_0 = arith.constant 0 : i32
    return %c0_i32 : i32
  }
  func.func @transform_3(%arg0: i32) -> (i32, i32, i32, i32) {
    %c0_i32 = arith.constant 0 : i32
    %c0_i32_0 = arith.constant 0 : i32
    %c0_i32_1 = arith.constant 0 : i32
    %c0_i32_2 = arith.constant 0 : i32
    return %arg0, %c0_i32, %c0_i32_0, %c0_i32_1 : i32, i32, i32, i32
  }
}

</mosaic_0001>

<bundles_post_ra>
// kernel: tpu_custom_call.1
= control target key start
LH: loop header
LB: loop body
LE: loop exit
PB: predicated region body
PF: predicated region fallthrough
CT: control target
= control target key end

     0   :  { %8 = vsyncpa [#allocation3], 0  ;;  %s5411_s0 = inlined_call_operand.vmem [shape: f32[8,1,46,46], index: 0, kind: input, shape index: {}]   ;;  %s5412_s1 = inlined_call_operand.hbm [shape: f32[72], index: 1, kind: input, shape index: {}]   ;;  %s5413_s2 = inlined_call_operand.hbm [shape: f32[8], index: 2, kind: input, shape index: {}]   ;;  %s5414_s3 = inlined_call_operand.vmem [shape: f32[8,8,44,44], index: 3, kind: output, shape index: {}]  }
   0x1   :  { %9 = vsyncpa [#allocation5], 0  ;;  %s2870_s12 = smov 0  }
   0x2 LB: > { %s2876_s13 = sadd.s32 4294967295, %s2844_s12   ;;  %p2620_p0 = scmp.ge.s32.totalorder %s2844_s12, 1  ;;  %s2844_s12 = sphi %s2870_s12, %s15_s12  }
   0x3   : > { %p114_p1 = scmp.lt.s32.totalorder %s2844_s12, 9  ;;  %p2768_p3 = scmp.eq.s32.totalorder %s2876_s13, 0 }
   0x4   : > { %s2804_s18 = scalar_lea.hbm %s5412_s1, 16 }
   0x5   : > { %p2880_p2 = pnand %p2620_p0, %p114_p1  ;;  %p2805_p6 = scmp.ne.s32.totalorder %s5412_s1, %s2804_s18 }
   0x6   : > { %p2811_p10 = scmp.lt.u32.totalorder %s2804_s18, %s5412_s1 }
   0x7   : > { %p2761_p4 = pneg %p2880_p2 }
   0x9   : > { %p2889_p5 = pnand %p2768_p3, %p2761_p4 }
   0xb   : > { %p2806_p7 = pneg %p2889_p5 }
   0xd   : > { %p2807_p8 = pnand %p2806_p7, %p2805_p6 }
   0xf   : > { %p2808_p9 = pneg %p2807_p8 }
  0x11   : > { %p2813_p11 = pnand %p2811_p10, %p2808_p9 }
  0x13   : > { %2816 = shalt.err (!%p2813_p11)
}
  0x14   : > { %s2846_s23 = smov [#allocation2]   ;;  %s2817_s28 = scalar_lea.hbm %s5413_s2, 16 }
  0x15   : > { %2764 = dma.hbm_to_smem (!%p2889_p5), %s5412_s1, 16, %s2846_s23, [#allocation3]  }
  0x16   : > { %p2818_p12 = scmp.ne.s32.totalorder %s5413_s2, %s2817_s28  ;;  %p2824_p1 = scmp.lt.u32.totalorder %s2817_s28, %s5413_s2 }
  0x18   : > { %p2820_p13 = pnand %p2818_p12, %p2806_p7 }
  0x1a   : > { %p2821_p0 = pneg %p2820_p13 }
  0x1c   : > { %p2826_p4 = pnand %p2824_p1, %p2821_p0 }
  0x1e   : > { %2829 = shalt.err (!%p2826_p4)
}
  0x1f   : > { %s2847_s6 = smov [#allocation4]   ;;  %155 = sbr.rel (%p2880_p2) target bundleno = 768 (0x300), region = 32 }
  0x20   : > { %2767 = dma.hbm_to_smem (!%p2889_p5), %s5413_s2, 16, %s2847_s6, [#allocation5]  }
  0x26   : > { %2835 = dma.done.wait (%p2768_p3), [#allocation3], 16  }
  0x27   : > { %2837 = vsyncadd (%p2768_p3), [#allocation3], 4294967280 }
  0x28   : > { %2839 = dma.done.wait (%p2768_p3), [#allocation5], 16  }
  0x29   : > { %2841 = vsyncadd (%p2768_p3), [#allocation5], 4294967280 }
  0x2a   : > { %165 = sfence }
  0x2b   : > { %p184_p6 = scmp.lt.s32.totalorder %s2876_s13, 7  ;;  %s2636_s9 = sld [smem:[#allocation2 + $0x1]]  ;;  %vm2386_vm0 = vcmask 359424   ;;  %vm2392_vm1 = vcmask 355328  }
  0x2c   : > { %s2637_s16 = sld [smem:[#allocation2 + $0xa]]  ;;  %s2848_s17 = smov 127  }
  0x2d   : > { %s6066_s13 = smov (!%p184_p6, %s2876_s13), 7  ;;  %s2638_s18 = sld [smem:[#allocation2 + $0x13]] }
  0x2e   : > { %s2751_s10 = smul.u32 48, %s6066_s13  ;;  %s2639_s19 = sld [smem:[#allocation2 + $0x1c]] }
  0x2f   : > { %s2640_s20 = sld [smem:[#allocation2 + $0x25]]  ;;  %s2641_s21 = sld [smem:[#allocation2 + $0x2e]] }
  0x30   : > { %s2941_s15 = scalar_lea.vmem %s5411_s0, %s2751_s10  ;;  %s2642_s22 = sld [smem:[#allocation2 + $0x37]] }
  0x31   : > { %v313_v0 = vstv %s2636_s9  ;;  %v2944_v1 = vld [vmem:[%s2941_s15 + $0x10] sm:$0xff]  ;;  %v2947_v2 = vld [vmem:[%s2941_s15] sm:$0xff]  ;;  %v2950_v3 = vld [vmem:[%s2941_s15 + $0x18] sm:$0xff]  ;;  %s2643_s23 = sld [smem:[#allocation2 + $0x40]]  ;;  %s2644_s24 = sld [smem:[#allocation2 + $0x2]] }
  0x32   : > { %v316_v4 = vmul.f32 %v313_v0, %v2944_v1  ;;  %v314_v5 = vmul.f32 %v313_v0, %v2947_v2  ;;  %v2955_v6 = vld [vmem:[%s2941_s15 + $0x8] sm:$0xff]  ;;  %v317_v7 = vmul.f32 %v313_v0, %v2950_v3  ;;  %v2965_v10 = vld [vmem:[%s2941_s15 + $0x20] sm:$0xff]  ;;  %v351_v13 = vstv %s2637_s16  ;;  %s2645_s25 = sld [smem:[#allocation2 + $0xb]]  ;;  %s2849_s26 = smov 126  }
  0x33   : > { %v315_v8 = vmul.f32 %v313_v0, %v2955_v6  ;;  %v2962_v9 = vld [vmem:[%s2941_s15 + $0x28] sm:$0xf]  ;;  %v318_v12 = vmul.f32 %v313_v0, %v2965_v10  ;;  %v353_v14 = vmul.f32 %v351_v13, %v2955_v6  ;;  %v352_v15 = vmul.f32 %v351_v13, %v2947_v2  ;;  %s2646_s27 = sld [smem:[#allocation2 + $0x14]]  ;;  %s2647_s28 = sld [smem:[#allocation2 + $0x1d]] }
  0x34   : > { %330 = vrot.lane.b32.xlu1 %v316_v4, %s2848_s17  ;;  %326 = vrot.lane.b32.xlu0 %v314_v5, %s2848_s17  ;;  %v319_v11 = vmul.f32 %v313_v0, %v2962_v9  ;;  %v355_v16 = vmul.f32 %v351_v13, %v2950_v3  ;;  %v354_v17 = vmul.f32 %v351_v13, %v2944_v1  ;;  %v389_v20 = vstv %s2638_s18  ;;  %s2648_s29 = sld [smem:[#allocation2 + $0x26]]  ;;  %s2649_s30 = sld [smem:[#allocation2 + $0x2f]] }
  0x35   : > { %v357_v18 = vmul.f32 %v351_v13, %v2962_v9  ;;  %v356_v19 = vmul.f32 %v351_v13, %v2965_v10  ;;  %v391_v21 = vmul.f32 %v389_v20, %v2955_v6  ;;  %v390_v22 = vmul.f32 %v389_v20, %v2947_v2  ;;  %s2650_s4 = sld [smem:[#allocation2 + $0x38]]  ;;  %s2651_s5 = sld [smem:[#allocation2 + $0x41]] }
  0x36   : > { %v393_v23 = vmul.f32 %v389_v20, %v2950_v3  ;;  %v392_v24 = vmul.f32 %v389_v20, %v2944_v1  ;;  %v395_v25 = vmul.f32 %v389_v20, %v2962_v9  ;;  %v394_v26 = vmul.f32 %v389_v20, %v2965_v10  ;;  %s2660_s6 = sld [smem:[#allocation2 + $0x4]]  ;;  %s2661_s7 = sld [smem:[#allocation2 + $0xd]] }
  0x37   : > { %v427_v27 = vstv %s2639_s19  ;;  %v465_v34 = vstv %s2640_s20  ;;  %v503_v41 = vstv %s2641_s21  ;;  %v541_v48 = vstv %s2642_s22  ;;  %s2662_s8 = sld [smem:[#allocation2 + $0x16]]  ;;  %s2663_s9 = sld [smem:[#allocation2 + $0x1f]] }
  0x38   : > { %332 = vrot.lane.b32.xlu1 %v317_v7, %s2848_s17  ;;  %328 = vrot.lane.b32.xlu0 %v315_v8, %s2848_s17  ;;  %v429_v28 = vmul.f32 %v427_v27, %v2955_v6  ;;  %v428_v29 = vmul.f32 %v427_v27, %v2947_v2  ;;  %v431_v30 = vmul.f32 %v427_v27, %v2950_v3  ;;  %v579_v55 = vstv %s2643_s23  ;;  %s2664_s10 = sld [smem:[#allocation2 + $0x28]]  ;;  %s2665_s11 = sld [smem:[#allocation2 + $0x31]] }
  0x39   : > { %v430_v31 = vmul.f32 %v427_v27, %v2944_v1  ;;  %v433_v32 = vmul.f32 %v427_v27, %v2962_v9  ;;  %v432_v33 = vmul.f32 %v427_v27, %v2965_v10  ;;  %v467_v35 = vmul.f32 %v465_v34, %v2955_v6  ;;  %s2666_s14 = sld [smem:[#allocation2 + $0x3a]]  ;;  %s2667_s16 = sld [smem:[#allocation2 + $0x43]] }
  0x3a   : > { %v466_v36 = vmul.f32 %v465_v34, %v2947_v2  ;;  %v469_v37 = vmul.f32 %v465_v34, %v2950_v3  ;;  %v468_v38 = vmul.f32 %v465_v34, %v2944_v1  ;;  %v471_v39 = vmul.f32 %v465_v34, %v2962_v9  ;;  %s2668_s18 = sld [smem:[#allocation2 + $0x5]]  ;;  %s2669_s19 = sld [smem:[#allocation2 + $0xe]] }
  0x3b   : > { %v470_v40 = vmul.f32 %v465_v34, %v2965_v10  ;;  %v505_v42 = vmul.f32 %v503_v41, %v2955_v6  ;;  %v504_v43 = vmul.f32 %v503_v41, %v2947_v2  ;;  %v507_v44 = vmul.f32 %v503_v41, %v2950_v3  ;;  %s2670_s20 = sld [smem:[#allocation2 + $0x17]]  ;;  %s2671_s21 = sld [smem:[#allocation2 + $0x20]] }
  0x3c   : > { %336 = vrot.lane.b32.xlu1 %v319_v11, %s2848_s17  ;;  %334 = vrot.lane.b32.xlu0 %v318_v12, %s2848_s17  ;;  %v506_v45 = vmul.f32 %v503_v41, %v2944_v1  ;;  %v509_v46 = vmul.f32 %v503_v41, %v2962_v9  ;;  %v508_v47 = vmul.f32 %v503_v41, %v2965_v10  ;;  %v617_v62 = vstv %s2644_s24  ;;  %s2672_s22 = sld [smem:[#allocation2 + $0x29]]  ;;  %s2673_s23 = sld [smem:[#allocation2 + $0x32]] }
  0x3d   : > { %v543_v49 = vmul.f32 %v541_v48, %v2955_v6  ;;  %v542_v50 = vmul.f32 %v541_v48, %v2947_v2  ;;  %v545_v51 = vmul.f32 %v541_v48, %v2950_v3  ;;  %v544_v52 = vmul.f32 %v541_v48, %v2944_v1  ;;  %s2674_s24 = sld [smem:[#allocation2 + $0x3b]] }
  0x3e   : > { %v547_v53 = vmul.f32 %v541_v48, %v2962_v9  ;;  %v546_v54 = vmul.f32 %v541_v48, %v2965_v10  ;;  %v581_v56 = vmul.f32 %v579_v55, %v2955_v6  ;;  %v580_v57 = vmul.f32 %v579_v55, %v2947_v2 }
  0x3f   : > { %v583_v58 = vmul.f32 %v579_v55, %v2950_v3  ;;  %v582_v59 = vmul.f32 %v579_v55, %v2944_v1  ;;  %v585_v60 = vmul.f32 %v579_v55, %v2962_v9  ;;  %v584_v61 = vmul.f32 %v579_v55, %v2965_v10 }
  0x40   : > { %366 = vrot.lane.b32.xlu1 %v353_v14, %s2848_s17  ;;  %364 = vrot.lane.b32.xlu0 %v352_v15, %s2848_s17  ;;  %v619_v63 = vmul.f32 %v617_v62, %v2955_v6  ;;  %v618_v0 = vmul.f32 %v617_v62, %v2947_v2  ;;  %v621_v4 = vmul.f32 %v617_v62, %v2950_v3  ;;  %v655_v11 = vstv %s2645_s25  ;;  %s2675_s25 = sld [smem:[#allocation2 + $0x44]] }
  0x41   : > { %v620_v5 = vmul.f32 %v617_v62, %v2944_v1  ;;  %v623_v7 = vmul.f32 %v617_v62, %v2962_v9  ;;  %v622_v8 = vmul.f32 %v617_v62, %v2965_v10  ;;  %v657_v12 = vmul.f32 %v655_v11, %v2955_v6 }
  0x42   : > { %v656_v13 = vmul.f32 %v655_v11, %v2947_v2  ;;  %v659_v14 = vmul.f32 %v655_v11, %v2950_v3  ;;  %v658_v15 = vmul.f32 %v655_v11, %v2944_v1 }
  0x44   : > { %370 = vrot.lane.b32.xlu1 %v355_v16, %s2848_s17  ;;  %368 = vrot.lane.b32.xlu0 %v354_v17, %s2848_s17  ;;  %v661_v16 = vmul.f32 %v655_v11, %v2962_v9  ;;  %v660_v17 = vmul.f32 %v655_v11, %v2965_v10 }
  0x48   : > { %374 = vrot.lane.b32.xlu1 %v357_v18, %s2848_s17  ;;  %372 = vrot.lane.b32.xlu0 %v356_v19, %s2848_s17  ;;  %v693_v18 = vstv %s2646_s27  ;;  %s2684_s27 = sld [smem:[#allocation2 + $0x7]] }
  0x4c   : > { %404 = vrot.lane.b32.xlu1 %v391_v21, %s2848_s17  ;;  %402 = vrot.lane.b32.xlu0 %v390_v22, %s2848_s17  ;;  %v695_v21 = vmul.f32 %v693_v18, %v2955_v6  ;;  %v694_v22 = vmul.f32 %v693_v18, %v2947_v2 }
  0x50   : > { %408 = vrot.lane.b32.xlu1 %v393_v23, %s2848_s17  ;;  %406 = vrot.lane.b32.xlu0 %v392_v24, %s2848_s17 }
  0x54   : > { %412 = vrot.lane.b32.xlu1 %v395_v25, %s2848_s17  ;;  %410 = vrot.lane.b32.xlu0 %v394_v26, %s2848_s17  ;;  %v697_v25 = vmul.f32 %v693_v18, %v2950_v3  ;;  %v696_v26 = vmul.f32 %v693_v18, %v2944_v1 }
  0x58   : > { %442 = vrot.lane.b32.xlu1 %v429_v28, %s2848_s17  ;;  %440 = vrot.lane.b32.xlu0 %v428_v29, %s2848_s17  ;;  %v699_v29 = vmul.f32 %v693_v18, %v2962_v9 }
  0x5c   : > { %446 = vrot.lane.b32.xlu1 %v431_v30, %s2848_s17  ;;  %444 = vrot.lane.b32.xlu0 %v430_v31, %s2848_s17  ;;  %v698_v30 = vmul.f32 %v693_v18, %v2965_v10  ;;  %v731_v31 = vstv %s2647_s28  ;;  %s2685_s28 = sld [smem:[#allocation2 + $0x10]] }
  0x5d   : > { %v733_v34 = vmul.f32 %v731_v31, %v2955_v6 }
  0x60   : > { %450 = vrot.lane.b32.xlu1 %v433_v32, %s2848_s17  ;;  %448 = vrot.lane.b32.xlu0 %v432_v33, %s2848_s17 }
  0x64   : > { %480 = vrot.lane.b32.xlu1 %v467_v35, %s2848_s17  ;;  %478 = vrot.lane.b32.xlu0 %v466_v36, %s2848_s17  ;;  %v732_v35 = vmul.f32 %v731_v31, %v2947_v2 }
  0x68   : > { %484 = vrot.lane.b32.xlu1 %v469_v37, %s2848_s17  ;;  %482 = vrot.lane.b32.xlu0 %v468_v38, %s2848_s17  ;;  %v735_v38 = vmul.f32 %v731_v31, %v2950_v3 }
  0x6c   : > { %488 = vrot.lane.b32.xlu1 %v471_v39, %s2848_s17  ;;  %486 = vrot.lane.b32.xlu0 %v470_v40, %s2848_s17  ;;  %v734_v39 = vmul.f32 %v731_v31, %v2944_v1 }
  0x70   : > { %518 = vrot.lane.b32.xlu1 %v505_v42, %s2848_s17  ;;  %516 = vrot.lane.b32.xlu0 %v504_v43, %s2848_s17  ;;  %v737_v42 = vmul.f32 %v731_v31, %v2962_v9  ;;  %v736_v43 = vmul.f32 %v731_v31, %v2965_v10  ;;  %v883_v31 = vstv %s2651_s5  ;;  %s2689_s5 = sld [smem:[#allocation2 + $0x34]] }
  0x74   : > { %522 = vrot.lane.b32.xlu1 %v507_v44, %s2848_s17  ;;  %520 = vrot.lane.b32.xlu0 %v506_v45, %s2848_s17  ;;  %v769_v44 = vstv %s2648_s29  ;;  %s2686_s29 = sld [smem:[#allocation2 + $0x19]] }
  0x75   : > { %v770_v48 = vmul.f32 %v769_v44, %v2947_v2  ;;  %v775_v55 = vmul.f32 %v769_v44, %v2962_v9 }
  0x78   : > { %526 = vrot.lane.b32.xlu1 %v509_v46, %s2848_s17  ;;  %524 = vrot.lane.b32.xlu0 %v508_v47, %s2848_s17  ;;  %v771_v47 = vmul.f32 %v769_v44, %v2955_v6 }
  0x7c   : > { %556 = vrot.lane.b32.xlu1 %v543_v49, %s2848_s17  ;;  %554 = vrot.lane.b32.xlu0 %v542_v50, %s2848_s17 }
  0x80   : > { %560 = vrot.lane.b32.xlu1 %v545_v51, %s2848_s17  ;;  %558 = vrot.lane.b32.xlu0 %v544_v52, %s2848_s17  ;;  %v773_v51 = vmul.f32 %v769_v44, %v2950_v3  ;;  %v772_v52 = vmul.f32 %v769_v44, %v2944_v1 }
  0x84   : > { %564 = vrot.lane.b32.xlu1 %v547_v53, %s2848_s17  ;;  %562 = vrot.lane.b32.xlu0 %v546_v54, %s2848_s17 }
  0x88   : > { %594 = vrot.lane.b32.xlu1 %v581_v56, %s2848_s17  ;;  %592 = vrot.lane.b32.xlu0 %v580_v57, %s2848_s17  ;;  %v774_v56 = vmul.f32 %v769_v44, %v2965_v10  ;;  %v807_v57 = vstv %s2649_s30  ;;  %v887_v44 = vmul.f32 %v883_v31, %v2950_v3  ;;  %s2687_s30 = sld [smem:[#allocation2 + $0x22]] }
  0x89   : > { %v812_v11 = vmul.f32 %v807_v57, %v2965_v10 }
  0x8c   : > { %598 = vrot.lane.b32.xlu1 %v583_v58, %s2848_s17  ;;  %596 = vrot.lane.b32.xlu0 %v582_v59, %s2848_s17 }
  0x90   : > { %602 = vrot.lane.b32.xlu1 %v585_v60, %s2848_s17  ;;  %600 = vrot.lane.b32.xlu0 %v584_v61, %s2848_s17  ;;  %v809_v60 = vmul.f32 %v807_v57, %v2955_v6  ;;  %v808_v61 = vmul.f32 %v807_v57, %v2947_v2 }
  0x94   : > { %632 = vrot.lane.b32.xlu1 %v619_v63, %s2849_s26  ;;  %630 = vrot.lane.b32.xlu0 %v618_v0, %s2849_s26  ;;  %v811_v0 = vmul.f32 %v807_v57, %v2950_v3 }
  0x98   : > { %636 = vrot.lane.b32.xlu1 %v621_v4, %s2849_s26  ;;  %634 = vrot.lane.b32.xlu0 %v620_v5, %s2849_s26  ;;  %v810_v4 = vmul.f32 %v807_v57, %v2944_v1 }
  0x9c   : > { %640 = vrot.lane.b32.xlu1 %v623_v7, %s2849_s26  ;;  %638 = vrot.lane.b32.xlu0 %v622_v8, %s2849_s26  ;;  %v813_v8 = vmul.f32 %v807_v57, %v2962_v9 }
  0xa0   : > { %670 = vrot.lane.b32.xlu1 %v657_v12, %s2849_s26  ;;  %668 = vrot.lane.b32.xlu0 %v656_v13, %s2849_s26  ;;  %v845_v12 = vstv %s2650_s4  ;;  %s2688_s4 = sld [smem:[#allocation2 + $0x2b]] }
  0xa4   : > { %674 = vrot.lane.b32.xlu1 %v659_v14, %s2849_s26  ;;  %672 = vrot.lane.b32.xlu0 %v658_v15, %s2849_s26  ;;  %v847_v15 = vmul.f32 %v845_v12, %v2955_v6 }
  0xa6   : > { %v3079_v19 = vpop.permute.xlu1 %330  ;;  %v3081_v20 = vpop.permute.xlu0 %326 }
  0xa8   : > { %678 = vrot.lane.b32.xlu1 %v661_v16, %s2849_s26  ;;  %676 = vrot.lane.b32.xlu0 %v660_v17, %s2849_s26  ;;  %v846_v16 = vmul.f32 %v845_v12, %v2947_v2 }
  0xaa   : > { %v3087_v23 = vpop.permute.xlu1 %332  ;;  %v3089_v24 = vpop.permute.xlu0 %328 }
  0xac   : > { %708 = vrot.lane.b32.xlu1 %v695_v21, %s2849_s26  ;;  %706 = vrot.lane.b32.xlu0 %v694_v22, %s2849_s26  ;;  %v849_v21 = vmul.f32 %v845_v12, %v2950_v3  ;;  %v848_v22 = vmul.f32 %v845_v12, %v2944_v1  ;;  %v3227_v3 = vld [vmem:[%s2941_s15 + $0x1] sm:$0xff] }
  0xae   : > { %v3095_v27 = vpop.permute.xlu1 %336  ;;  %v3097_v28 = vpop.permute.xlu0 %334 }
  0xb0   : > { %712 = vrot.lane.b32.xlu1 %v697_v25, %s2849_s26  ;;  %710 = vrot.lane.b32.xlu0 %v696_v26, %s2849_s26 }
  0xb2   : > { %v3103_v32 = vpop.permute.xlu1 %366  ;;  %v3105_v33 = vpop.permute.xlu0 %364 }
  0xb4   : > { %716 = vrot.lane.b32.xlu1 %v699_v29, %s2849_s26  ;;  %714 = vrot.lane.b32.xlu0 %v698_v30, %s2849_s26  ;;  %v851_v29 = vmul.f32 %v845_v12, %v2962_v9  ;;  %v850_v30 = vmul.f32 %v845_v12, %v2965_v10  ;;  %v3255_v12 = vld [vmem:[%s2941_s15 + $0x21] sm:$0xff] }
  0xb6   : > { %v3111_v36 = vpop.permute.xlu1 %370  ;;  %v3113_v37 = vpop.permute.xlu0 %368 }
  0xb8   : > { %746 = vrot.lane.b32.xlu1 %v733_v34, %s2849_s26  ;;  %744 = vrot.lane.b32.xlu0 %v732_v35, %s2849_s26 }
  0xba   : > { %v3119_v40 = vpop.permute.xlu1 %374  ;;  %v3121_v41 = vpop.permute.xlu0 %372 }
  0xbc   : > { %750 = vrot.lane.b32.xlu1 %v735_v38, %s2849_s26  ;;  %748 = vrot.lane.b32.xlu0 %v734_v39, %s2849_s26  ;;  %v885_v38 = vmul.f32 %v883_v31, %v2955_v6  ;;  %v884_v39 = vmul.f32 %v883_v31, %v2947_v2  ;;  %v889_v2 = vmul.f32 %v883_v31, %v2962_v9 }
  0xbe   : > { %v3127_v45 = vpop.permute.xlu1 %404  ;;  %v3129_v46 = vpop.permute.xlu0 %402 }
  0xc0   : > { %754 = vrot.lane.b32.xlu1 %v737_v42, %s2849_s26  ;;  %752 = vrot.lane.b32.xlu0 %v736_v43, %s2849_s26 }
  0xc2   : > { %v3135_v49 = vpop.permute.xlu1 %408  ;;  %v3137_v50 = vpop.permute.xlu0 %406 }
  0xc4   : > { %784 = vrot.lane.b32.xlu1 %v771_v47, %s2849_s26  ;;  %782 = vrot.lane.b32.xlu0 %v770_v48, %s2849_s26  ;;  %v886_v47 = vmul.f32 %v883_v31, %v2944_v1 }
  0xc6   : > { %v3143_v53 = vpop.permute.xlu1 %412  ;;  %v3145_v54 = vpop.permute.xlu0 %410 }
  0xc8   : > { %788 = vrot.lane.b32.xlu1 %v773_v51, %s2849_s26  ;;  %786 = vrot.lane.b32.xlu0 %v772_v52, %s2849_s26  ;;  %v888_v51 = vmul.f32 %v883_v31, %v2965_v10  ;;  %v3224_v52 = vld [vmem:[%s2941_s15 + $0x9] sm:$0xff]  ;;  %v3238_v10 = vld [vmem:[%s2941_s15 + $0x19] sm:$0xff] }
  0xca   : > { %v3151_v58 = vpop.permute.xlu1 %442  ;;  %v3153_v59 = vpop.permute.xlu0 %440 }
  0xcb   : > { %5419 = vst [vmem:[#allocation8_spill] sm:$0xff] %v3153_v59 }
  0xcc   : > { %792 = vrot.lane.b32.xlu1 %v775_v55, %s2849_s26  ;;  %790 = vrot.lane.b32.xlu0 %v774_v56, %s2849_s26  ;;  %v1039_v55 = vstv %s2660_s6  ;;  %s2690_s6 = sld [smem:[#allocation2 + $0x3d]] }
  0xcd   : > { %v1041_v57 = vmul.f32 %v1039_v55, %v3224_v52  ;;  %v1040_v9 = vmul.f32 %v1039_v55, %v3227_v3 }
  0xce   : > { %v3159_v62 = vpop.permute.xlu1 %446  ;;  %v3161_v63 = vpop.permute.xlu0 %444 }
  0xcf   : > { %5420 = vst [vmem:[#allocation9_spill] sm:$0xff] %v3159_v62  ;;  %5421 = vst [vmem:[#allocation10_spill] sm:$0xff] %v3161_v63 }
  0xd0   : > { %822 = vrot.lane.b32.xlu1 %v809_v60, %s2849_s26  ;;  %820 = vrot.lane.b32.xlu0 %v808_v61, %s2849_s26  ;;  %v3241_v60 = vld [vmem:[%s2941_s15 + $0x11] sm:$0xff] }
  0xd2   : > { %v3167_v5 = vpop.permute.xlu1 %450  ;;  %v3169_v7 = vpop.permute.xlu0 %448 }
  0xd3   : > { %5422 = vst [vmem:[#allocation11_spill] sm:$0xff] %v3167_v5  ;;  %5423 = vst [vmem:[#allocation12_spill] sm:$0xff] %v3169_v7 }
  0xd4   : > { %826 = vrot.lane.b32.xlu1 %v811_v0, %s2849_s26  ;;  %824 = vrot.lane.b32.xlu0 %v810_v4, %s2849_s26  ;;  %v1043_v4 = vmul.f32 %v1039_v55, %v3238_v10 }
  0xd6   : > { %v3175_v13 = vpop.permute.xlu1 %480  ;;  %v3177_v14 = vpop.permute.xlu0 %478 }
  0xd7   : > { %5424 = vst [vmem:[#allocation13_spill] sm:$0xff] %v3175_v13  ;;  %5425 = vst [vmem:[#allocation14_spill] sm:$0xff] %v3177_v14 }
  0xd8   : > { %830 = vrot.lane.b32.xlu1 %v813_v8, %s2849_s26  ;;  %828 = vrot.lane.b32.xlu0 %v812_v11, %s2849_s26  ;;  %v1042_v8 = vmul.f32 %v1039_v55, %v3241_v60  ;;  %v3252_v11 = vld [vmem:[%s2941_s15 + $0x29] sm:$0xf] }
  0xda   : > { %v3183_v17 = vpop.permute.xlu1 %484  ;;  %v3185_v18 = vpop.permute.xlu0 %482 }
  0xdb   : > { %5426 = vst [vmem:[#allocation15_spill] sm:$0xff] %v3183_v17  ;;  %5427 = vst [vmem:[#allocation16_spill] sm:$0xff] %v3185_v18 }
  0xdc   : > { %860 = vrot.lane.b32.xlu1 %v847_v15, %s2849_s26  ;;  %858 = vrot.lane.b32.xlu0 %v846_v16, %s2849_s26 }
  0xde   : > { %v3191_v25 = vpop.permute.xlu1 %488  ;;  %v3193_v26 = vpop.permute.xlu0 %486 }
  0xdf   : > { %5428 = vst [vmem:[#allocation17_spill] sm:$0xff] %v3191_v25  ;;  %5429 = vst [vmem:[#allocation18_spill] sm:$0xff] %v3193_v26 }
  0xe0   : > { %864 = vrot.lane.b32.xlu1 %v849_v21, %s2849_s26  ;;  %862 = vrot.lane.b32.xlu0 %v848_v22, %s2849_s26  ;;  %v1045_v21 = vmul.f32 %v1039_v55, %v3252_v11  ;;  %v1044_v22 = vmul.f32 %v1039_v55, %v3255_v12 }
  0xe2   : > { %v3199_v34 = vpop.permute.xlu1 %518  ;;  %v3201_v35 = vpop.permute.xlu0 %516 }
  0xe3   : > { %5430 = vst [vmem:[#allocation19_spill] sm:$0xff] %v3199_v34  ;;  %5431 = vst [vmem:[#allocation20_spill] sm:$0xff] %v3201_v35 }
  0xe4   : > { %868 = vrot.lane.b32.xlu1 %v851_v29, %s2849_s26  ;;  %866 = vrot.lane.b32.xlu0 %v850_v30, %s2849_s26  ;;  %v1077_v29 = vstv %s2661_s7  ;;  %s2691_s7 = sld [smem:[#allocation2 + $0x46]] }
  0xe6   : > { %v3207_v42 = vpop.permute.xlu1 %522  ;;  %v3209_v43 = vpop.permute.xlu0 %520 }
  0xe7   : > { %5432 = vst [vmem:[#allocation21_spill] sm:$0xff] %v3207_v42  ;;  %5433 = vst [vmem:[#allocation22_spill] sm:$0xff] %v3209_v43 }
  0xe8   : > { %898 = vrot.lane.b32.xlu1 %v885_v38, %s2849_s26  ;;  %896 = vrot.lane.b32.xlu0 %v884_v39, %s2849_s26  ;;  %v1079_v38 = vmul.f32 %v1077_v29, %v3224_v52  ;;  %v1078_v39 = vmul.f32 %v1077_v29, %v3227_v3 }
  0xea   : > { %v3215_v48 = vpop.permute.xlu1 %526  ;;  %v3217_v6 = vpop.permute.xlu0 %524 }
  0xeb   : > { %5434 = vst [vmem:[#allocation23_spill] sm:$0xff] %v3215_v48  ;;  %5435 = vst [vmem:[#allocation24_spill] sm:$0xff] %v3217_v6 }
  0xec   : > { %902 = vrot.lane.b32.xlu1 %v887_v44, %s2849_s26  ;;  %900 = vrot.lane.b32.xlu0 %v886_v47, %s2849_s26 }
  0xee   : > { %v3229_v1 = vpop.permute.xlu1 %556  ;;  %v3231_v56 = vpop.permute.xlu0 %554 }
  0xef   : > { %5436 = vst [vmem:[#allocation25_spill] sm:$0xff] %v3229_v1  ;;  %5437 = vst [vmem:[#allocation26_spill] sm:$0xff] %v3231_v56 }
  0xf0   : > { %906 = vrot.lane.b32.xlu1 %v889_v2, %s2849_s26  ;;  %904 = vrot.lane.b32.xlu0 %v888_v51, %s2849_s26  ;;  %v1081_v2 = vmul.f32 %v1077_v29, %v3238_v10  ;;  %v1080_v51 = vmul.f32 %v1077_v29, %v3241_v60 }
  0xf2   : > { %v3243_v61 = vpop.permute.xlu1 %560  ;;  %v3245_v0 = vpop.permute.xlu0 %558 }
  0xf3   : > { %5438 = vst [vmem:[#allocation27_spill] sm:$0xff] %v3243_v61  ;;  %5439 = vst [vmem:[#allocation28_spill] sm:$0xff] %v3245_v0 }
  0xf4   : > { %1054 = vrot.lane.b32.xlu1 %v1041_v57, %s2848_s17  ;;  %1052 = vrot.lane.b32.xlu0 %v1040_v9, %s2848_s17  ;;  %v1083_v9 = vmul.f32 %v1077_v29, %v3252_v11 }
  0xf6   : > { %v3257_v15 = vpop.permute.xlu1 %564  ;;  %v3259_v16 = vpop.permute.xlu0 %562 }
  0xf7   : > { %5440 = vst [vmem:[#allocation29_spill] sm:$0xff] %v3257_v15  ;;  %5441 = vst [vmem:[#allocation30_spill] sm:$0xff] %v3259_v16 }
  0xf8   : > { %1058 = vrot.lane.b32.xlu1 %v1043_v4, %s2848_s17  ;;  %1056 = vrot.lane.b32.xlu0 %v1042_v8, %s2848_s17  ;;  %v1082_v4 = vmul.f32 %v1077_v29, %v3255_v12  ;;  %v1115_v8 = vstv %s2662_s8  ;;  %s2692_s8 = sld [smem:[#allocation2 + $0x8]] }
  0xf9   : > { %v1119_v29 = vmul.f32 %v1115_v8, %v3238_v10 }
  0xfa   : > { %v3265_v30 = vpop.permute.xlu1 %594  ;;  %v3267_v31 = vpop.permute.xlu0 %592 }
  0xfb   : > { %5442 = vst [vmem:[#allocation31_spill] sm:$0xff] %v3265_v30  ;;  %5443 = vst [vmem:[#allocation32_spill] sm:$0xff] %v3267_v31  ;;  %v3932_v30 = vld [vmem:[%s2941_s15 + $0x8] sm:$0xff] }
  0xfc   : > { %1062 = vrot.lane.b32.xlu1 %v1045_v21, %s2848_s17  ;;  %1060 = vrot.lane.b32.xlu0 %v1044_v22, %s2848_s17 }
  0xfe   : > { %v3273_v44 = vpop.permute.xlu1 %598  ;;  %v3275_v47 = vpop.permute.xlu0 %596 }
  0xff   : > { %5444 = vst [vmem:[#allocation33_spill] sm:$0xff] %v3273_v44  ;;  %5445 = vst [vmem:[#allocation34_spill] sm:$0xff] %v3275_v47  ;;  %v1120_v47 = vmul.f32 %v1115_v8, %v3255_v12  ;;  %v1153_v44 = vstv %s2663_s9  ;;  %s2693_s9 = sld [smem:[#allocation2 + $0x11]] }
 0x100   : > { %1092 = vrot.lane.b32.xlu1 %v1079_v38, %s2848_s17  ;;  %1090 = vrot.lane.b32.xlu0 %v1078_v39, %s2848_s17  ;;  %v1117_v38 = vmul.f32 %v1115_v8, %v3224_v52  ;;  %v1116_v39 = vmul.f32 %v1115_v8, %v3227_v3 }
 0x102   : > { %v3281_v55 = vpop.permute.xlu1 %602  ;;  %v3283_v57 = vpop.permute.xlu0 %600 }
 0x103   : > { %5446 = vst [vmem:[#allocation35_spill] sm:$0xff] %v3281_v55  ;;  %5447 = vst [vmem:[#allocation36_spill] sm:$0xff] %v3283_v57  ;;  %v1118_v57 = vmul.f32 %v1115_v8, %v3241_v60  ;;  %v1121_v55 = vmul.f32 %v1115_v8, %v3252_v11  ;;  %v1157_v8 = vmul.f32 %v1153_v44, %v3238_v10 }
 0x104   : > { %1096 = vrot.lane.b32.xlu1 %v1081_v2, %s2848_s17  ;;  %1094 = vrot.lane.b32.xlu0 %v1080_v51, %s2848_s17 }
 0x106   : > { %v3289_v21 = vpop.permute.xlu1 %632  ;;  %v3291_v22 = vpop.permute.xlu0 %630 }
 0x107   : > { %5448 = vst [vmem:[#allocation37_spill] sm:$0xff] %v3289_v21  ;;  %5449 = vst [vmem:[#allocation38_spill] sm:$0xff] %v3291_v22  ;;  %v3938_v22 = vld [vmem:[%s2941_s15 + $0x28] sm:$0xf] }
 0x108   : > { %1100 = vrot.lane.b32.xlu1 %v1083_v9, %s2848_s17  ;;  %1098 = vrot.lane.b32.xlu0 %v1082_v4, %s2848_s17 }
 0x10a   : > { %v3297_v2 = vpop.permute.xlu1 %636  ;;  %v3299_v51 = vpop.permute.xlu0 %634 }
 0x10b   : > { %5450 = vst [vmem:[#allocation39_spill] sm:$0xff] %v3297_v2  ;;  %5451 = vst [vmem:[#allocation40_spill] sm:$0xff] %v3299_v51  ;;  %v3922_v51 = vld [vmem:[%s2941_s15 + $0x18] sm:$0xff] }
 0x10c   : > { %1130 = vrot.lane.b32.xlu1 %v1117_v38, %s2848_s17  ;;  %1128 = vrot.lane.b32.xlu0 %v1116_v39, %s2848_s17 }
 0x10e   : > { %v3305_v9 = vpop.permute.xlu1 %640  ;;  %v3307_v4 = vpop.permute.xlu0 %638 }
 0x10f   : > { %5452 = vst [vmem:[#allocation41_spill] sm:$0xff] %v3305_v9  ;;  %5453 = vst [vmem:[#allocation42_spill] sm:$0xff] %v3307_v4  ;;  %v1155_v9 = vmul.f32 %v1153_v44, %v3224_v52  ;;  %v1154_v4 = vmul.f32 %v1153_v44, %v3227_v3 }
 0x110   : > { %1134 = vrot.lane.b32.xlu1 %v1119_v29, %s2848_s17  ;;  %1132 = vrot.lane.b32.xlu0 %v1118_v57, %s2848_s17 }
 0x112   : > { %v3313_v38 = vpop.permute.xlu1 %670  ;;  %v3315_v39 = vpop.permute.xlu0 %668 }
 0x113   : > { %5454 = vst [vmem:[#allocation43_spill] sm:$0xff] %v3313_v38  ;;  %5455 = vst [vmem:[#allocation44_spill] sm:$0xff] %v3315_v39  ;;  %v1156_v39 = vmul.f32 %v1153_v44, %v3241_v60  ;;  %v1191_v38 = vstv %s2664_s10  ;;  %s200_s10 = sld [smem:[#allocation2]] }
 0x114   : > { %1138 = vrot.lane.b32.xlu1 %v1121_v55, %s2848_s17  ;;  %1136 = vrot.lane.b32.xlu0 %v1120_v47, %s2848_s17 }
 0x116   : > { %v3321_v29 = vpop.permute.xlu1 %674  ;;  %v3323_v57 = vpop.permute.xlu0 %672 }
 0x117   : > { %5456 = vst [vmem:[#allocation45_spill] sm:$0xff] %v3321_v29  ;;  %5457 = vst [vmem:[#allocation46_spill] sm:$0xff] %v3323_v57  ;;  %v1159_v29 = vmul.f32 %v1153_v44, %v3252_v11  ;;  %v1158_v57 = vmul.f32 %v1153_v44, %v3255_v12  ;;  %v1195_v44 = vmul.f32 %v1191_v38, %v3238_v10 }
 0x118   : > { %1168 = vrot.lane.b32.xlu1 %v1155_v9, %s2848_s17  ;;  %1166 = vrot.lane.b32.xlu0 %v1154_v4, %s2848_s17 }
 0x11a   : > { %v3329_v55 = vpop.permute.xlu1 %678  ;;  %v3331_v47 = vpop.permute.xlu0 %676 }
 0x11b   : > { %5458 = vst [vmem:[#allocation47_spill] sm:$0xff] %v3329_v55  ;;  %5459 = vst [vmem:[#allocation48_spill] sm:$0xff] %v3331_v47  ;;  %v1193_v55 = vmul.f32 %v1191_v38, %v3224_v52  ;;  %v1192_v47 = vmul.f32 %v1191_v38, %v3227_v3 }
 0x11c   : > { %1172 = vrot.lane.b32.xlu1 %v1157_v8, %s2848_s17  ;;  %1170 = vrot.lane.b32.xlu0 %v1156_v39, %s2848_s17 }
 0x11e   : > { %v3337_v9 = vpop.permute.xlu1 %708  ;;  %v3339_v4 = vpop.permute.xlu0 %706 }
 0x11f   : > { %5460 = vst [vmem:[#allocation49_spill] sm:$0xff] %v3337_v9  ;;  %5461 = vst [vmem:[#allocation50_spill] sm:$0xff] %v3339_v4  ;;  %v1194_v4 = vmul.f32 %v1191_v38, %v3241_v60  ;;  %v1229_v9 = vstv %s2665_s11  ;;  %s2629_s11 = sld [smem:[#allocation2 + $0x9]] }
 0x120   : > { %1176 = vrot.lane.b32.xlu1 %v1159_v29, %s2848_s17  ;;  %1174 = vrot.lane.b32.xlu0 %v1158_v57, %s2848_s17 }
 0x122   : > { %v3345_v8 = vpop.permute.xlu1 %712  ;;  %v3347_v39 = vpop.permute.xlu0 %710 }
 0x123   : > { %5462 = vst [vmem:[#allocation51_spill] sm:$0xff] %v3345_v8  ;;  %5463 = vst [vmem:[#allocation52_spill] sm:$0xff] %v3347_v39  ;;  %v1197_v8 = vmul.f32 %v1191_v38, %v3252_v11  ;;  %v1196_v39 = vmul.f32 %v1191_v38, %v3255_v12  ;;  %v1233_v38 = vmul.f32 %v1229_v9, %v3238_v10 }
 0x124   : > { %1206 = vrot.lane.b32.xlu1 %v1193_v55, %s2848_s17  ;;  %1204 = vrot.lane.b32.xlu0 %v1192_v47, %s2848_s17 }
 0x125   : > { %v215_v31 = vstv %s2629_s11  ;;  %s4915_s11 = sld [smem:[#allocation2 + $0x21]] }
 0x126   : > { %v3353_v29 = vpop.permute.xlu1 %716  ;;  %v3355_v57 = vpop.permute.xlu0 %714  ;;  %v3956_v56 = vmul.f32 %v3922_v51, %v215_v31 }
 0x127   : > { %5464 = vst [vmem:[#allocation53_spill] sm:$0xff] %v3353_v29  ;;  %5465 = vst [vmem:[#allocation54_spill] sm:$0xff] %v3355_v57  ;;  %v1231_v29 = vmul.f32 %v1229_v9, %v3224_v52  ;;  %v1230_v57 = vmul.f32 %v1229_v9, %v3227_v3 }
 0x128   : > { %1210 = vrot.lane.b32.xlu1 %v1195_v44, %s2848_s17  ;;  %1208 = vrot.lane.b32.xlu0 %v1194_v4, %s2848_s17 }
 0x12a   : > { %v3361_v55 = vpop.permute.xlu1 %746  ;;  %v3363_v47 = vpop.permute.xlu0 %744 }
 0x12b   : > { %5466 = vst [vmem:[#allocation55_spill] sm:$0xff] %v3361_v55  ;;  %5467 = vst [vmem:[#allocation56_spill] sm:$0xff] %v3363_v47  ;;  %v1232_v47 = vmul.f32 %v1229_v9, %v3241_v60  ;;  %v1267_v55 = vstv %s2666_s14  ;;  %s2630_s14 = sld [smem:[#allocation2 + $0x12]] }
 0x12c   : > { %1214 = vrot.lane.b32.xlu1 %v1197_v8, %s2848_s17  ;;  %1212 = vrot.lane.b32.xlu0 %v1196_v39, %s2848_s17 }
 0x12e   : > { %v3369_v44 = vpop.permute.xlu1 %750  ;;  %v3371_v4 = vpop.permute.xlu0 %748 }
 0x12f   : > { %5468 = vst [vmem:[#allocation57_spill] sm:$0xff] %v3369_v44  ;;  %5469 = vst [vmem:[#allocation58_spill] sm:$0xff] %v3371_v4  ;;  %v1235_v44 = vmul.f32 %v1229_v9, %v3252_v11  ;;  %v1234_v4 = vmul.f32 %v1229_v9, %v3255_v12  ;;  %v1271_v9 = vmul.f32 %v1267_v55, %v3238_v10 }
 0x130   : > { %1244 = vrot.lane.b32.xlu1 %v1231_v29, %s2848_s17  ;;  %1242 = vrot.lane.b32.xlu0 %v1230_v57, %s2848_s17 }
 0x131   : > { %v229_v15 = vstv %s2630_s14  ;;  %s4921_s14 = sld [smem:[#allocation4]] }
 0x132   : > { %v3377_v8 = vpop.permute.xlu1 %754  ;;  %v3379_v39 = vpop.permute.xlu0 %752  ;;  %v3975_v35 = vmul.f32 %v3932_v30, %v229_v15  ;;  %v3993_v25 = vmul.f32 %v3938_v22, %v229_v15 }
 0x133   : > { %5470 = vst [vmem:[#allocation59_spill] sm:$0xff] %v3377_v8  ;;  %5471 = vst [vmem:[#allocation60_spill] sm:$0xff] %v3379_v39  ;;  %v1269_v8 = vmul.f32 %v1267_v55, %v3224_v52  ;;  %v1268_v39 = vmul.f32 %v1267_v55, %v3227_v3 }
 0x134   : > { %1248 = vrot.lane.b32.xlu1 %v1233_v38, %s2848_s17  ;;  %1246 = vrot.lane.b32.xlu0 %v1232_v47, %s2848_s17 }
 0x136   : > { %v3385_v29 = vpop.permute.xlu1 %784  ;;  %v3387_v57 = vpop.permute.xlu0 %782 }
 0x137   : > { %5472 = vst [vmem:[#allocation61_spill] sm:$0xff] %v3385_v29  ;;  %5473 = vst [vmem:[#allocation62_spill] sm:$0xff] %v3387_v57  ;;  %v1270_v57 = vmul.f32 %v1267_v55, %v3241_v60  ;;  %v1305_v29 = vstv %s2667_s16  ;;  %s2695_s16 = sld [smem:[#allocation2 + $0x23]] }
 0x138   : > { %1252 = vrot.lane.b32.xlu1 %v1235_v44, %s2848_s17  ;;  %1250 = vrot.lane.b32.xlu0 %v1234_v4, %s2848_s17 }
 0x13a   : > { %v3393_v38 = vpop.permute.xlu1 %788  ;;  %v3395_v47 = vpop.permute.xlu0 %786 }
 0x13b   : > { %5474 = vst [vmem:[#allocation63_spill] sm:$0xff] %v3393_v38  ;;  %5475 = vst [vmem:[#allocation64_spill] sm:$0xff] %v3395_v47  ;;  %v1273_v38 = vmul.f32 %v1267_v55, %v3252_v11  ;;  %v1272_v47 = vmul.f32 %v1267_v55, %v3255_v12  ;;  %v1309_v55 = vmul.f32 %v1305_v29, %v3238_v10 }
 0x13c   : > { %1282 = vrot.lane.b32.xlu1 %v1269_v8, %s2848_s17  ;;  %1280 = vrot.lane.b32.xlu0 %v1268_v39, %s2848_s17 }
 0x13d   : > { %v2183_v0 = vstv %s2695_s16  ;;  %s2752_s16 = smul.u32 384, %s6066_s13 }
 0x13e   : > { %v3401_v44 = vpop.permute.xlu1 %792  ;;  %v3403_v4 = vpop.permute.xlu0 %790 }
 0x13f   : > { %5476 = vst [vmem:[#allocation65_spill] sm:$0xff] %v3401_v44  ;;  %5477 = vst [vmem:[#allocation66_spill] sm:$0xff] %v3403_v4  ;;  %v1307_v44 = vmul.f32 %v1305_v29, %v3224_v52  ;;  %v1306_v4 = vmul.f32 %v1305_v29, %v3227_v3 }
 0x140   : > { %1286 = vrot.lane.b32.xlu1 %v1271_v9, %s2848_s17  ;;  %1284 = vrot.lane.b32.xlu0 %v1270_v57, %s2848_s17 }
 0x142   : > { %v3409_v8 = vpop.permute.xlu1 %822  ;;  %v3411_v39 = vpop.permute.xlu0 %820 }
 0x143   : > { %5478 = vst [vmem:[#allocation67_spill] sm:$0xff] %v3409_v8  ;;  %5479 = vst [vmem:[#allocation68_spill] sm:$0xff] %v3411_v39  ;;  %v1308_v39 = vmul.f32 %v1305_v29, %v3241_v60  ;;  %v1343_v8 = vstv %s2668_s18  ;;  %s3895_s18 = sld [smem:[#allocation2 + $0x1b]] }
 0x144   : > { %1290 = vrot.lane.b32.xlu1 %v1273_v38, %s2848_s17  ;;  %1288 = vrot.lane.b32.xlu0 %v1272_v47, %s2848_s17 }
 0x146   : > { %v3417_v9 = vpop.permute.xlu1 %826  ;;  %v3419_v57 = vpop.permute.xlu0 %824 }
 0x147   : > { %5480 = vst [vmem:[#allocation69_spill] sm:$0xff] %v3417_v9  ;;  %5481 = vst [vmem:[#allocation70_spill] sm:$0xff] %v3419_v57  ;;  %v1311_v9 = vmul.f32 %v1305_v29, %v3252_v11  ;;  %v1310_v57 = vmul.f32 %v1305_v29, %v3255_v12  ;;  %v1347_v29 = vmul.f32 %v1343_v8, %v3238_v10 }
 0x148   : > { %1320 = vrot.lane.b32.xlu1 %v1307_v44, %s2848_s17  ;;  %1318 = vrot.lane.b32.xlu0 %v1306_v4, %s2848_s17 }
 0x149   : > { %v243_v42 = vstv %s3895_s18 }
 0x14a   : > { %v3425_v38 = vpop.permute.xlu1 %830  ;;  %v3427_v47 = vpop.permute.xlu0 %828  ;;  %v4014_v7 = vmul.f32 %v3922_v51, %v243_v42 }
 0x14b   : > { %5482 = vst [vmem:[#allocation71_spill] sm:$0xff] %v3425_v38  ;;  %5483 = vst [vmem:[#allocation72_spill] sm:$0xff] %v3427_v47  ;;  %v1345_v38 = vmul.f32 %v1343_v8, %v3224_v52  ;;  %v1344_v47 = vmul.f32 %v1343_v8, %v3227_v3 }
 0x14c   : > { %1324 = vrot.lane.b32.xlu1 %v1309_v55, %s2848_s17  ;;  %1322 = vrot.lane.b32.xlu0 %v1308_v39, %s2848_s17  ;;  %5602 = vst [vmem:[#allocation191_spill] sm:$0xff] %v4014_v7 }
 0x14e   : > { %v3433_v44 = vpop.permute.xlu1 %860  ;;  %v3435_v4 = vpop.permute.xlu0 %858 }
 0x14f   : > { %5484 = vst [vmem:[#allocation73_spill] sm:$0xff] %v3433_v44  ;;  %5485 = vst [vmem:[#allocation74_spill] sm:$0xff] %v3435_v4  ;;  %v1346_v4 = vmul.f32 %v1343_v8, %v3241_v60  ;;  %v1381_v44 = vstv %s2669_s19  ;;  %s3901_s19 = sld [smem:[#allocation2 + $0x24]] }
 0x150   : > { %1328 = vrot.lane.b32.xlu1 %v1311_v9, %s2848_s17  ;;  %1326 = vrot.lane.b32.xlu0 %v1310_v57, %s2848_s17 }
 0x152   : > { %v3441_v55 = vpop.permute.xlu1 %864  ;;  %v3443_v39 = vpop.permute.xlu0 %862 }
 0x153   : > { %5486 = vst [vmem:[#allocation75_spill] sm:$0xff] %v3441_v55  ;;  %5487 = vst [vmem:[#allocation76_spill] sm:$0xff] %v3443_v39  ;;  %v1349_v55 = vmul.f32 %v1343_v8, %v3252_v11  ;;  %v1348_v39 = vmul.f32 %v1343_v8, %v3255_v12  ;;  %v1385_v8 = vmul.f32 %v1381_v44, %v3238_v10 }
 0x154   : > { %1358 = vrot.lane.b32.xlu1 %v1345_v38, %s2849_s26  ;;  %1356 = vrot.lane.b32.xlu0 %v1344_v47, %s2849_s26 }
 0x155   : > { %v257_v17 = vstv %s3901_s19  ;;  %s5005_s19 = scalar_lea.vmem %s5414_s3, %s2752_s16 }
 0x156   : > { %v3449_v9 = vpop.permute.xlu1 %868  ;;  %v3451_v57 = vpop.permute.xlu0 %866 }
 0x157   : > { %5488 = vst [vmem:[#allocation77_spill] sm:$0xff] %v3449_v9  ;;  %5489 = vst [vmem:[#allocation78_spill] sm:$0xff] %v3451_v57  ;;  %v1383_v9 = vmul.f32 %v1381_v44, %v3224_v52  ;;  %v1382_v57 = vmul.f32 %v1381_v44, %v3227_v3 }
 0x158   : > { %1362 = vrot.lane.b32.xlu1 %v1347_v29, %s2849_s26  ;;  %1360 = vrot.lane.b32.xlu0 %v1346_v4, %s2849_s26 }
 0x15a   : > { %v3457_v38 = vpop.permute.xlu1 %898  ;;  %v3459_v47 = vpop.permute.xlu0 %896 }
 0x15b   : > { %5490 = vst [vmem:[#allocation79_spill] sm:$0xff] %v3457_v38  ;;  %5491 = vst [vmem:[#allocation80_spill] sm:$0xff] %v3459_v47  ;;  %v1384_v47 = vmul.f32 %v1381_v44, %v3241_v60  ;;  %v1419_v38 = vstv %s2670_s20  ;;  %s3919_s20 = sld [smem:[#allocation2 + $0x2d]] }
 0x15c   : > { %1366 = vrot.lane.b32.xlu1 %v1349_v55, %s2849_s26  ;;  %1364 = vrot.lane.b32.xlu0 %v1348_v39, %s2849_s26 }
 0x15e   : > { %v3465_v29 = vpop.permute.xlu1 %902  ;;  %v3467_v4 = vpop.permute.xlu0 %900 }
 0x15f   : > { %5492 = vst [vmem:[#allocation81_spill] sm:$0xff] %v3465_v29  ;;  %5493 = vst [vmem:[#allocation82_spill] sm:$0xff] %v3467_v4  ;;  %v1387_v29 = vmul.f32 %v1381_v44, %v3252_v11  ;;  %v1386_v4 = vmul.f32 %v1381_v44, %v3255_v12  ;;  %v1423_v44 = vmul.f32 %v1419_v38, %v3238_v10 }
 0x160   : > { %1396 = vrot.lane.b32.xlu1 %v1383_v9, %s2849_s26  ;;  %1394 = vrot.lane.b32.xlu0 %v1382_v57, %s2849_s26 }
 0x161   : > { %v271_v63 = vstv %s3919_s20  ;;  %s5010_s20 = sld [smem:[#allocation4 + $0x1]] }
 0x162   : > { %v3473_v55 = vpop.permute.xlu1 %906  ;;  %v3475_v39 = vpop.permute.xlu0 %904  ;;  %v4051_v7 = vmul.f32 %v3932_v30, %v271_v63 }
 0x163   : > { %5494 = vst [vmem:[#allocation83_spill] sm:$0xff] %v3473_v55  ;;  %5495 = vst [vmem:[#allocation84_spill] sm:$0xff] %v3475_v39  ;;  %v1421_v55 = vmul.f32 %v1419_v38, %v3224_v52  ;;  %v1420_v39 = vmul.f32 %v1419_v38, %v3227_v3 }
 0x164   : > { %1400 = vrot.lane.b32.xlu1 %v1385_v8, %s2849_s26  ;;  %1398 = vrot.lane.b32.xlu0 %v1384_v47, %s2849_s26  ;;  %5612 = vst [vmem:[#allocation201_spill] sm:$0xff] %v4051_v7  ;;  %v4070_v7 = vmul.f32 %v3938_v22, %v271_v63 }
 0x166   : > { %v3481_v9 = vpop.permute.xlu1 %1054  ;;  %v3483_v57 = vpop.permute.xlu0 %1052  ;;  %5618 = vst [vmem:[#allocation207_spill] sm:$0xff] %v4070_v7 }
 0x167   : > { %5496 = vst [vmem:[#allocation85_spill] sm:$0xff] %v3481_v9  ;;  %5497 = vst [vmem:[#allocation86_spill] sm:$0xff] %v3483_v57  ;;  %v1422_v57 = vmul.f32 %v1419_v38, %v3241_v60  ;;  %v1457_v9 = vstv %s2671_s21  ;;  %s3958_s21 = sld [smem:[#allocation2 + $0x36]] }
 0x168   : > { %1404 = vrot.lane.b32.xlu1 %v1387_v29, %s2849_s26  ;;  %1402 = vrot.lane.b32.xlu0 %v1386_v4, %s2849_s26 }
 0x16a   : > { %v3489_v8 = vpop.permute.xlu1 %1058  ;;  %v3491_v47 = vpop.permute.xlu0 %1056 }
 0x16b   : > { %5498 = vst [vmem:[#allocation87_spill] sm:$0xff] %v3489_v8  ;;  %5499 = vst [vmem:[#allocation88_spill] sm:$0xff] %v3491_v47  ;;  %v1425_v8 = vmul.f32 %v1419_v38, %v3252_v11  ;;  %v1424_v47 = vmul.f32 %v1419_v38, %v3255_v12  ;;  %v1461_v38 = vmul.f32 %v1457_v9, %v3238_v10 }
 0x16c   : > { %1434 = vrot.lane.b32.xlu1 %v1421_v55, %s2849_s26  ;;  %1432 = vrot.lane.b32.xlu0 %v1420_v39, %s2849_s26 }
 0x16e   : > { %v3497_v29 = vpop.permute.xlu1 %1062  ;;  %v3499_v4 = vpop.permute.xlu0 %1060 }
 0x16f   : > { %5500 = vst [vmem:[#allocation89_spill] sm:$0xff] %v3497_v29  ;;  %5501 = vst [vmem:[#allocation90_spill] sm:$0xff] %v3499_v4  ;;  %v1459_v29 = vmul.f32 %v1457_v9, %v3224_v52  ;;  %v1458_v4 = vmul.f32 %v1457_v9, %v3227_v3 }
 0x170   : > { %1438 = vrot.lane.b32.xlu1 %v1423_v44, %s2849_s26  ;;  %1436 = vrot.lane.b32.xlu0 %v1422_v57, %s2849_s26 }
 0x172   : > { %v3505_v55 = vpop.permute.xlu1 %1092  ;;  %v3507_v39 = vpop.permute.xlu0 %1090 }
 0x173   : > { %5502 = vst [vmem:[#allocation91_spill] sm:$0xff] %v3505_v55  ;;  %5503 = vst [vmem:[#allocation92_spill] sm:$0xff] %v3507_v39  ;;  %v1460_v39 = vmul.f32 %v1457_v9, %v3241_v60  ;;  %v1495_v55 = vstv %s2672_s22  ;;  %s3977_s22 = sld [smem:[#allocation2 + $0x3f]] }
 0x174   : > { %1442 = vrot.lane.b32.xlu1 %v1425_v8, %s2849_s26  ;;  %1440 = vrot.lane.b32.xlu0 %v1424_v47, %s2849_s26 }
 0x176   : > { %v3513_v44 = vpop.permute.xlu1 %1096  ;;  %v3515_v57 = vpop.permute.xlu0 %1094 }
 0x177   : > { %5504 = vst [vmem:[#allocation93_spill] sm:$0xff] %v3513_v44  ;;  %5505 = vst [vmem:[#allocation94_spill] sm:$0xff] %v3515_v57  ;;  %v1463_v44 = vmul.f32 %v1457_v9, %v3252_v11  ;;  %v1462_v57 = vmul.f32 %v1457_v9, %v3255_v12  ;;  %v1499_v9 = vmul.f32 %v1495_v55, %v3238_v10 }
 0x178   : > { %1472 = vrot.lane.b32.xlu1 %v1459_v29, %s2849_s26  ;;  %1470 = vrot.lane.b32.xlu0 %v1458_v4, %s2849_s26 }
 0x17a   : > { %v3521_v8 = vpop.permute.xlu1 %1100  ;;  %v3523_v47 = vpop.permute.xlu0 %1098 }
 0x17b   : > { %5506 = vst [vmem:[#allocation95_spill] sm:$0xff] %v3521_v8  ;;  %5507 = vst [vmem:[#allocation96_spill] sm:$0xff] %v3523_v47  ;;  %v1497_v8 = vmul.f32 %v1495_v55, %v3224_v52  ;;  %v1496_v47 = vmul.f32 %v1495_v55, %v3227_v3 }
 0x17c   : > { %1476 = vrot.lane.b32.xlu1 %v1461_v38, %s2849_s26  ;;  %1474 = vrot.lane.b32.xlu0 %v1460_v39, %s2849_s26 }
 0x17e   : > { %v3529_v29 = vpop.permute.xlu1 %1130  ;;  %v3531_v4 = vpop.permute.xlu0 %1128 }
 0x17f   : > { %5508 = vst [vmem:[#allocation97_spill] sm:$0xff] %v3529_v29  ;;  %5509 = vst [vmem:[#allocation98_spill] sm:$0xff] %v3531_v4  ;;  %v1498_v4 = vmul.f32 %v1495_v55, %v3241_v60  ;;  %v1533_v29 = vstv %s2673_s23  ;;  %s3995_s23 = sld [smem:[#allocation2 + $0x2c]] }
 0x180   : > { %1480 = vrot.lane.b32.xlu1 %v1463_v44, %s2849_s26  ;;  %1478 = vrot.lane.b32.xlu0 %v1462_v57, %s2849_s26 }
 0x182   : > { %v3537_v38 = vpop.permute.xlu1 %1134  ;;  %v3539_v39 = vpop.permute.xlu0 %1132 }
 0x183   : > { %5510 = vst [vmem:[#allocation99_spill] sm:$0xff] %v3537_v38  ;;  %5511 = vst [vmem:[#allocation100_spill] sm:$0xff] %v3539_v39  ;;  %v1501_v38 = vmul.f32 %v1495_v55, %v3252_v11  ;;  %v1500_v39 = vmul.f32 %v1495_v55, %v3255_v12  ;;  %v1537_v55 = vmul.f32 %v1533_v29, %v3238_v10 }
 0x184   : > { %1510 = vrot.lane.b32.xlu1 %v1497_v8, %s2849_s26  ;;  %1508 = vrot.lane.b32.xlu0 %v1496_v47, %s2849_s26 }
 0x186   : > { %v3545_v44 = vpop.permute.xlu1 %1138  ;;  %v3547_v57 = vpop.permute.xlu0 %1136 }
 0x187   : > { %5512 = vst [vmem:[#allocation101_spill] sm:$0xff] %v3545_v44  ;;  %5513 = vst [vmem:[#allocation102_spill] sm:$0xff] %v3547_v57  ;;  %v1535_v44 = vmul.f32 %v1533_v29, %v3224_v52  ;;  %v1534_v57 = vmul.f32 %v1533_v29, %v3227_v3 }
 0x188   : > { %1514 = vrot.lane.b32.xlu1 %v1499_v9, %s2849_s26  ;;  %1512 = vrot.lane.b32.xlu0 %v1498_v4, %s2849_s26 }
 0x18a   : > { %v3553_v8 = vpop.permute.xlu1 %1168  ;;  %v3555_v47 = vpop.permute.xlu0 %1166 }
 0x18b   : > { %5514 = vst [vmem:[#allocation103_spill] sm:$0xff] %v3553_v8  ;;  %5515 = vst [vmem:[#allocation104_spill] sm:$0xff] %v3555_v47  ;;  %v1536_v47 = vmul.f32 %v1533_v29, %v3241_v60  ;;  %v1571_v8 = vstv %s2674_s24  ;;  %s4007_s24 = sld [smem:[#allocation2 + $0x3]] }
 0x18c   : > { %1518 = vrot.lane.b32.xlu1 %v1501_v38, %s2849_s26  ;;  %1516 = vrot.lane.b32.xlu0 %v1500_v39, %s2849_s26 }
 0x18e   : > { %v3561_v9 = vpop.permute.xlu1 %1172  ;;  %v3563_v4 = vpop.permute.xlu0 %1170 }
 0x18f   : > { %5516 = vst [vmem:[#allocation105_spill] sm:$0xff] %v3561_v9  ;;  %5517 = vst [vmem:[#allocation106_spill] sm:$0xff] %v3563_v4  ;;  %v1539_v9 = vmul.f32 %v1533_v29, %v3252_v11  ;;  %v1538_v4 = vmul.f32 %v1533_v29, %v3255_v12  ;;  %v1575_v29 = vmul.f32 %v1571_v8, %v3238_v10 }
 0x190   : > { %1548 = vrot.lane.b32.xlu1 %v1535_v44, %s2849_s26  ;;  %1546 = vrot.lane.b32.xlu0 %v1534_v57, %s2849_s26 }
 0x192   : > { %v3569_v38 = vpop.permute.xlu1 %1176  ;;  %v3571_v39 = vpop.permute.xlu0 %1174 }
 0x193   : > { %5518 = vst [vmem:[#allocation107_spill] sm:$0xff] %v3569_v38  ;;  %5519 = vst [vmem:[#allocation108_spill] sm:$0xff] %v3571_v39  ;;  %v1573_v38 = vmul.f32 %v1571_v8, %v3224_v52  ;;  %v1572_v39 = vmul.f32 %v1571_v8, %v3227_v3 }
 0x194   : > { %1552 = vrot.lane.b32.xlu1 %v1537_v55, %s2849_s26  ;;  %1550 = vrot.lane.b32.xlu0 %v1536_v47, %s2849_s26 }
 0x196   : > { %v3577_v44 = vpop.permute.xlu1 %1206  ;;  %v3579_v57 = vpop.permute.xlu0 %1204 }
 0x197   : > { %5520 = vst [vmem:[#allocation109_spill] sm:$0xff] %v3577_v44  ;;  %5521 = vst [vmem:[#allocation110_spill] sm:$0xff] %v3579_v57  ;;  %v1574_v57 = vmul.f32 %v1571_v8, %v3241_v60  ;;  %v1609_v44 = vstv %s2675_s25  ;;  %s4026_s25 = sld [smem:[#allocation2 + $0xc]] }
 0x198   : > { %1556 = vrot.lane.b32.xlu1 %v1539_v9, %s2849_s26  ;;  %1554 = vrot.lane.b32.xlu0 %v1538_v4, %s2849_s26 }
 0x19a   : > { %v3585_v55 = vpop.permute.xlu1 %1210  ;;  %v3587_v47 = vpop.permute.xlu0 %1208 }
 0x19b   : > { %5522 = vst [vmem:[#allocation111_spill] sm:$0xff] %v3585_v55  ;;  %5523 = vst [vmem:[#allocation112_spill] sm:$0xff] %v3587_v47  ;;  %v1577_v55 = vmul.f32 %v1571_v8, %v3252_v11  ;;  %v1576_v47 = vmul.f32 %v1571_v8, %v3255_v12  ;;  %v1613_v8 = vmul.f32 %v1609_v44, %v3238_v10  ;;  %v3629_v10 = vld [vmem:[%s2941_s15 + $0x2] sm:$0xff] }
 0x19c   : > { %1586 = vrot.lane.b32.xlu1 %v1573_v38, %s2849_s26  ;;  %1584 = vrot.lane.b32.xlu0 %v1572_v39, %s2849_s26 }
 0x19e   : > { %v3593_v9 = vpop.permute.xlu1 %1214  ;;  %v3595_v4 = vpop.permute.xlu0 %1212 }
 0x19f   : > { %5524 = vst [vmem:[#allocation113_spill] sm:$0xff] %v3593_v9  ;;  %5525 = vst [vmem:[#allocation114_spill] sm:$0xff] %v3595_v4  ;;  %v1611_v4 = vmul.f32 %v1609_v44, %v3224_v52 }
 0x1a0   : > { %1590 = vrot.lane.b32.xlu1 %v1575_v29, %s2849_s26  ;;  %1588 = vrot.lane.b32.xlu0 %v1574_v57, %s2849_s26  ;;  %v1610_v29 = vmul.f32 %v1609_v44, %v3227_v3  ;;  %v1615_v3 = vmul.f32 %v1609_v44, %v3252_v11 }
 0x1a2   : > { %v3601_v38 = vpop.permute.xlu1 %1244  ;;  %v3603_v39 = vpop.permute.xlu0 %1242 }
 0x1a3   : > { %5526 = vst [vmem:[#allocation115_spill] sm:$0xff] %v3601_v38  ;;  %5527 = vst [vmem:[#allocation116_spill] sm:$0xff] %v3603_v39 }
 0x1a4   : > { %1594 = vrot.lane.b32.xlu1 %v1577_v55, %s2849_s26  ;;  %1592 = vrot.lane.b32.xlu0 %v1576_v47, %s2849_s26  ;;  %v1612_v55 = vmul.f32 %v1609_v44, %v3241_v60 }
 0x1a6   : > { %v3609_v57 = vpop.permute.xlu1 %1248  ;;  %v3611_v9 = vpop.permute.xlu0 %1246 }
 0x1a7   : > { %5528 = vst [vmem:[#allocation117_spill] sm:$0xff] %v3609_v57  ;;  %5529 = vst [vmem:[#allocation118_spill] sm:$0xff] %v3611_v9  ;;  %v3626_v9 = vld [vmem:[%s2941_s15 + $0xa] sm:$0xff] }
 0x1a8   : > { %1624 = vrot.lane.b32.xlu1 %v1611_v4, %s2849_s26  ;;  %1622 = vrot.lane.b32.xlu0 %v1610_v29, %s2849_s26  ;;  %v1614_v4 = vmul.f32 %v1609_v44, %v3255_v12  ;;  %v1765_v29 = vstv %s2684_s27  ;;  %v3640_v12 = vld [vmem:[%s2941_s15 + $0x1a] sm:$0xff]  ;;  %s4054_s27 = sld [smem:[#allocation2 + $0x15]] }
 0x1a9   : > { %v1766_v11 = vmul.f32 %v1765_v29, %v3629_v10  ;;  %v3643_v44 = vld [vmem:[%s2941_s15 + $0x12] sm:$0xff] }
 0x1aa   : > { %v3617_v47 = vpop.permute.xlu1 %1252  ;;  %v3619_v52 = vpop.permute.xlu0 %1250 }
 0x1ab   : > { %5530 = vst [vmem:[#allocation119_spill] sm:$0xff] %v3617_v47  ;;  %5531 = vst [vmem:[#allocation120_spill] sm:$0xff] %v3619_v52 }
 0x1ac   : > { %1628 = vrot.lane.b32.xlu1 %v1613_v8, %s2849_s26  ;;  %1626 = vrot.lane.b32.xlu0 %v1612_v55, %s2849_s26  ;;  %v1767_v8 = vmul.f32 %v1765_v29, %v3626_v9 }
 0x1ae   : > { %v3631_v60 = vpop.permute.xlu1 %1282  ;;  %v3633_v47 = vpop.permute.xlu0 %1280 }
 0x1af   : > { %5532 = vst [vmem:[#allocation121_spill] sm:$0xff] %v3631_v60  ;;  %5533 = vst [vmem:[#allocation122_spill] sm:$0xff] %v3633_v47  ;;  %v3654_v47 = vld [vmem:[%s2941_s15 + $0x2a] sm:$0xf]  ;;  %v3657_v60 = vld [vmem:[%s2941_s15 + $0x22] sm:$0xff] }
 0x1b0   : > { %1632 = vrot.lane.b32.xlu1 %v1615_v3, %s2849_s26  ;;  %1630 = vrot.lane.b32.xlu0 %v1614_v4, %s2849_s26  ;;  %v1769_v3 = vmul.f32 %v1765_v29, %v3640_v12  ;;  %v1768_v4 = vmul.f32 %v1765_v29, %v3643_v44 }
 0x1b2   : > { %v3645_v55 = vpop.permute.xlu1 %1286  ;;  %v3647_v52 = vpop.permute.xlu0 %1284 }
 0x1b3   : > { %5534 = vst [vmem:[#allocation123_spill] sm:$0xff] %v3645_v55  ;;  %5535 = vst [vmem:[#allocation124_spill] sm:$0xff] %v3647_v52  ;;  %v1803_v52 = vstv %s2685_s28  ;;  %s4076_s28 = sld [smem:[#allocation2 + $0x1e]] }
 0x1b4   : > { %1780 = vrot.lane.b32.xlu1 %v1767_v8, %s2848_s17  ;;  %1778 = vrot.lane.b32.xlu0 %v1766_v11, %s2848_s17  ;;  %v1771_v8 = vmul.f32 %v1765_v29, %v3654_v47  ;;  %v1770_v11 = vmul.f32 %v1765_v29, %v3657_v60  ;;  %v1807_v29 = vmul.f32 %v1803_v52, %v3640_v12 }
 0x1b6   : > { %v3659_v57 = vpop.permute.xlu1 %1290  ;;  %v3661_v39 = vpop.permute.xlu0 %1288 }
 0x1b7   : > { %5536 = vst [vmem:[#allocation125_spill] sm:$0xff] %v3659_v57  ;;  %5537 = vst [vmem:[#allocation126_spill] sm:$0xff] %v3661_v39  ;;  %v1805_v57 = vmul.f32 %v1803_v52, %v3626_v9  ;;  %v1804_v39 = vmul.f32 %v1803_v52, %v3629_v10 }
 0x1b8   : > { %1784 = vrot.lane.b32.xlu1 %v1769_v3, %s2848_s17  ;;  %1782 = vrot.lane.b32.xlu0 %v1768_v4, %s2848_s17 }
 0x1ba   : > { %v3667_v55 = vpop.permute.xlu1 %1320  ;;  %v3669_v38 = vpop.permute.xlu0 %1318 }
 0x1bb   : > { %5538 = vst [vmem:[#allocation127_spill] sm:$0xff] %v3667_v55  ;;  %5539 = vst [vmem:[#allocation128_spill] sm:$0xff] %v3669_v38  ;;  %v1806_v38 = vmul.f32 %v1803_v52, %v3643_v44  ;;  %v1841_v55 = vstv %s2686_s29  ;;  %s4124_s29 = sld [smem:[#allocation2 + $0x27]] }
 0x1bc   : > { %1788 = vrot.lane.b32.xlu1 %v1771_v8, %s2848_s17  ;;  %1786 = vrot.lane.b32.xlu0 %v1770_v11, %s2848_s17 }
 0x1be   : > { %v3675_v3 = vpop.permute.xlu1 %1324  ;;  %v3677_v4 = vpop.permute.xlu0 %1322 }
 0x1bf   : > { %5540 = vst [vmem:[#allocation129_spill] sm:$0xff] %v3675_v3  ;;  %5541 = vst [vmem:[#allocation130_spill] sm:$0xff] %v3677_v4  ;;  %v1809_v3 = vmul.f32 %v1803_v52, %v3654_v47  ;;  %v1808_v4 = vmul.f32 %v1803_v52, %v3657_v60  ;;  %v1845_v52 = vmul.f32 %v1841_v55, %v3640_v12 }
 0x1c0   : > { %1818 = vrot.lane.b32.xlu1 %v1805_v57, %s2848_s17  ;;  %1816 = vrot.lane.b32.xlu0 %v1804_v39, %s2848_s17 }
 0x1c2   : > { %v3683_v8 = vpop.permute.xlu1 %1328  ;;  %v3685_v11 = vpop.permute.xlu0 %1326 }
 0x1c3   : > { %5542 = vst [vmem:[#allocation131_spill] sm:$0xff] %v3683_v8  ;;  %5543 = vst [vmem:[#allocation132_spill] sm:$0xff] %v3685_v11  ;;  %v1843_v8 = vmul.f32 %v1841_v55, %v3626_v9  ;;  %v1842_v11 = vmul.f32 %v1841_v55, %v3629_v10 }
 0x1c4   : > { %1822 = vrot.lane.b32.xlu1 %v1807_v29, %s2848_s17  ;;  %1820 = vrot.lane.b32.xlu0 %v1806_v38, %s2848_s17 }
 0x1c6   : > { %v3691_v57 = vpop.permute.xlu1 %1358  ;;  %v3693_v39 = vpop.permute.xlu0 %1356 }
 0x1c7   : > { %5544 = vst [vmem:[#allocation133_spill] sm:$0xff] %v3691_v57  ;;  %5545 = vst [vmem:[#allocation134_spill] sm:$0xff] %v3693_v39  ;;  %v1844_v39 = vmul.f32 %v1841_v55, %v3643_v44  ;;  %v1879_v57 = vstv %s2687_s30  ;;  %s4153_s30 = sld [smem:[#allocation2 + $0x35]] }
 0x1c8   : > { %1826 = vrot.lane.b32.xlu1 %v1809_v3, %s2848_s17  ;;  %1824 = vrot.lane.b32.xlu0 %v1808_v4, %s2848_s17 }
 0x1ca   : > { %v3699_v29 = vpop.permute.xlu1 %1362  ;;  %v3701_v38 = vpop.permute.xlu0 %1360 }
 0x1cb   : > { %5546 = vst [vmem:[#allocation135_spill] sm:$0xff] %v3699_v29  ;;  %5547 = vst [vmem:[#allocation136_spill] sm:$0xff] %v3701_v38  ;;  %v1847_v29 = vmul.f32 %v1841_v55, %v3654_v47  ;;  %v1846_v38 = vmul.f32 %v1841_v55, %v3657_v60  ;;  %v1883_v55 = vmul.f32 %v1879_v57, %v3640_v12 }
 0x1cc   : > { %1856 = vrot.lane.b32.xlu1 %v1843_v8, %s2848_s17  ;;  %1854 = vrot.lane.b32.xlu0 %v1842_v11, %s2848_s17 }
 0x1ce   : > { %v3707_v3 = vpop.permute.xlu1 %1366  ;;  %v3709_v4 = vpop.permute.xlu0 %1364 }
 0x1cf   : > { %5548 = vst [vmem:[#allocation137_spill] sm:$0xff] %v3707_v3  ;;  %5549 = vst [vmem:[#allocation138_spill] sm:$0xff] %v3709_v4  ;;  %v1881_v3 = vmul.f32 %v1879_v57, %v3626_v9  ;;  %v1880_v4 = vmul.f32 %v1879_v57, %v3629_v10 }
 0x1d0   : > { %1860 = vrot.lane.b32.xlu1 %v1845_v52, %s2848_s17  ;;  %1858 = vrot.lane.b32.xlu0 %v1844_v39, %s2848_s17 }
 0x1d2   : > { %v3715_v8 = vpop.permute.xlu1 %1396  ;;  %v3717_v11 = vpop.permute.xlu0 %1394 }
 0x1d3   : > { %5550 = vst [vmem:[#allocation139_spill] sm:$0xff] %v3715_v8  ;;  %5551 = vst [vmem:[#allocation140_spill] sm:$0xff] %v3717_v11  ;;  %v1882_v11 = vmul.f32 %v1879_v57, %v3643_v44  ;;  %v1917_v8 = vstv %s2688_s4  ;;  %s4194_s4 = sld [smem:[#allocation2 + $0x30]] }
 0x1d4   : > { %1864 = vrot.lane.b32.xlu1 %v1847_v29, %s2848_s17  ;;  %1862 = vrot.lane.b32.xlu0 %v1846_v38, %s2848_s17 }
 0x1d6   : > { %v3723_v52 = vpop.permute.xlu1 %1400  ;;  %v3725_v39 = vpop.permute.xlu0 %1398 }
 0x1d7   : > { %5552 = vst [vmem:[#allocation141_spill] sm:$0xff] %v3723_v52  ;;  %5553 = vst [vmem:[#allocation142_spill] sm:$0xff] %v3725_v39  ;;  %v1885_v52 = vmul.f32 %v1879_v57, %v3654_v47  ;;  %v1884_v39 = vmul.f32 %v1879_v57, %v3657_v60  ;;  %v1921_v57 = vmul.f32 %v1917_v8, %v3640_v12 }
 0x1d8   : > { %1894 = vrot.lane.b32.xlu1 %v1881_v3, %s2848_s17  ;;  %1892 = vrot.lane.b32.xlu0 %v1880_v4, %s2848_s17 }
 0x1da   : > { %v3731_v29 = vpop.permute.xlu1 %1404  ;;  %v3733_v38 = vpop.permute.xlu0 %1402 }
 0x1db   : > { %5554 = vst [vmem:[#allocation143_spill] sm:$0xff] %v3731_v29  ;;  %5555 = vst [vmem:[#allocation144_spill] sm:$0xff] %v3733_v38  ;;  %v1919_v29 = vmul.f32 %v1917_v8, %v3626_v9  ;;  %v1918_v38 = vmul.f32 %v1917_v8, %v3629_v10 }
 0x1dc   : > { %1898 = vrot.lane.b32.xlu1 %v1883_v55, %s2848_s17  ;;  %1896 = vrot.lane.b32.xlu0 %v1882_v11, %s2848_s17 }
 0x1de   : > { %v3739_v3 = vpop.permute.xlu1 %1434  ;;  %v3741_v4 = vpop.permute.xlu0 %1432 }
 0x1df   : > { %5556 = vst [vmem:[#allocation145_spill] sm:$0xff] %v3739_v3  ;;  %5557 = vst [vmem:[#allocation146_spill] sm:$0xff] %v3741_v4  ;;  %v1920_v4 = vmul.f32 %v1917_v8, %v3643_v44  ;;  %v1955_v3 = vstv %s2689_s5  ;;  %s4250_s5 = sld [smem:[#allocation2 + $0x39]] }
 0x1e0   : > { %1902 = vrot.lane.b32.xlu1 %v1885_v52, %s2848_s17  ;;  %1900 = vrot.lane.b32.xlu0 %v1884_v39, %s2848_s17 }
 0x1e2   : > { %v3747_v55 = vpop.permute.xlu1 %1438  ;;  %v3749_v11 = vpop.permute.xlu0 %1436 }
 0x1e3   : > { %5558 = vst [vmem:[#allocation147_spill] sm:$0xff] %v3747_v55  ;;  %5559 = vst [vmem:[#allocation148_spill] sm:$0xff] %v3749_v11  ;;  %v1923_v55 = vmul.f32 %v1917_v8, %v3654_v47  ;;  %v1922_v11 = vmul.f32 %v1917_v8, %v3657_v60  ;;  %v1959_v8 = vmul.f32 %v1955_v3, %v3640_v12 }
 0x1e4   : > { %1932 = vrot.lane.b32.xlu1 %v1919_v29, %s2848_s17  ;;  %1930 = vrot.lane.b32.xlu0 %v1918_v38, %s2848_s17 }
 0x1e6   : > { %v3755_v52 = vpop.permute.xlu1 %1442  ;;  %v3757_v39 = vpop.permute.xlu0 %1440 }
 0x1e7   : > { %5560 = vst [vmem:[#allocation149_spill] sm:$0xff] %v3755_v52  ;;  %5561 = vst [vmem:[#allocation150_spill] sm:$0xff] %v3757_v39  ;;  %v1957_v52 = vmul.f32 %v1955_v3, %v3626_v9  ;;  %v1956_v39 = vmul.f32 %v1955_v3, %v3629_v10 }
 0x1e8   : > { %1936 = vrot.lane.b32.xlu1 %v1921_v57, %s2848_s17  ;;  %1934 = vrot.lane.b32.xlu0 %v1920_v4, %s2848_s17 }
 0x1ea   : > { %v3763_v29 = vpop.permute.xlu1 %1472  ;;  %v3765_v38 = vpop.permute.xlu0 %1470 }
 0x1eb   : > { %5562 = vst [vmem:[#allocation151_spill] sm:$0xff] %v3763_v29  ;;  %5563 = vst [vmem:[#allocation152_spill] sm:$0xff] %v3765_v38  ;;  %v1958_v38 = vmul.f32 %v1955_v3, %v3643_v44  ;;  %v1993_v29 = vstv %s2690_s6  ;;  %s4306_s6 = sld [smem:[#allocation2 + $0x42]] }
 0x1ec   : > { %1940 = vrot.lane.b32.xlu1 %v1923_v55, %s2848_s17  ;;  %1938 = vrot.lane.b32.xlu0 %v1922_v11, %s2848_s17 }
 0x1ee   : > { %v3771_v57 = vpop.permute.xlu1 %1476  ;;  %v3773_v4 = vpop.permute.xlu0 %1474 }
 0x1ef   : > { %5564 = vst [vmem:[#allocation153_spill] sm:$0xff] %v3771_v57  ;;  %5565 = vst [vmem:[#allocation154_spill] sm:$0xff] %v3773_v4  ;;  %v1961_v57 = vmul.f32 %v1955_v3, %v3654_v47  ;;  %v1960_v4 = vmul.f32 %v1955_v3, %v3657_v60  ;;  %v1997_v3 = vmul.f32 %v1993_v29, %v3640_v12 }
 0x1f0   : > { %1970 = vrot.lane.b32.xlu1 %v1957_v52, %s2848_s17  ;;  %1968 = vrot.lane.b32.xlu0 %v1956_v39, %s2848_s17 }
 0x1f2   : > { %v3779_v55 = vpop.permute.xlu1 %1480  ;;  %v3781_v11 = vpop.permute.xlu0 %1478 }
 0x1f3   : > { %5566 = vst [vmem:[#allocation155_spill] sm:$0xff] %v3779_v55  ;;  %5567 = vst [vmem:[#allocation156_spill] sm:$0xff] %v3781_v11  ;;  %v1995_v55 = vmul.f32 %v1993_v29, %v3626_v9  ;;  %v1994_v11 = vmul.f32 %v1993_v29, %v3629_v10 }
 0x1f4   : > { %1974 = vrot.lane.b32.xlu1 %v1959_v8, %s2848_s17  ;;  %1972 = vrot.lane.b32.xlu0 %v1958_v38, %s2848_s17 }
 0x1f6   : > { %v3787_v52 = vpop.permute.xlu1 %1510  ;;  %v3789_v39 = vpop.permute.xlu0 %1508 }
 0x1f7   : > { %5568 = vst [vmem:[#allocation157_spill] sm:$0xff] %v3787_v52  ;;  %5569 = vst [vmem:[#allocation158_spill] sm:$0xff] %v3789_v39  ;;  %v1996_v39 = vmul.f32 %v1993_v29, %v3643_v44  ;;  %v2031_v52 = vstv %s2691_s7  ;;  %s4326_s7 = sld [smem:[#allocation2 + $0x3e]] }
 0x1f8   : > { %1978 = vrot.lane.b32.xlu1 %v1961_v57, %s2848_s17  ;;  %1976 = vrot.lane.b32.xlu0 %v1960_v4, %s2848_s17 }
 0x1fa   : > { %v3795_v8 = vpop.permute.xlu1 %1514  ;;  %v3797_v38 = vpop.permute.xlu0 %1512 }
 0x1fb   : > { %5570 = vst [vmem:[#allocation159_spill] sm:$0xff] %v3795_v8  ;;  %5571 = vst [vmem:[#allocation160_spill] sm:$0xff] %v3797_v38  ;;  %v1999_v8 = vmul.f32 %v1993_v29, %v3654_v47  ;;  %v1998_v38 = vmul.f32 %v1993_v29, %v3657_v60  ;;  %v2035_v29 = vmul.f32 %v2031_v52, %v3640_v12 }
 0x1fc   : > { %2008 = vrot.lane.b32.xlu1 %v1995_v55, %s2848_s17  ;;  %2006 = vrot.lane.b32.xlu0 %v1994_v11, %s2848_s17 }
 0x1fe   : > { %v3803_v57 = vpop.permute.xlu1 %1518  ;;  %v3805_v4 = vpop.permute.xlu0 %1516 }
 0x1ff   : > { %5572 = vst [vmem:[#allocation161_spill] sm:$0xff] %v3803_v57  ;;  %5573 = vst [vmem:[#allocation162_spill] sm:$0xff] %v3805_v4  ;;  %v2033_v57 = vmul.f32 %v2031_v52, %v3626_v9  ;;  %v2032_v4 = vmul.f32 %v2031_v52, %v3629_v10 }
 0x200   : > { %2012 = vrot.lane.b32.xlu1 %v1997_v3, %s2848_s17  ;;  %2010 = vrot.lane.b32.xlu0 %v1996_v39, %s2848_s17 }
 0x202   : > { %v3811_v55 = vpop.permute.xlu1 %1548  ;;  %v3813_v11 = vpop.permute.xlu0 %1546 }
 0x203   : > { %5574 = vst [vmem:[#allocation163_spill] sm:$0xff] %v3811_v55  ;;  %5575 = vst [vmem:[#allocation164_spill] sm:$0xff] %v3813_v11  ;;  %v2034_v11 = vmul.f32 %v2031_v52, %v3643_v44  ;;  %v2069_v55 = vstv %s2692_s8  ;;  %s4489_s8 = sld [smem:[#allocation2 + $0x47]] }
 0x204   : > { %2016 = vrot.lane.b32.xlu1 %v1999_v8, %s2848_s17  ;;  %2014 = vrot.lane.b32.xlu0 %v1998_v38, %s2848_s17 }
 0x206   : > { %v3819_v3 = vpop.permute.xlu1 %1552  ;;  %v3821_v39 = vpop.permute.xlu0 %1550 }
 0x207   : > { %5576 = vst [vmem:[#allocation165_spill] sm:$0xff] %v3819_v3  ;;  %5577 = vst [vmem:[#allocation166_spill] sm:$0xff] %v3821_v39  ;;  %v2037_v3 = vmul.f32 %v2031_v52, %v3654_v47  ;;  %v2036_v39 = vmul.f32 %v2031_v52, %v3657_v60  ;;  %v2073_v52 = vmul.f32 %v2069_v55, %v3640_v12 }
 0x208   : > { %2046 = vrot.lane.b32.xlu1 %v2033_v57, %s2848_s17  ;;  %2044 = vrot.lane.b32.xlu0 %v2032_v4, %s2848_s17 }
 0x20a   : > { %v3827_v8 = vpop.permute.xlu1 %1556  ;;  %v3829_v38 = vpop.permute.xlu0 %1554 }
 0x20b   : > { %5578 = vst [vmem:[#allocation167_spill] sm:$0xff] %v3827_v8  ;;  %5579 = vst [vmem:[#allocation168_spill] sm:$0xff] %v3829_v38  ;;  %v2071_v8 = vmul.f32 %v2069_v55, %v3626_v9  ;;  %v2070_v38 = vmul.f32 %v2069_v55, %v3629_v10 }
 0x20c   : > { %2050 = vrot.lane.b32.xlu1 %v2035_v29, %s2848_s17  ;;  %2048 = vrot.lane.b32.xlu0 %v2034_v11, %s2848_s17 }
 0x20e   : > { %v3835_v57 = vpop.permute.xlu1 %1586  ;;  %v3837_v4 = vpop.permute.xlu0 %1584 }
 0x20f   : > { %5580 = vst [vmem:[#allocation169_spill] sm:$0xff] %v3835_v57  ;;  %5581 = vst [vmem:[#allocation170_spill] sm:$0xff] %v3837_v4  ;;  %v2072_v4 = vmul.f32 %v2069_v55, %v3643_v44  ;;  %v2107_v57 = vstv %s2693_s9  ;;  %s4681_s9 = sld [smem:[#allocation2 + $0x6]] }
 0x210   : > { %2054 = vrot.lane.b32.xlu1 %v2037_v3, %s2848_s17  ;;  %2052 = vrot.lane.b32.xlu0 %v2036_v39, %s2848_s17  ;;  %s2694_s17 = sld [smem:[#allocation2 + $0x1a]] }
 0x212   : > { %v3843_v29 = vpop.permute.xlu1 %1590  ;;  %v3845_v11 = vpop.permute.xlu0 %1588 }
 0x213   : > { %5582 = vst [vmem:[#allocation171_spill] sm:$0xff] %v3843_v29  ;;  %5583 = vst [vmem:[#allocation172_spill] sm:$0xff] %v3845_v11  ;;  %v2075_v29 = vmul.f32 %v2069_v55, %v3654_v47  ;;  %v2074_v11 = vmul.f32 %v2069_v55, %v3657_v60  ;;  %v2111_v55 = vmul.f32 %v2107_v57, %v3640_v12 }
 0x214   : > { %2084 = vrot.lane.b32.xlu1 %v2071_v8, %s2849_s26  ;;  %2082 = vrot.lane.b32.xlu0 %v2070_v38, %s2849_s26 }
 0x216   : > { %v3851_v3 = vpop.permute.xlu1 %1594  ;;  %v3853_v39 = vpop.permute.xlu0 %1592 }
 0x217   : > { %5584 = vst [vmem:[#allocation173_spill] sm:$0xff] %v3851_v3  ;;  %5585 = vst [vmem:[#allocation174_spill] sm:$0xff] %v3853_v39  ;;  %v2109_v3 = vmul.f32 %v2107_v57, %v3626_v9  ;;  %v2108_v39 = vmul.f32 %v2107_v57, %v3629_v10 }
 0x218   : > { %2088 = vrot.lane.b32.xlu1 %v2073_v52, %s2849_s26  ;;  %2086 = vrot.lane.b32.xlu0 %v2072_v4, %s2849_s26 }
 0x21a   : > { %v3859_v8 = vpop.permute.xlu1 %1624  ;;  %v3861_v38 = vpop.permute.xlu0 %1622 }
 0x21b   : > { %5586 = vst [vmem:[#allocation175_spill] sm:$0xff] %v3859_v8  ;;  %5587 = vst [vmem:[#allocation176_spill] sm:$0xff] %v3861_v38  ;;  %v2110_v38 = vmul.f32 %v2107_v57, %v3643_v44 }
 0x21c   : > { %2092 = vrot.lane.b32.xlu1 %v2075_v29, %s2849_s26  ;;  %2090 = vrot.lane.b32.xlu0 %v2074_v11, %s2849_s26 }
 0x21e   : > { %v3867_v52 = vpop.permute.xlu1 %1628  ;;  %v3869_v4 = vpop.permute.xlu0 %1626 }
 0x21f   : > { %5588 = vst [vmem:[#allocation177_spill] sm:$0xff] %v3867_v52  ;;  %5589 = vst [vmem:[#allocation178_spill] sm:$0xff] %v3869_v4  ;;  %v2113_v52 = vmul.f32 %v2107_v57, %v3654_v47  ;;  %v2112_v4 = vmul.f32 %v2107_v57, %v3657_v60 }
 0x220   : > { %2122 = vrot.lane.b32.xlu1 %v2109_v3, %s2849_s26  ;;  %2120 = vrot.lane.b32.xlu0 %v2108_v39, %s2849_s26  ;;  %v2145_v3 = vstv %s2694_s17  ;;  %s4726_s17 = sld [smem:[#allocation2 + $0xf]] }
 0x221   : > { %v2150_v2 = vmul.f32 %v2145_v3, %v3657_v60 }
 0x222   : > { %v3875_v29 = vpop.permute.xlu1 %1632  ;;  %v3877_v11 = vpop.permute.xlu0 %1630 }
 0x223   : > { %5590 = vst [vmem:[#allocation179_spill] sm:$0xff] %v3875_v29  ;;  %5591 = vst [vmem:[#allocation180_spill] sm:$0xff] %v3877_v11  ;;  %v2147_v11 = vmul.f32 %v2145_v3, %v3626_v9 }
 0x224   : > { %2126 = vrot.lane.b32.xlu1 %v2111_v55, %s2849_s26  ;;  %2124 = vrot.lane.b32.xlu0 %v2110_v38, %s2849_s26  ;;  %v2146_v55 = vmul.f32 %v2145_v3, %v3629_v10 }
 0x226   : > { %v3883_v8 = vpop.permute.xlu1 %1780  ;;  %v3885_v39 = vpop.permute.xlu0 %1778 }
 0x227   : > { %5592 = vst [vmem:[#allocation181_spill] sm:$0xff] %v3883_v8  ;;  %5593 = vst [vmem:[#allocation182_spill] sm:$0xff] %v3885_v39  ;;  %v201_v39 = vstv %s200_s10  ;;  %s4815_s10 = sld [smem:[#allocation2 + $0x45]] }
 0x228   : > { %2130 = vrot.lane.b32.xlu1 %v2113_v52, %s2849_s26  ;;  %2128 = vrot.lane.b32.xlu0 %v2112_v4, %s2849_s26  ;;  %v2149_v52 = vmul.f32 %v2145_v3, %v3640_v12  ;;  %v2148_v4 = vmul.f32 %v2145_v3, %v3643_v44  ;;  %v3935_v16 = vmul.f32 %v3932_v30, %v201_v39 }
 0x229   : > { %v3941_v21 = vmul.f32 %v3938_v22, %v201_v39 }
 0x22a   : > { %v3891_v38 = vpop.permute.xlu1 %1784  ;;  %v3893_v57 = vpop.permute.xlu0 %1782 }
 0x22b   : > { %5594 = vst [vmem:[#allocation183_spill] sm:$0xff] %v3891_v38  ;;  %5595 = vst [vmem:[#allocation184_spill] sm:$0xff] %v3893_v57  ;;  %v3908_v57 = vld [vmem:[%s2941_s15 + $0x10] sm:$0xff] }
 0x22c   : > { %2160 = vrot.lane.b32.xlu1 %v2147_v11, %s2849_s26  ;;  %2158 = vrot.lane.b32.xlu0 %v2146_v55, %s2849_s26  ;;  %v3911_v29 = vmul.f32 %v3908_v57, %v201_v39  ;;  %v3914_v11 = vld [vmem:[%s2941_s15] sm:$0xff]  ;;  %v3965_v48 = vmul.f32 %v3908_v57, %v215_v31  ;;  %v3990_v26 = vmul.f32 %v3908_v57, %v229_v15 }
 0x22d   : > { %v3917_v55 = vmul.f32 %v3914_v11, %v201_v39  ;;  %v3953_v61 = vmul.f32 %v3914_v11, %v215_v31  ;;  %v3984_v34 = vmul.f32 %v3914_v11, %v229_v15  ;;  %v4004_v18 = vmul.f32 %v3914_v11, %v243_v42 }
 0x22e   : > { %v3903_v8 = vpop.permute.xlu1 %1788  ;;  %v3905_v38 = vpop.permute.xlu0 %1786  ;;  %v4017_v5 = vmul.f32 %v3908_v57, %v243_v42 }
 0x22f   : > { %5596 = vst [vmem:[#allocation185_spill] sm:$0xff] %v3903_v8  ;;  %5597 = vst [vmem:[#allocation186_spill] sm:$0xff] %v3905_v38  ;;  %v3925_v8 = vmul.f32 %v3922_v51, %v201_v39  ;;  %v2151_v38 = vmul.f32 %v2145_v3, %v3654_v47  ;;  %v3950_v3 = vmul.f32 %v3932_v30, %v215_v31 }
 0x230   : > { %2164 = vrot.lane.b32.xlu1 %v2149_v52, %s2849_s26  ;;  %2162 = vrot.lane.b32.xlu0 %v2148_v4, %s2849_s26  ;;  %v3944_v52 = vld [vmem:[%s2941_s15 + $0x20] sm:$0xff]  ;;  %5603 = vst [vmem:[#allocation192_spill] sm:$0xff] %v4017_v5  ;;  %v4033_v5 = vmul.f32 %v3932_v30, %v257_v17 }
 0x231   : > { %v3947_v4 = vmul.f32 %v3944_v52, %v201_v39  ;;  %v3968_v39 = vmul.f32 %v3938_v22, %v215_v31  ;;  %v3971_v43 = vmul.f32 %v3944_v52, %v215_v31  ;;  %v3987_v31 = vmul.f32 %v3922_v51, %v229_v15 }
 0x232   : > { %v3960_v1 = vpop.permute.xlu1 %1818  ;;  %v3962_v6 = vpop.permute.xlu0 %1816  ;;  %v4024_v62 = vmul.f32 %v3944_v52, %v243_v42  ;;  %5606 = vst [vmem:[#allocation195_spill] sm:$0xff] %v4033_v5  ;;  %v285_v5 = vstv %s3958_s21  ;;  %s5063_s21 = sld [smem:[#allocation2 + $0x2a]] }
 0x233   : > { %5598 = vst [vmem:[#allocation187_spill] sm:$0xff] %v3960_v1  ;;  %5599 = vst [vmem:[#allocation188_spill] sm:$0xff] %v3962_v6  ;;  %v2185_v6 = vmul.f32 %v2183_v0, %v3626_v9  ;;  %v2184_v1 = vmul.f32 %v2183_v0, %v3629_v10  ;;  %v4086_v7 = vmul.f32 %v3914_v11, %v285_v5 }
 0x234   : > { %2168 = vrot.lane.b32.xlu1 %v2151_v38, %s2849_s26  ;;  %2166 = vrot.lane.b32.xlu0 %v2150_v2, %s2849_s26  ;;  %v3998_v2 = vmul.f32 %v3944_v52, %v229_v15  ;;  %v4001_v38 = vmul.f32 %v3932_v30, %v243_v42  ;;  %v4020_v15 = vmul.f32 %v3938_v22, %v243_v42 }
 0x235   : > { %5605 = vst [vmem:[#allocation194_spill] sm:$0xff] %v4024_v62  ;;  %v4039_v42 = vmul.f32 %v3922_v51, %v257_v17  ;;  %v4042_v62 = vmul.f32 %v3908_v57, %v257_v17  ;;  %5621 = vst [vmem:[#allocation210_spill] sm:$0xff] %v4086_v7 }
 0x236   : > { %v4009_v14 = vpop.permute.xlu1 %1822  ;;  %v4011_v13 = vpop.permute.xlu0 %1820  ;;  %5604 = vst [vmem:[#allocation193_spill] sm:$0xff] %v4020_v15  ;;  %v4036_v15 = vmul.f32 %v3914_v11, %v257_v17 }
 0x237   : > { %5600 = vst [vmem:[#allocation189_spill] sm:$0xff] %v4009_v14  ;;  %5601 = vst [vmem:[#allocation190_spill] sm:$0xff] %v4011_v13  ;;  %v2187_v13 = vmul.f32 %v2183_v0, %v3640_v12  ;;  %v2186_v14 = vmul.f32 %v2183_v0, %v3643_v44 }
 0x238   : > { %2198 = vrot.lane.b32.xlu1 %v2185_v6, %s2849_s26  ;;  %2196 = vrot.lane.b32.xlu0 %v2184_v1, %s2849_s26  ;;  %5607 = vst [vmem:[#allocation196_spill] sm:$0xff] %v4036_v15  ;;  %5608 = vst [vmem:[#allocation197_spill] sm:$0xff] %v4039_v42  ;;  %v4045_v6 = vmul.f32 %v3938_v22, %v257_v17  ;;  %v4048_v1 = vmul.f32 %v3944_v52, %v257_v17 }
 0x239   : > { %5609 = vst [vmem:[#allocation198_spill] sm:$0xff] %v4042_v62  ;;  %v4061_v42 = vmul.f32 %v3914_v11, %v271_v63  ;;  %v4064_v62 = vmul.f32 %v3922_v51, %v271_v63  ;;  %v4067_v17 = vmul.f32 %v3908_v57, %v271_v63 }
 0x23a   : > { %5610 = vst [vmem:[#allocation199_spill] sm:$0xff] %v4045_v6  ;;  %5611 = vst [vmem:[#allocation200_spill] sm:$0xff] %v4048_v1  ;;  %v4056_v59 = vpop.permute.xlu1 %1826  ;;  %v4058_v15 = vpop.permute.xlu0 %1824  ;;  %v4073_v1 = vmul.f32 %v3944_v52, %v271_v63  ;;  %v4089_v63 = vmul.f32 %v3922_v51, %v285_v5 }
 0x23b   : > { %5613 = vst [vmem:[#allocation202_spill] sm:$0xff] %v4056_v59  ;;  %5614 = vst [vmem:[#allocation203_spill] sm:$0xff] %v4058_v15  ;;  %v299_v59 = vstv %s3977_s22  ;;  %v2189_v15 = vmul.f32 %v2183_v0, %v3654_v47  ;;  %s5075_s22 = sld [smem:[#allocation4 + $0x2]] }
 0x23c   : > { %5615 = vst [vmem:[#allocation204_spill] sm:$0xff] %v4061_v42  ;;  %5616 = vst [vmem:[#allocation205_spill] sm:$0xff] %v4064_v62  ;;  %2202 = vrot.lane.b32.xlu1 %v2187_v13, %s2849_s26  ;;  %2200 = vrot.lane.b32.xlu0 %v2186_v14, %s2849_s26  ;;  %v2188_v62 = vmul.f32 %v2183_v0, %v3657_v60  ;;  %v4095_v13 = vmul.f32 %v3908_v57, %v285_v5  ;;  %v927_v42 = vstv %s4007_s24  ;;  %s5152_s24 = sld [smem:[#allocation2 + $0x33]] }
 0x23d   : > { %5617 = vst [vmem:[#allocation206_spill] sm:$0xff] %v4067_v17  ;;  %5619 = vst [vmem:[#allocation208_spill] sm:$0xff] %v4073_v1  ;;  %v4083_v17 = vmul.f32 %v3932_v30, %v285_v5  ;;  %v4092_v1 = vstv %s3995_s23  ;;  %v4098_v14 = vmul.f32 %v3938_v22, %v285_v5  ;;  %v4101_v0 = vmul.f32 %v3944_v52, %v285_v5  ;;  %s5139_s23 = sld [smem:[#allocation4 + $0x3]] }
 0x23e   : > { %5622 = vst [vmem:[#allocation211_spill] sm:$0xff] %v4089_v63  ;;  %5623 = vst [vmem:[#allocation212_spill] sm:$0xff] %v4095_v13  ;;  %v4106_v7 = vpop.permute.xlu0 %1854  ;;  %v4109_v63 = vmul.f32 %v3932_v30, %v299_v59  ;;  %v4112_v6 = vmul.f32 %v3914_v11, %v299_v59  ;;  %v4115_v13 = vmul.f32 %v3922_v51, %v299_v59 }
 0x23f   : > { %5620 = vst [vmem:[#allocation209_spill] sm:$0xff] %v4083_v17  ;;  %5624 = vst [vmem:[#allocation213_spill] sm:$0xff] %v4098_v14  ;;  %v4104_v17 = vpop.permute.xlu1 %1856  ;;  %v4118_v5 = vmul.f32 %v3908_v57, %v299_v59  ;;  %v2223_v30 = vmul.f32 %v4092_v1, %v3626_v9  ;;  %v2222_v51 = vmul.f32 %v4092_v1, %v3629_v10 }
 0x240   : > { %5625 = vst [vmem:[#allocation214_spill] sm:$0xff] %v4101_v0  ;;  %5626 = vst [vmem:[#allocation215_spill] sm:$0xff] %v4104_v17  ;;  %v4121_v0 = vmul.f32 %v3938_v22, %v299_v59  ;;  %v941_v17 = vstv %s4026_s25  ;;  %2206 = vrot.lane.b32.xlu1 %v2189_v15, %s2849_s26  ;;  %2204 = vrot.lane.b32.xlu0 %v2188_v62, %s2849_s26  ;;  %v4133_v57 = vmul.f32 %v3944_v52, %v299_v59  ;;  %v4136_v22 = vld [vmem:[%s2941_s15 + $0x9] sm:$0xff]  ;;  %s5205_s25 = sld [smem:[#allocation4 + $0x4]] }
 0x241   : > { %5627 = vst [vmem:[#allocation216_spill] sm:$0xff] %v4106_v7  ;;  %5628 = vst [vmem:[#allocation217_spill] sm:$0xff] %v4109_v63  ;;  %v4139_v11 = vmul.f32 %v4136_v22, %v927_v42  ;;  %v4142_v7 = vld [vmem:[%s2941_s15 + $0x1] sm:$0xff]  ;;  %v4148_v62 = vld [vmem:[%s2941_s15 + $0x19] sm:$0xff]  ;;  %v4179_v63 = vmul.f32 %v4136_v22, %v941_v17 }
 0x242   : > { %5629 = vst [vmem:[#allocation218_spill] sm:$0xff] %v4112_v6  ;;  %5630 = vst [vmem:[#allocation219_spill] sm:$0xff] %v4115_v13  ;;  %v4145_v15 = vmul.f32 %v4142_v7, %v927_v42  ;;  %v4156_v59 = vld [vmem:[%s2941_s15 + $0x11] sm:$0xff]  ;;  %v955_v13 = vstv %s4054_s27  ;;  %v4176_v6 = vpop.permute.xlu0 %1858  ;;  %v4185_v14 = vmul.f32 %v4148_v62, %v941_v17  ;;  %s5234_s27 = sld [smem:[#allocation2 + $0x3c]] }
 0x243   : > { %5631 = vst [vmem:[#allocation220_spill] sm:$0xff] %v4118_v5  ;;  %5632 = vst [vmem:[#allocation221_spill] sm:$0xff] %v4121_v0  ;;  %v4151_v0 = vmul.f32 %v4148_v62, %v927_v42  ;;  %v4159_v52 = vmul.f32 %v4156_v59, %v927_v42  ;;  %v4168_v5 = vld [vmem:[%s2941_s15 + $0x21] sm:$0xff] }
 0x244   : > { %5633 = vst [vmem:[#allocation222_spill] sm:$0xff] %v4133_v57  ;;  %5634 = vst [vmem:[#allocation223_spill] sm:$0xff] %v4139_v11  ;;  %v4162_v57 = vld [vmem:[%s2941_s15 + $0x29] sm:$0xf]  ;;  %2236 = vrot.lane.b32.xlu1 %v2223_v30, %s2849_s26  ;;  %2234 = vrot.lane.b32.xlu0 %v2222_v51, %s2849_s26  ;;  %v4212_v30 = vmul.f32 %v4148_v62, %v955_v13  ;;  %v4216_v51 = vadd.f32 %v3079_v19, %v3911_v29 }
 0x245   : > { %5635 = vst [vmem:[#allocation224_spill] sm:$0xff] %v4145_v15  ;;  %5636 = vst [vmem:[#allocation225_spill] sm:$0xff] %v4151_v0  ;;  %v4165_v11 = vmul.f32 %v4162_v57, %v927_v42  ;;  %v4171_v15 = vmul.f32 %v4168_v5, %v927_v42  ;;  %v4174_v0 = vpop.permute.xlu1 %1860  ;;  %v4191_v42 = vmul.f32 %v4162_v57, %v941_v17 }
 0x246   : > { %5637 = vst [vmem:[#allocation226_spill] sm:$0xff] %v4159_v52  ;;  %5640 = vst [vmem:[#allocation229_spill] sm:$0xff] %v4174_v0  ;;  %v4182_v52 = vmul.f32 %v4142_v7, %v941_v17  ;;  %v2224_v0 = vmul.f32 %v4092_v1, %v3643_v44  ;;  %v4238_v19 = vadd.f32 %v3089_v24, %v3935_v16 }
 0x247   : > { %5638 = vst [vmem:[#allocation227_spill] sm:$0xff] %v4165_v11  ;;  %5639 = vst [vmem:[#allocation228_spill] sm:$0xff] %v4171_v15  ;;  %v4188_v11 = vmul.f32 %v4156_v59, %v941_v17  ;;  %v969_v15 = vstv %s4076_s28  ;;  %v2226_v24 = vmul.f32 %v4092_v1, %v3657_v60  ;;  %v4260_v16 = vadd.f32 %v3095_v27, %v3941_v21  ;;  %s5263_s28 = sld [smem:[#allocation4 + $0x5]] }
 0x248   : > { %5641 = vst [vmem:[#allocation230_spill] sm:$0xff] %v4176_v6  ;;  %5642 = vst [vmem:[#allocation231_spill] sm:$0xff] %v4182_v52  ;;  %v2225_v6 = vmul.f32 %v4092_v1, %v3640_v12  ;;  %v4220_v52 = vadd.f32 %v3081_v20, %v3917_v55  ;;  %v4241_v20 = vmul.f32 %v4168_v5, %v955_v13  ;;  %2238 = vrot.lane.b32.xlu0 %v2224_v0, %s2849_s26 }
 0x249   : > { %5643 = vst [vmem:[#allocation232_spill] sm:$0xff] %v4185_v14  ;;  %5644 = vst [vmem:[#allocation233_spill] sm:$0xff] %v4188_v11  ;;  %v4203_v14 = vmul.f32 %v4168_v5, %v941_v17  ;;  %v4206_v11 = vmul.f32 %v4136_v22, %v955_v13  ;;  %v4223_v17 = vmul.f32 %v4156_v59, %v955_v13 }
 0x24a   : > { %5645 = vst [vmem:[#allocation234_spill] sm:$0xff] %v4191_v42  ;;  %v4209_v42 = vmul.f32 %v4142_v7, %v955_v13  ;;  %5649 = vst [vmem:[#allocation238_spill] sm:$0xff] %v4212_v30  ;;  %v4234_v30 = vadd.f32 %v3087_v23, %v3925_v8  ;;  %v4244_v29 = vmul.f32 %v4136_v22, %v969_v15  ;;  %2240 = vrot.lane.b32.xlu1 %v2225_v6, %s2849_s26 }
 0x24b   : > { %5646 = vst [vmem:[#allocation235_spill] sm:$0xff] %v4203_v14  ;;  %5647 = vst [vmem:[#allocation236_spill] sm:$0xff] %v4206_v11  ;;  %v4226_v14 = vmul.f32 %v4162_v57, %v955_v13  ;;  %v4228_v11 = vpop.permute.xlu1 %1864  ;;  %v4247_v55 = vmul.f32 %v4142_v7, %v969_v15  ;;  %v2227_v23 = vmul.f32 %v4092_v1, %v3654_v47  ;;  %v2259_v6 = vstv %s4153_s30  ;;  %s5363_s30 = sld [smem:[#allocation4 + $0x7]] }
 0x24c   : > { %5648 = vst [vmem:[#allocation237_spill] sm:$0xff] %v4209_v42  ;;  %5650 = vst [vmem:[#allocation239_spill] sm:$0xff] %v4228_v11  ;;  %v4230_v42 = vpop.permute.xlu0 %1862  ;;  %v983_v11 = vstv %s4124_s29  ;;  %v4264_v8 = vadd.f32 %v3097_v28, %v3947_v4  ;;  %v4267_v13 = vmul.f32 %v4148_v62, %v969_v15  ;;  %v4272_v0 = vadd.f32 %v3103_v32, %v3950_v3  ;;  %s5314_s29 = sld [smem:[#allocation4 + $0x6]] }
 0x24d   : > { %5651 = vst [vmem:[#allocation240_spill] sm:$0xff] %v4230_v42  ;;  %v4276_v1 = vadd.f32 %v3105_v33, %v3953_v61  ;;  %v4279_v42 = vmul.f32 %v4156_v59, %v969_v15  ;;  %v4282_v27 = vmul.f32 %v4162_v57, %v969_v15  ;;  %v4290_v4 = vadd.f32 %v3111_v36, %v3956_v56 }
 0x24e   : > { %v4294_v32 = vadd.f32 %v3113_v37, %v3965_v48  ;;  %v4297_v33 = vmul.f32 %v4168_v5, %v969_v15  ;;  %v4300_v61 = vmul.f32 %v4136_v22, %v983_v11  ;;  %v4303_v3 = vmul.f32 %v4142_v7, %v983_v11  ;;  %2244 = vrot.lane.b32.xlu1 %v2227_v23, %s2849_s26 }
 0x24f   : > { %5652 = vst [vmem:[#allocation241_spill] sm:$0xff] %v4279_v42  ;;  %5653 = vst [vmem:[#allocation242_spill] sm:$0xff] %v4282_v27  ;;  %v4284_v28 = vpop.permute.xlu1 %1894  ;;  %2242 = vrot.lane.b32.xlu0 %v2226_v24, %s2849_s26  ;;  %v2261_v36 = vmul.f32 %v2259_v6, %v3626_v9  ;;  %v2260_v37 = vmul.f32 %v2259_v6, %v3629_v10  ;;  %v4314_v48 = vadd.f32 %v3119_v40, %v3968_v39  ;;  %v5714_v42 = vld [vmem:[#allocation22_spill] sm:$0xff] }
 0x250   : > { %5654 = vst [vmem:[#allocation243_spill] sm:$0xff] %v4284_v28  ;;  %v4286_v21 = vpop.permute.xlu0 %1892  ;;  %5656 = vst [vmem:[#allocation245_spill] sm:$0xff] %v4297_v33  ;;  %v997_v28 = vstv %s4194_s4  ;;  %v4318_v56 = vadd.f32 %v3121_v41, %v3971_v43  ;;  %v4321_v15 = vmul.f32 %v4148_v62, %v983_v11  ;;  %v4324_v23 = vmul.f32 %v4156_v59, %v983_v11 }
 0x251   : > { %5655 = vst [vmem:[#allocation244_spill] sm:$0xff] %v4286_v21  ;;  %5657 = vst [vmem:[#allocation246_spill] sm:$0xff] %v4300_v61  ;;  %v4330_v24 = vadd.f32 %v3127_v45, %v3975_v35  ;;  %v4334_v40 = vadd.f32 %v3129_v46, %v3984_v34  ;;  %v4337_v39 = vmul.f32 %v4162_v57, %v983_v11  ;;  %v5697_v61 = vld [vmem:[#allocation16_spill] sm:$0xff] }
 0x252   : > { %5658 = vst [vmem:[#allocation247_spill] sm:$0xff] %v4303_v3  ;;  %5659 = vst [vmem:[#allocation248_spill] sm:$0xff] %v4321_v15  ;;  %v4340_v41 = vmul.f32 %v4168_v5, %v983_v11  ;;  %v4352_v45 = vadd.f32 %v3137_v50, %v3990_v26  ;;  %v4355_v46 = vmul.f32 %v4136_v22, %v997_v28  ;;  %v1011_v11 = vstv %s4250_s5  ;;  %v5691_v15 = vld [vmem:[#allocation15_spill] sm:$0xff] }
 0x253   : > { %5660 = vst [vmem:[#allocation249_spill] sm:$0xff] %v4324_v23  ;;  %5661 = vst [vmem:[#allocation250_spill] sm:$0xff] %v4337_v39  ;;  %v4342_v43 = vpop.permute.xlu1 %1898  ;;  %v4348_v23 = vadd.f32 %v3135_v49, %v3987_v31  ;;  %v4358_v34 = vmul.f32 %v4142_v7, %v997_v28  ;;  %v4362_v35 = vadd.f32 %v3143_v53, %v3993_v25  ;;  %2274 = vrot.lane.b32.xlu1 %v2261_v36, %s2849_s26  ;;  %v5669_v36 = vld [vmem:[#allocation8_spill] sm:$0xff]  ;;  %v5689_v39 = vld [vmem:[#allocation14_spill] sm:$0xff] }
 0x254   : > { %5662 = vst [vmem:[#allocation251_spill] sm:$0xff] %v4340_v41  ;;  %5663 = vst [vmem:[#allocation252_spill] sm:$0xff] %v4342_v43  ;;  %v4344_v21 = vpop.permute.xlu0 %1896  ;;  %2272 = vrot.lane.b32.xlu0 %v2260_v37, %s2849_s26  ;;  %v2263_v49 = vmul.f32 %v2259_v6, %v3640_v12  ;;  %v2262_v50 = vmul.f32 %v2259_v6, %v3643_v44  ;;  %v4371_v26 = vadd.f32 %v3145_v54, %v3998_v2  ;;  %v5671_v43 = vld [vmem:[#allocation9_spill] sm:$0xff] }
 0x255   : > { %5664 = vst [vmem:[#allocation253_spill] sm:$0xff] %v4344_v21  ;;  %5665 = vst [vmem:[#allocation254_spill] sm:$0xff] %v4355_v46  ;;  %v4375_v31 = vadd.f32 %v3151_v58, %v4001_v38  ;;  %v4378_v53 = vmul.f32 %v4148_v62, %v997_v28  ;;  %v4381_v25 = vmul.f32 %v4156_v59, %v997_v28  ;;  %v5670_v21 = vld [vmem:[#allocation191_spill] sm:$0xff] }
 0x256   : > { %5666 = vst [vmem:[#allocation255_spill] sm:$0xff] %v4358_v34  ;;  %v4385_v37 = vadd.f32 %v5669_v36, %v4004_v18  ;;  %v4389_v34 = vadd.f32 %v5671_v43, %v5670_v21  ;;  %v4392_v54 = vmul.f32 %v4162_v57, %v997_v28  ;;  %v4395_v58 = vmul.f32 %v4168_v5, %v997_v28  ;;  %v5678_v18 = vld [vmem:[#allocation193_spill] sm:$0xff]  ;;  %v5679_v36 = vld [vmem:[#allocation11_spill] sm:$0xff]  ;;  %v5682_v28 = vld [vmem:[#allocation194_spill] sm:$0xff] }
 0x257   : > { %5667 = vst [vmem:[#allocation256_spill] sm:$0xff] %v4378_v53  ;;  %5668 = vst [vmem:[#allocation257_spill] sm:$0xff] %v4381_v25  ;;  %v4397_v2 = vpop.permute.xlu1 %1902  ;;  %v5676_v25 = vld [vmem:[#allocation192_spill] sm:$0xff]  ;;  %v5677_v53 = vld [vmem:[#allocation10_spill] sm:$0xff]  ;;  %v4407_v41 = vadd.f32 %v5679_v36, %v5678_v18  ;;  %v4410_v21 = vmul.f32 %v4136_v22, %v1011_v11  ;;  %v4413_v43 = vmul.f32 %v4142_v7, %v1011_v11  ;;  %2278 = vrot.lane.b32.xlu1 %v2263_v49, %s2849_s26 }
 0x258   : > { %5672 = vst [vmem:[#allocation8_spill] sm:$0xff] %v4392_v54  ;;  %5673 = vst [vmem:[#allocation191_spill] sm:$0xff] %v4395_v58  ;;  %v4399_v38 = vpop.permute.xlu0 %1900  ;;  %v4403_v46 = vadd.f32 %v5677_v53, %v5676_v25  ;;  %v5683_v58 = vld [vmem:[#allocation12_spill] sm:$0xff]  ;;  %2276 = vrot.lane.b32.xlu0 %v2262_v50, %s2849_s26  ;;  %v2265_v53 = vmul.f32 %v2259_v6, %v3654_v47  ;;  %v2264_v25 = vmul.f32 %v2259_v6, %v3657_v60  ;;  %v5684_v18 = vld [vmem:[#allocation195_spill] sm:$0xff] }
 0x259   : > { %5674 = vst [vmem:[#allocation9_spill] sm:$0xff] %v4397_v2  ;;  %5675 = vst [vmem:[#allocation258_spill] sm:$0xff] %v4399_v38  ;;  %v4417_v54 = vadd.f32 %v5683_v58, %v5682_v28  ;;  %v1025_v2 = vstv %s4306_s6  ;;  %v5685_v36 = vld [vmem:[#allocation13_spill] sm:$0xff]  ;;  %v2297_v58 = vstv %s4326_s7  ;;  %v5688_v28 = vld [vmem:[#allocation196_spill] sm:$0xff]  ;;  %v4444_v6 = vmul.f32 %v4162_v57, %v1011_v11 }
 0x25a   : > { %5680 = vst [vmem:[#allocation192_spill] sm:$0xff] %v4410_v21  ;;  %5681 = vst [vmem:[#allocation10_spill] sm:$0xff] %v4413_v43  ;;  %v4426_v38 = vadd.f32 %v5685_v36, %v5684_v18  ;;  %v4429_v21 = vmul.f32 %v4148_v62, %v1011_v11  ;;  %v4432_v43 = vmul.f32 %v4156_v59, %v1011_v11  ;;  %v5690_v50 = vld [vmem:[#allocation197_spill] sm:$0xff] }
 0x25b   : > { %v4437_v49 = vadd.f32 %v5689_v39, %v5688_v28  ;;  %v4441_v3 = vadd.f32 %v5691_v15, %v5690_v50  ;;  %5692 = vst [vmem:[#allocation194_spill] sm:$0xff] %v4444_v6  ;;  %v4447_v18 = vmul.f32 %v4168_v5, %v1011_v11  ;;  %v4449_v36 = vpop.permute.xlu1 %1932  ;;  %v5698_v39 = vld [vmem:[#allocation199_spill] sm:$0xff]  ;;  %v5699_v28 = vld [vmem:[#allocation17_spill] sm:$0xff]  ;;  %v4462_v15 = vmul.f32 %v4136_v22, %v1025_v2  ;;  %v5702_v11 = vld [vmem:[#allocation200_spill] sm:$0xff] }
 0x25c   : > { %5686 = vst [vmem:[#allocation193_spill] sm:$0xff] %v4429_v21  ;;  %5687 = vst [vmem:[#allocation11_spill] sm:$0xff] %v4432_v43  ;;  %v4451_v21 = vpop.permute.xlu0 %1930  ;;  %v5696_v43 = vld [vmem:[#allocation198_spill] sm:$0xff]  ;;  %v4459_v27 = vadd.f32 %v5699_v28, %v5698_v39  ;;  %v4465_v50 = vmul.f32 %v4142_v7, %v1025_v2  ;;  %2282 = vrot.lane.b32.xlu1 %v2265_v53, %s2849_s26  ;;  %2280 = vrot.lane.b32.xlu0 %v2264_v25, %s2849_s26  ;;  %v5704_v39 = vld [vmem:[#allocation201_spill] sm:$0xff] }
 0x25d   : > { %5693 = vst [vmem:[#allocation12_spill] sm:$0xff] %v4447_v18  ;;  %5694 = vst [vmem:[#allocation195_spill] sm:$0xff] %v4449_v36  ;;  %v4455_v33 = vadd.f32 %v5697_v61, %v5696_v43  ;;  %v5703_v18 = vld [vmem:[#allocation18_spill] sm:$0xff]  ;;  %v2299_v61 = vmul.f32 %v2297_v58, %v3626_v9  ;;  %v2298_v43 = vmul.f32 %v2297_v58, %v3629_v10  ;;  %v5705_v28 = vld [vmem:[#allocation19_spill] sm:$0xff] }
 0x25e   : > { %5695 = vst [vmem:[#allocation13_spill] sm:$0xff] %v4451_v21  ;;  %5700 = vst [vmem:[#allocation196_spill] sm:$0xff] %v4462_v15  ;;  %v4469_v6 = vadd.f32 %v5703_v18, %v5702_v11  ;;  %v4477_v21 = vadd.f32 %v5705_v28, %v5704_v39  ;;  %v5706_v22 = vld [vmem:[#allocation204_spill] sm:$0xff]  ;;  %v4487_v18 = vmul.f32 %v4156_v59, %v1025_v2  ;;  %v5710_v53 = vld [vmem:[#allocation205_spill] sm:$0xff] }
 0x25f   : > { %5701 = vst [vmem:[#allocation14_spill] sm:$0xff] %v4465_v50  ;;  %v5707_v36 = vld [vmem:[#allocation20_spill] sm:$0xff]  ;;  %v4484_v50 = vmul.f32 %v4148_v62, %v1025_v2  ;;  %v5711_v25 = vld [vmem:[#allocation21_spill] sm:$0xff]  ;;  %v5713_v15 = vld [vmem:[#allocation206_spill] sm:$0xff]  ;;  %v4500_v28 = vmul.f32 %v4162_v57, %v1025_v2  ;;  %v4505_v62 = vpop.permute.xlu1 %1936 }
 0x260   : > { %v4481_v7 = vadd.f32 %v5707_v36, %v5706_v22  ;;  %5709 = vst [vmem:[#allocation15_spill] sm:$0xff] %v4487_v18  ;;  %v4493_v11 = vadd.f32 %v5711_v25, %v5710_v53  ;;  %v4497_v39 = vadd.f32 %v5714_v42, %v5713_v15  ;;  %v4503_v36 = vmul.f32 %v4168_v5, %v1025_v2  ;;  %v4507_v59 = vpop.permute.xlu0 %1934  ;;  %v5720_v22 = vld [vmem:[#allocation207_spill] sm:$0xff]  ;;  %v5722_v53 = vld [vmem:[#allocation208_spill] sm:$0xff]  ;;  %v5724_v42 = vld [vmem:[#allocation209_spill] sm:$0xff] }
 0x261   : > { %5708 = vst [vmem:[#allocation197_spill] sm:$0xff] %v4484_v50  ;;  %5716 = vst [vmem:[#allocation199_spill] sm:$0xff] %v4500_v28  ;;  %v5721_v18 = vld [vmem:[#allocation23_spill] sm:$0xff]  ;;  %v5723_v25 = vld [vmem:[#allocation24_spill] sm:$0xff]  ;;  %2312 = vrot.lane.b32.xlu1 %v2299_v61, %s2849_s26  ;;  %2310 = vrot.lane.b32.xlu0 %v2298_v43, %s2849_s26 }
 0x262   : > { %5712 = vst [vmem:[#allocation198_spill] sm:$0xff] %v4493_v11  ;;  %5715 = vst [vmem:[#allocation16_spill] sm:$0xff] %v4497_v39  ;;  %v4511_v50 = vadd.f32 %v5721_v18, %v5720_v22  ;;  %v4515_v11 = vadd.f32 %v5723_v25, %v5722_v53  ;;  %v5725_v15 = vld [vmem:[#allocation25_spill] sm:$0xff]  ;;  %v5727_v57 = vld [vmem:[#allocation210_spill] sm:$0xff]  ;;  %v2301_v18 = vmul.f32 %v2297_v58, %v3640_v12 }
 0x263   : > { %5717 = vst [vmem:[#allocation17_spill] sm:$0xff] %v4503_v36  ;;  %5718 = vst [vmem:[#allocation200_spill] sm:$0xff] %v4505_v62  ;;  %v4519_v39 = vadd.f32 %v5725_v15, %v5724_v42  ;;  %v5728_v28 = vld [vmem:[#allocation26_spill] sm:$0xff]  ;;  %v5730_v2 = vld [vmem:[#allocation211_spill] sm:$0xff]  ;;  %v2300_v22 = vmul.f32 %v2297_v58, %v3643_v44 }
 0x264   : > { %5719 = vst [vmem:[#allocation18_spill] sm:$0xff] %v4507_v59  ;;  %v4523_v5 = vadd.f32 %v5728_v28, %v5727_v57  ;;  %v5731_v62 = vld [vmem:[#allocation27_spill] sm:$0xff]  ;;  %v5733_v53 = vld [vmem:[#allocation212_spill] sm:$0xff]  ;;  %v5736_v15 = vld [vmem:[#allocation213_spill] sm:$0xff] }
 0x265   : > { %5726 = vst [vmem:[#allocation201_spill] sm:$0xff] %v4519_v39  ;;  %v4527_v36 = vadd.f32 %v5731_v62, %v5730_v2  ;;  %v5734_v25 = vld [vmem:[#allocation28_spill] sm:$0xff]  ;;  %v5737_v59 = vld [vmem:[#allocation29_spill] sm:$0xff]  ;;  %v5740_v2 = vld [vmem:[#allocation38_spill] sm:$0xff]  ;;  %2316 = vrot.lane.b32.xlu1 %v2301_v18, %s2849_s26  ;;  %2314 = vrot.lane.b32.xlu0 %v2300_v22, %s2849_s26 }
 0x266   : > { %5729 = vst [vmem:[#allocation19_spill] sm:$0xff] %v4523_v5  ;;  %v4535_v42 = vadd.f32 %v5734_v25, %v5733_v53  ;;  %v4539_v28 = vadd.f32 %v5737_v59, %v5736_v15  ;;  %v5739_v57 = vld [vmem:[#allocation37_spill] sm:$0xff]  ;;  %v648_v61 = vadd.f32 %v5740_v2, %v4220_v52  ;;  %v5742_v43 = vld [vmem:[#allocation30_spill] sm:$0xff]  ;;  %v5745_v44 = vld [vmem:[#allocation31_spill] sm:$0xff] }
 0x267   : > { %5732 = vst [vmem:[#allocation204_spill] sm:$0xff] %v4527_v36  ;;  %v649_v62 = vadd.f32 %v5739_v57, %v4238_v19  ;;  %v5741_v36 = vld [vmem:[#allocation214_spill] sm:$0xff]  ;;  %v5744_v12 = vld [vmem:[#allocation217_spill] sm:$0xff]  ;;  %v5747_v53 = vld [vmem:[#allocation39_spill] sm:$0xff]  ;;  %v4559_v19 = vpop.permute.xlu0 %1938 }
 0x268   : > { %5735 = vst [vmem:[#allocation20_spill] sm:$0xff] %v4535_v42  ;;  %5738 = vst [vmem:[#allocation205_spill] sm:$0xff] %v4539_v28  ;;  %v4547_v5 = vadd.f32 %v5742_v43, %v5741_v36  ;;  %v4551_v39 = vadd.f32 %v5745_v44, %v5744_v12  ;;  %v651_v25 = vadd.f32 %v5747_v53, %v4234_v30  ;;  %v5748_v59 = vld [vmem:[#allocation40_spill] sm:$0xff]  ;;  %v4557_v28 = vpop.permute.xlu1 %1940  ;;  %v5751_v52 = vld [vmem:[#allocation218_spill] sm:$0xff] }
 0x269   : > { %v650_v15 = vadd.f32 %v5748_v59, %v4216_v51  ;;  %5749 = vst [vmem:[#allocation22_spill] sm:$0xff] %v4557_v28  ;;  %5750 = vst [vmem:[#allocation207_spill] sm:$0xff] %v4559_v19  ;;  %v5752_v57 = vld [vmem:[#allocation32_spill] sm:$0xff]  ;;  %v5753_v36 = vld [vmem:[#allocation219_spill] sm:$0xff]  ;;  %v2335_v19 = vstv %s4489_s8 }
 0x26a   : > { %5743 = vst [vmem:[#allocation21_spill] sm:$0xff] %v4547_v5  ;;  %5746 = vst [vmem:[#allocation206_spill] sm:$0xff] %v4551_v39  ;;  %v4563_v2 = vadd.f32 %v5752_v57, %v5751_v52  ;;  %v5754_v43 = vld [vmem:[#allocation33_spill] sm:$0xff]  ;;  %v5755_v12 = vld [vmem:[#allocation220_spill] sm:$0xff]  ;;  %v2303_v52 = vmul.f32 %v2297_v58, %v3654_v47  ;;  %v2302_v57 = vmul.f32 %v2297_v58, %v3657_v60 }
 0x26b   : > { %v4567_v5 = vadd.f32 %v5754_v43, %v5753_v36  ;;  %v5756_v44 = vld [vmem:[#allocation34_spill] sm:$0xff]  ;;  %v5758_v30 = vld [vmem:[#allocation221_spill] sm:$0xff]  ;;  %v5759_v53 = vld [vmem:[#allocation35_spill] sm:$0xff] }
 0x26c   : > { %v4571_v39 = vadd.f32 %v5756_v44, %v5755_v12  ;;  %v4575_v42 = vadd.f32 %v5759_v53, %v5758_v30  ;;  %v5760_v51 = vld [vmem:[#allocation222_spill] sm:$0xff]  ;;  %v5761_v59 = vld [vmem:[#allocation36_spill] sm:$0xff]  ;;  %v5762_v36 = vld [vmem:[#allocation41_spill] sm:$0xff]  ;;  %2320 = vrot.lane.b32.xlu1 %v2303_v52, %s2849_s26  ;;  %2318 = vrot.lane.b32.xlu0 %v2302_v57, %s2849_s26 }
 0x26d   : > { %v4579_v28 = vadd.f32 %v5761_v59, %v5760_v51  ;;  %v653_v43 = vadd.f32 %v5762_v36, %v4260_v16  ;;  %v5763_v12 = vld [vmem:[#allocation223_spill] sm:$0xff]  ;;  %v5764_v30 = vld [vmem:[#allocation224_spill] sm:$0xff]  ;;  %v5765_v51 = vld [vmem:[#allocation42_spill] sm:$0xff]  ;;  %v4604_v16 = vpop.permute.xlu1 %1970 }
 0x26e   : > { %5757 = vst [vmem:[#allocation23_spill] sm:$0xff] %v4571_v39  ;;  %v4588_v44 = vadd.f32 %v5763_v12, %v649_v62  ;;  %v4591_v53 = vadd.f32 %v5764_v30, %v648_v61  ;;  %v652_v59 = vadd.f32 %v5765_v51, %v4264_v8  ;;  %v5766_v18 = vld [vmem:[#allocation43_spill] sm:$0xff]  ;;  %v5767_v39 = vld [vmem:[#allocation225_spill] sm:$0xff]  ;;  %v5768_v60 = vld [vmem:[#allocation226_spill] sm:$0xff]  ;;  %v4606_v62 = vpop.permute.xlu0 %1968 }
 0x26f   : > { %v687_v22 = vadd.f32 %v5766_v18, %v4272_v0  ;;  %v4599_v47 = vadd.f32 %v5767_v39, %v651_v25  ;;  %v4602_v58 = vadd.f32 %v5768_v60, %v650_v15  ;;  %5769 = vst [vmem:[#allocation208_spill] sm:$0xff] %v4604_v16  ;;  %5770 = vst [vmem:[#allocation24_spill] sm:$0xff] %v4606_v62  ;;  %v5771_v61 = vld [vmem:[#allocation44_spill] sm:$0xff]  ;;  %v5772_v12 = vld [vmem:[#allocation45_spill] sm:$0xff] }
 0x270   : > { %v686_v36 = vadd.f32 %v5771_v61, %v4276_v1  ;;  %v689_v30 = vadd.f32 %v5772_v12, %v4290_v4  ;;  %v5773_v8 = vld [vmem:[#allocation46_spill] sm:$0xff]  ;;  %v5774_v0 = vld [vmem:[#allocation47_spill] sm:$0xff]  ;;  %v5775_v25 = vld [vmem:[#allocation48_spill] sm:$0xff]  ;;  %v2337_v18 = vmul.f32 %v2335_v19, %v3626_v9  ;;  %v2336_v1 = vmul.f32 %v2335_v19, %v3629_v10 }
 0x271   : > { %v688_v51 = vadd.f32 %v5773_v8, %v4294_v32  ;;  %v691_v39 = vadd.f32 %v5774_v0, %v4314_v48  ;;  %v690_v15 = vadd.f32 %v5775_v25, %v4318_v56  ;;  %v5776_v60 = vld [vmem:[#allocation49_spill] sm:$0xff]  ;;  %v5777_v61 = vld [vmem:[#allocation50_spill] sm:$0xff]  ;;  %v5778_v12 = vld [vmem:[#allocation51_spill] sm:$0xff] }
 0x272   : > { %v725_v4 = vadd.f32 %v5776_v60, %v4330_v24  ;;  %v724_v32 = vadd.f32 %v5777_v61, %v4334_v40  ;;  %v727_v48 = vadd.f32 %v5778_v12, %v4348_v23  ;;  %v5779_v8 = vld [vmem:[#allocation227_spill] sm:$0xff]  ;;  %v5780_v52 = vld [vmem:[#allocation52_spill] sm:$0xff]  ;;  %v5781_v9 = vld [vmem:[#allocation53_spill] sm:$0xff]  ;;  %v4639_v24 = vadd.f32 %v4179_v63, %v687_v22  ;;  %v4641_v40 = vpop.permute.xlu1 %1974  ;;  %v4643_v60 = vpop.permute.xlu0 %1972  ;;  %2350 = vrot.lane.b32.xlu1 %v2337_v18, %s2849_s26 }
 0x273   : > { %v4629_v56 = vadd.f32 %v5779_v8, %v653_v43  ;;  %v726_v57 = vadd.f32 %v5780_v52, %v4352_v45  ;;  %v729_v10 = vadd.f32 %v5781_v9, %v4362_v35  ;;  %v5782_v0 = vld [vmem:[#allocation228_spill] sm:$0xff]  ;;  %5783 = vst [vmem:[#allocation209_spill] sm:$0xff] %v4641_v40  ;;  %5784 = vst [vmem:[#allocation25_spill] sm:$0xff] %v4643_v60  ;;  %v5785_v23 = vld [vmem:[#allocation231_spill] sm:$0xff]  ;;  %2348 = vrot.lane.b32.xlu0 %v2336_v1, %s2849_s26 }
 0x274   : > { %v4636_v25 = vadd.f32 %v5782_v0, %v652_v59  ;;  %v4646_v43 = vadd.f32 %v5785_v23, %v686_v36  ;;  %v5786_v61 = vld [vmem:[#allocation232_spill] sm:$0xff]  ;;  %v5787_v45 = vld [vmem:[#allocation233_spill] sm:$0xff]  ;;  %v5788_v35 = vld [vmem:[#allocation234_spill] sm:$0xff] }
 0x275   : > { %v4649_v12 = vadd.f32 %v5786_v61, %v689_v30  ;;  %v4652_v8 = vadd.f32 %v5787_v45, %v688_v51  ;;  %v4655_v52 = vadd.f32 %v5788_v35, %v691_v39  ;;  %v5789_v59 = vld [vmem:[#allocation235_spill] sm:$0xff]  ;;  %v5790_v51 = vld [vmem:[#allocation54_spill] sm:$0xff]  ;;  %v5791_v39 = vld [vmem:[#allocation236_spill] sm:$0xff] }
 0x276   : > { %v4658_v9 = vadd.f32 %v5789_v59, %v690_v15  ;;  %v4663_v63 = vld [vmem:[%s2941_s15 + $0x1a] sm:$0xff]  ;;  %v4667_v36 = vld [vmem:[%s2941_s15 + $0x12] sm:$0xff]  ;;  %v728_v0 = vadd.f32 %v5790_v51, %v4371_v26  ;;  %v4673_v23 = vadd.f32 %v5791_v39, %v725_v4  ;;  %v5792_v15 = vld [vmem:[#allocation237_spill] sm:$0xff]  ;;  %v4688_v26 = vadd.f32 %v4223_v17, %v726_v57  ;;  %v4695_v51 = vpop.permute.xlu0 %1976 }
 0x277   : > { %v2339_v22 = vmul.f32 %v4663_v63, %v2335_v19  ;;  %v2338_v30 = vmul.f32 %v4667_v36, %v2335_v19  ;;  %v4676_v61 = vadd.f32 %v5792_v15, %v724_v32  ;;  %v5793_v18 = vld [vmem:[#allocation238_spill] sm:$0xff]  ;;  %v5794_v45 = vld [vmem:[#allocation55_spill] sm:$0xff]  ;;  %v5795_v59 = vld [vmem:[#allocation56_spill] sm:$0xff]  ;;  %v4691_v4 = vadd.f32 %v4226_v14, %v729_v10  ;;  %v4693_v32 = vpop.permute.xlu1 %1978  ;;  %5797 = vst [vmem:[#allocation26_spill] sm:$0xff] %v4695_v51 }
 0x278   : > { %v4679_v1 = vadd.f32 %v5793_v18, %v727_v48  ;;  %v763_v35 = vadd.f32 %v5794_v45, %v4375_v31  ;;  %v762_v60 = vadd.f32 %v5795_v59, %v4385_v37  ;;  %5796 = vst [vmem:[#allocation210_spill] sm:$0xff] %v4693_v32  ;;  %v5798_v48 = vld [vmem:[#allocation57_spill] sm:$0xff]  ;;  %v5799_v15 = vld [vmem:[#allocation58_spill] sm:$0xff]  ;;  %v5800_v31 = vld [vmem:[#allocation59_spill] sm:$0xff] }
 0x279   : > { %v765_v39 = vadd.f32 %v5798_v48, %v4389_v34  ;;  %v764_v18 = vadd.f32 %v5799_v15, %v4403_v46  ;;  %v767_v45 = vadd.f32 %v5800_v31, %v4407_v41  ;;  %v5801_v37 = vld [vmem:[#allocation60_spill] sm:$0xff]  ;;  %v5802_v57 = vld [vmem:[#allocation61_spill] sm:$0xff]  ;;  %2354 = vrot.lane.b32.xlu1 %v2339_v22, %s2849_s26  ;;  %2352 = vrot.lane.b32.xlu0 %v2338_v30, %s2849_s26  ;;  %v5803_v41 = vld [vmem:[#allocation62_spill] sm:$0xff] }
 0x27a   : > { %v766_v17 = vadd.f32 %v5801_v37, %v4417_v54  ;;  %v801_v14 = vadd.f32 %v5802_v57, %v4426_v38  ;;  %v4710_v10 = vld [vmem:[%s2941_s15 + $0x2a] sm:$0xf]  ;;  %v4714_v59 = vld [vmem:[%s2941_s15 + $0x22] sm:$0xff]  ;;  %v800_v48 = vadd.f32 %v5803_v41, %v4437_v49  ;;  %v5804_v54 = vld [vmem:[#allocation63_spill] sm:$0xff]  ;;  %v4724_v22 = vadd.f32 %v4241_v20, %v728_v0 }
 0x27b   : > { %v2341_v34 = vmul.f32 %v4710_v10, %v2335_v19  ;;  %v2340_v46 = vmul.f32 %v4714_v59, %v2335_v19  ;;  %v803_v15 = vadd.f32 %v5804_v54, %v4441_v3  ;;  %v5805_v38 = vld [vmem:[#allocation64_spill] sm:$0xff]  ;;  %v5806_v30 = vld [vmem:[#allocation65_spill] sm:$0xff]  ;;  %v5807_v57 = vld [vmem:[#allocation66_spill] sm:$0xff]  ;;  %v4733_v51 = vadd.f32 %v4244_v29, %v763_v35  ;;  %v4738_v49 = vpop.permute.xlu1 %2008 }
 0x27c   : > { %v802_v31 = vadd.f32 %v5805_v38, %v4455_v33  ;;  %v805_v37 = vadd.f32 %v5806_v30, %v4459_v27  ;;  %v804_v19 = vadd.f32 %v5807_v57, %v4469_v6  ;;  %v4736_v3 = vadd.f32 %v4247_v55, %v762_v60  ;;  %5808 = vst [vmem:[#allocation211_spill] sm:$0xff] %v4738_v49  ;;  %v4740_v33 = vpop.permute.xlu0 %2006  ;;  %v5810_v20 = vld [vmem:[#allocation67_spill] sm:$0xff]  ;;  %v5811_v41 = vld [vmem:[#allocation68_spill] sm:$0xff]  ;;  %v5812_v6 = vld [vmem:[#allocation241_spill] sm:$0xff] }
 0x27d   : > { %5809 = vst [vmem:[#allocation27_spill] sm:$0xff] %v4740_v33  ;;  %v839_v0 = vadd.f32 %v5810_v20, %v4477_v21  ;;  %v838_v27 = vadd.f32 %v5811_v41, %v4481_v7  ;;  %v4747_v54 = vadd.f32 %v4267_v13, %v765_v39  ;;  %v4750_v29 = vadd.f32 %v5812_v6, %v764_v18  ;;  %v5813_v35 = vld [vmem:[#allocation242_spill] sm:$0xff]  ;;  %v5814_v55 = vld [vmem:[#allocation245_spill] sm:$0xff]  ;;  %v5818_v21 = vld [vmem:[#allocation247_spill] sm:$0xff] }
 0x27e   : > { %v4753_v38 = vadd.f32 %v5813_v35, %v767_v45  ;;  %v4756_v60 = vadd.f32 %v5814_v55, %v766_v17  ;;  %v5816_v30 = vld [vmem:[#allocation246_spill] sm:$0xff]  ;;  %2358 = vrot.lane.b32.xlu1 %v2341_v34, %s2849_s26  ;;  %2356 = vrot.lane.b32.xlu0 %v2340_v46, %s2849_s26  ;;  %v4764_v7 = vadd.f32 %v5818_v21, %v800_v48  ;;  %v5820_v13 = vld [vmem:[#allocation248_spill] sm:$0xff]  ;;  %v5822_v18 = vld [vmem:[#allocation249_spill] sm:$0xff]  ;;  %v1653_v17 = vstv %s4681_s9  ;;  %s4813_s26 = sld [smem:[#allocation2 + $0x18]] }
 0x27f   : > { %v4759_v57 = vadd.f32 %v5816_v30, %v801_v14  ;;  %v4767_v39 = vadd.f32 %v5820_v13, %v803_v15  ;;  %v4770_v45 = vadd.f32 %v5822_v18, %v802_v31  ;;  %v5824_v20 = vld [vmem:[#allocation198_spill] sm:$0xff]  ;;  %v5825_v41 = vld [vmem:[#allocation69_spill] sm:$0xff]  ;;  %v5826_v6 = vld [vmem:[#allocation16_spill] sm:$0xff]  ;;  %v4783_v21 = vpop.permute.xlu1 %2012 }
 0x280   : > { %5815 = vst [vmem:[#allocation212_spill] sm:$0xff] %v4756_v60  ;;  %5819 = vst [vmem:[#allocation213_spill] sm:$0xff] %v4764_v7  ;;  %v841_v14 = vadd.f32 %v5825_v41, %v5824_v20  ;;  %v5827_v35 = vld [vmem:[#allocation70_spill] sm:$0xff]  ;;  %v5830_v48 = vld [vmem:[#allocation251_spill] sm:$0xff]  ;;  %v4785_v15 = vpop.permute.xlu0 %2010 }
 0x281   : > { %5817 = vst [vmem:[#allocation28_spill] sm:$0xff] %v4759_v57  ;;  %5821 = vst [vmem:[#allocation29_spill] sm:$0xff] %v4767_v39  ;;  %v840_v34 = vadd.f32 %v5827_v35, %v5826_v6  ;;  %v5828_v55 = vld [vmem:[#allocation250_spill] sm:$0xff]  ;;  %v4781_v30 = vadd.f32 %v5830_v48, %v804_v19  ;;  %v5834_v31 = vld [vmem:[#allocation71_spill] sm:$0xff] }
 0x282   : > { %5823 = vst [vmem:[#allocation37_spill] sm:$0xff] %v4770_v45  ;;  %v4778_v46 = vadd.f32 %v5828_v55, %v805_v37  ;;  %5832 = vst [vmem:[#allocation30_spill] sm:$0xff] %v4783_v21  ;;  %v843_v13 = vadd.f32 %v5834_v31, %v4511_v50  ;;  %v5835_v18 = vld [vmem:[#allocation72_spill] sm:$0xff]  ;;  %v5836_v41 = vld [vmem:[#allocation254_spill] sm:$0xff] }
 0x283   : > { %5831 = vst [vmem:[#allocation214_spill] sm:$0xff] %v4781_v30  ;;  %5833 = vst [vmem:[#allocation217_spill] sm:$0xff] %v4785_v15  ;;  %v842_v20 = vadd.f32 %v5835_v18, %v4515_v11  ;;  %v4792_v33 = vadd.f32 %v5836_v41, %v839_v0  ;;  %v5838_v6 = vld [vmem:[#allocation255_spill] sm:$0xff]  ;;  %v5840_v35 = vld [vmem:[#allocation201_spill] sm:$0xff]  ;;  %v4833_v30 = vmul.f32 %v4663_v63, %v1653_v17 }
 0x284   : > { %5829 = vst [vmem:[#allocation38_spill] sm:$0xff] %v4778_v46  ;;  %v4795_v37 = vadd.f32 %v5838_v6, %v838_v27  ;;  %v5841_v19 = vld [vmem:[#allocation73_spill] sm:$0xff]  ;;  %v5842_v48 = vld [vmem:[#allocation19_spill] sm:$0xff]  ;;  %v5843_v21 = vld [vmem:[#allocation74_spill] sm:$0xff]  ;;  %v4896_v39 = vstv %s4813_s26 }
 0x285   : > { %5837 = vst [vmem:[#allocation31_spill] sm:$0xff] %v4792_v33  ;;  %v877_v55 = vadd.f32 %v5841_v19, %v5840_v35  ;;  %v876_v49 = vadd.f32 %v5843_v21, %v5842_v48  ;;  %v4802_v15 = vld [vmem:[%s2941_s15 + $0xa] sm:$0xff]  ;;  %v4808_v50 = vld [vmem:[%s2941_s15 + $0x2] sm:$0xff]  ;;  %v5845_v27 = vld [vmem:[#allocation75_spill] sm:$0xff]  ;;  %v1667_v35 = vstv %s4726_s17 }
 0x286   : > { %5839 = vst [vmem:[#allocation39_spill] sm:$0xff] %v4795_v37  ;;  %v4805_v32 = vmul.f32 %v4802_v15, %v1653_v17  ;;  %v4811_v11 = vmul.f32 %v4808_v50, %v1653_v17  ;;  %v5844_v0 = vld [vmem:[#allocation204_spill] sm:$0xff]  ;;  %v5846_v18 = vld [vmem:[#allocation83_spill] sm:$0xff]  ;;  %v5852_v37 = vld [vmem:[#allocation257_spill] sm:$0xff] }
 0x287   : > { %v879_v31 = vadd.f32 %v5845_v27, %v5844_v0  ;;  %v919_v21 = vadd.f32 %v5846_v18, %v4575_v42  ;;  %v5847_v41 = vld [vmem:[#allocation84_spill] sm:$0xff]  ;;  %v4830_v33 = vadd.f32 %v5852_v37, %v840_v34  ;;  %v4835_v0 = vpop.permute.xlu1 %2016  ;;  %v4837_v27 = vpop.permute.xlu0 %2014  ;;  %v5862_v37 = vld [vmem:[#allocation10_spill] sm:$0xff]  ;;  %v5913_v57 = vld [vmem:[#allocation181_spill] sm:$0xff] }
 0x288   : > { %v918_v6 = vadd.f32 %v5847_v41, %v4579_v28  ;;  %v5848_v19 = vld [vmem:[#allocation20_spill] sm:$0xff]  ;;  %5854 = vst [vmem:[#allocation32_spill] sm:$0xff] %v4835_v0  ;;  %5855 = vst [vmem:[#allocation219_spill] sm:$0xff] %v4837_v27  ;;  %v5858_v28 = vld [vmem:[#allocation191_spill] sm:$0xff]  ;;  %v4858_v27 = vmul.f32 %v4714_v59, %v1653_v17 }
 0x289   : > { %v5849_v48 = vld [vmem:[#allocation76_spill] sm:$0xff]  ;;  %5853 = vst [vmem:[#allocation218_spill] sm:$0xff] %v4830_v33  ;;  %v4843_v41 = vadd.f32 %v5858_v28, %v842_v20  ;;  %v5864_v20 = vld [vmem:[#allocation193_spill] sm:$0xff]  ;;  %v5866_v28 = vld [vmem:[#allocation199_spill] sm:$0xff] }
 0x28a   : > { %v878_v40 = vadd.f32 %v5849_v48, %v5848_v19  ;;  %v5850_v62 = vld [vmem:[#allocation256_spill] sm:$0xff]  ;;  %v4846_v19 = vmul.f32 %v4667_v36, %v1653_v17  ;;  %v4855_v48 = vadd.f32 %v5862_v37, %v876_v49  ;;  %v1037_v0 = vadd.f32 %v5866_v28, %v919_v21  ;;  %v5868_v49 = vld [vmem:[#allocation205_spill] sm:$0xff]  ;;  %v5872_v33 = vld [vmem:[#allocation11_spill] sm:$0xff] }
 0x28b   : > { %v4827_v16 = vadd.f32 %v5850_v62, %v841_v14  ;;  %v5856_v42 = vld [vmem:[#allocation8_spill] sm:$0xff]  ;;  %5859 = vst [vmem:[#allocation220_spill] sm:$0xff] %v4843_v41  ;;  %v4849_v62 = vmul.f32 %v4710_v10, %v1653_v17  ;;  %v5867_v41 = vld [vmem:[#allocation17_spill] sm:$0xff]  ;;  %v4883_v21 = vpop.permute.xlu0 %2044 }
 0x28c   : > { %v4840_v18 = vadd.f32 %v5856_v42, %v843_v13  ;;  %v5860_v14 = vld [vmem:[#allocation192_spill] sm:$0xff]  ;;  %5863 = vst [vmem:[#allocation221_spill] sm:$0xff] %v4855_v48  ;;  %v4861_v13 = vmul.f32 %v4802_v15, %v1667_v35  ;;  %v4864_v42 = vadd.f32 %v5864_v20, %v879_v31  ;;  %v5870_v17 = vld [vmem:[#allocation21_spill] sm:$0xff]  ;;  %v5871_v48 = vld [vmem:[#allocation78_spill] sm:$0xff]  ;;  %v4879_v31 = vmul.f32 %v4663_v63, %v1667_v35  ;;  %v4881_v20 = vpop.permute.xlu1 %2046 }
 0x28d   : > { %5851 = vst [vmem:[#allocation40_spill] sm:$0xff] %v4827_v16  ;;  %v4852_v34 = vadd.f32 %v5860_v14, %v877_v55  ;;  %v4869_v55 = vmul.f32 %v4808_v50, %v1667_v35  ;;  %v5869_v14 = vld [vmem:[#allocation77_spill] sm:$0xff]  ;;  %v4876_v16 = vadd.f32 %v5872_v33, %v878_v40  ;;  %5874 = vst [vmem:[#allocation36_spill] sm:$0xff] %v4881_v20  ;;  %v5880_v45 = vld [vmem:[#allocation132_spill] sm:$0xff]  ;;  %v4899_v20 = vstv %s4815_s10 }
 0x28e   : > { %5857 = vst [vmem:[#allocation33_spill] sm:$0xff] %v4840_v18  ;;  %5865 = vst [vmem:[#allocation35_spill] sm:$0xff] %v4864_v42  ;;  %v1036_v18 = vadd.f32 %v5867_v41, %v918_v6  ;;  %v881_v37 = vadd.f32 %v5869_v14, %v5868_v49  ;;  %v5876_v6 = vld [vmem:[#allocation206_spill] sm:$0xff]  ;;  %v5877_v41 = vld [vmem:[#allocation79_spill] sm:$0xff] }
 0x28f   : > { %5861 = vst [vmem:[#allocation34_spill] sm:$0xff] %v4852_v34  ;;  %v880_v34 = vadd.f32 %v5871_v48, %v5870_v17  ;;  %5873 = vst [vmem:[#allocation222_spill] sm:$0xff] %v4876_v16  ;;  %v915_v28 = vadd.f32 %v5877_v41, %v5876_v6  ;;  %v5878_v42 = vld [vmem:[#allocation80_spill] sm:$0xff]  ;;  %v5879_v49 = vld [vmem:[#allocation131_spill] sm:$0xff] }
 0x290   : > { %5875 = vst [vmem:[#allocation41_spill] sm:$0xff] %v4883_v21  ;;  %v914_v46 = vadd.f32 %v5878_v42, %v4563_v2  ;;  %v1341_v14 = vadd.f32 %v5879_v49, %v1037_v0  ;;  %v1340_v48 = vadd.f32 %v5880_v45, %v1036_v18  ;;  %v5881_v40 = vld [vmem:[#allocation85_spill] sm:$0xff]  ;;  %v5882_v17 = vld [vmem:[#allocation86_spill] sm:$0xff]  ;;  %5883 = vst [vmem:[#allocation223_spill] sm:$0xff] %v4899_v20 }
 0x291   : > { %v1071_v33 = vadd.f32 %v5881_v40, %v4588_v44  ;;  %v1070_v16 = vadd.f32 %v5882_v17, %v4591_v53  ;;  %v5884_v21 = vld [vmem:[#allocation179_spill] sm:$0xff]  ;;  %v5885_v6 = vld [vmem:[#allocation180_spill] sm:$0xff]  ;;  %v1757_v2 = vmul.f32 %v4710_v10, %v4899_v20  ;;  %v1756_v45 = vmul.f32 %v4714_v59, %v4899_v20  ;;  %v5886_v0 = vld [vmem:[#allocation194_spill] sm:$0xff] }
 0x292   : > { %v1645_v7 = vadd.f32 %v5884_v21, %v1341_v14  ;;  %v1644_v41 = vadd.f32 %v5885_v6, %v1340_v48  ;;  %v4908_v18 = vadd.f32 %v5886_v0, %v881_v37  ;;  %v5888_v44 = vld [vmem:[#allocation133_spill] sm:$0xff]  ;;  %v5889_v53 = vld [vmem:[#allocation134_spill] sm:$0xff]  ;;  %v4913_v40 = vmul.f32 %v4667_v36, %v1667_v35  ;;  %v4917_v21 = vpop.permute.xlu1 %2050  ;;  %v4919_v14 = vpop.permute.xlu0 %2048  ;;  %v5892_v48 = vld [vmem:[#allocation12_spill] sm:$0xff] }
 0x293   : > { %v1375_v42 = vadd.f32 %v5888_v44, %v1071_v33  ;;  %v1374_v49 = vadd.f32 %v5889_v53, %v1070_v16  ;;  %5890 = vst [vmem:[#allocation42_spill] sm:$0xff] %v4917_v21  ;;  %5891 = vst [vmem:[#allocation43_spill] sm:$0xff] %v4919_v14  ;;  %v4924_v17 = vadd.f32 %v5892_v48, %v880_v34  ;;  %v5894_v37 = vld [vmem:[#allocation196_spill] sm:$0xff]  ;;  %v5896_v0 = vld [vmem:[#allocation81_spill] sm:$0xff] }
 0x294   : > { %5887 = vst [vmem:[#allocation224_spill] sm:$0xff] %v4908_v18  ;;  %v4927_v6 = vadd.f32 %v5894_v37, %v915_v28  ;;  %v4930_v33 = vmul.f32 %v4710_v10, %v1667_v35  ;;  %v4933_v16 = vmul.f32 %v4714_v59, %v1667_v35  ;;  %v917_v44 = vadd.f32 %v5896_v0, %v4567_v5  ;;  %v5897_v53 = vld [vmem:[#allocation23_spill] sm:$0xff]  ;;  %v5898_v21 = vld [vmem:[#allocation82_spill] sm:$0xff]  ;;  %v5902_v37 = vld [vmem:[#allocation88_spill] sm:$0xff] }
 0x295   : > { %5893 = vst [vmem:[#allocation225_spill] sm:$0xff] %v4924_v17  ;;  %v916_v14 = vadd.f32 %v5898_v21, %v5897_v53  ;;  %v5899_v20 = vld [vmem:[#allocation14_spill] sm:$0xff]  ;;  %v4944_v34 = vmul.f32 %v4802_v15, %v4896_v39  ;;  %v5901_v28 = vld [vmem:[#allocation87_spill] sm:$0xff]  ;;  %v1072_v35 = vadd.f32 %v5902_v37, %v4602_v58  ;;  %v1762_v17 = vadd.f32 %v1756_v45, %v1644_v41  ;;  %v5903_v5 = vld [vmem:[#allocation89_spill] sm:$0xff] }
 0x296   : > { %5895 = vst [vmem:[#allocation226_spill] sm:$0xff] %v4927_v6  ;;  %v4940_v18 = vadd.f32 %v5899_v20, %v914_v46  ;;  %v1073_v48 = vadd.f32 %v5901_v28, %v4599_v47  ;;  %v1763_v6 = vadd.f32 %v1757_v2, %v1645_v7  ;;  %v1075_v0 = vadd.f32 %v5903_v5, %v4629_v56  ;;  %v2055_v53 = vpop.permute.xlu1 %2054  ;;  %v5904_v47 = vld [vmem:[#allocation135_spill] sm:$0xff]  ;;  %v5905_v58 = vld [vmem:[#allocation136_spill] sm:$0xff]  ;;  %v5909_v2 = vld [vmem:[#allocation197_spill] sm:$0xff] }
 0x297   : > { %v1661_v21 = vadd.f32 %v4805_v32, %v1375_v42  ;;  %v1660_v46 = vadd.f32 %v4811_v11, %v1374_v49  ;;  %v4956_v20 = vmul.f32 %v4808_v50, %v4896_v39  ;;  %v1376_v7 = vadd.f32 %v5905_v58, %v1072_v35  ;;  %v5908_v32 = vld [vmem:[#allocation90_spill] sm:$0xff]  ;;  %v5910_v42 = vld [vmem:[#allocation15_spill] sm:$0xff]  ;;  %v5912_v37 = vld [vmem:[#allocation137_spill] sm:$0xff] }
 0x298   : > { %5900 = vst [vmem:[#allocation44_spill] sm:$0xff] %v4940_v18  ;;  %v2053_v18 = vpop.permute.xlu0 %2052  ;;  %v1377_v28 = vadd.f32 %v5904_v47, %v1073_v48  ;;  %v4960_v41 = vadd.f32 %v2055_v53, %v1763_v6  ;;  %v1074_v11 = vadd.f32 %v5908_v32, %v4636_v25  ;;  %v4967_v45 = vadd.f32 %v5909_v2, %v917_v44  ;;  %v5914_v47 = vld [vmem:[#allocation182_spill] sm:$0xff]  ;;  %v5915_v25 = vld [vmem:[#allocation91_spill] sm:$0xff]  ;;  %v5917_v2 = vld [vmem:[#allocation92_spill] sm:$0xff] }
 0x299   : > { %v4962_v56 = vadd.f32 %v2053_v18, %v1762_v17  ;;  %v4970_v49 = vadd.f32 %v5910_v42, %v916_v14  ;;  %v1379_v5 = vadd.f32 %v5912_v37, %v1075_v0  ;;  %v1797_v48 = vadd.f32 %v5913_v57, %v1661_v21  ;;  %v5916_v14 = vld [vmem:[#allocation138_spill] sm:$0xff]  ;;  %v5918_v37 = vld [vmem:[#allocation93_spill] sm:$0xff] }
 0x29a   : > { %5906 = vst [vmem:[#allocation45_spill] sm:$0xff] %v4960_v41  ;;  %v1796_v60 = vadd.f32 %v5914_v47, %v1660_v46  ;;  %v4977_v6 = vmul.f32 %v4663_v63, %v4896_v39  ;;  %v4981_v18 = vmul.f32 %v4667_v36, %v4896_v39  ;;  %v1109_v17 = vadd.f32 %v5915_v25, %v4639_v24  ;;  %v2085_v57 = vpop.permute.xlu1 %2084  ;;  %v5919_v24 = vld [vmem:[#allocation94_spill] sm:$0xff]  ;;  %v5921_v41 = vld [vmem:[#allocation184_spill] sm:$0xff] }
 0x29b   : > { %5907 = vst [vmem:[#allocation46_spill] sm:$0xff] %v4962_v56  ;;  %5911 = vst [vmem:[#allocation47_spill] sm:$0xff] %v4970_v49  ;;  %v1378_v44 = vadd.f32 %v5916_v14, %v1074_v11  ;;  %v4988_v35 = vstv %s4915_s11  ;;  %v2373_v0 = vstv %s4921_s14  ;;  %v1663_v46 = vadd.f32 %v4833_v30, %v1377_v28  ;;  %v5920_v14 = vld [vmem:[#allocation183_spill] sm:$0xff] }
 0x29c   : > { %v2083_v21 = vpop.permute.xlu0 %2082  ;;  %v1662_v53 = vadd.f32 %v4846_v19, %v1376_v7  ;;  %v2101_v58 = vadd.f32 %v2085_v57, %v1797_v48  ;;  %v1108_v42 = vadd.f32 %v5917_v2, %v4646_v43  ;;  %v1111_v47 = vadd.f32 %v5918_v37, %v4649_v12  ;;  %v5922_v43 = vld [vmem:[#allocation139_spill] sm:$0xff]  ;;  %v5923_v19 = vld [vmem:[#allocation140_spill] sm:$0xff]  ;;  %v5927_v2 = vld [vmem:[#allocation186_spill] sm:$0xff] }
 0x29d   : > { %v2100_v32 = vadd.f32 %v2083_v21, %v1796_v60  ;;  %v1110_v11 = vadd.f32 %v5919_v24, %v4652_v8  ;;  %v1665_v25 = vadd.f32 %v4849_v62, %v1379_v5  ;;  %v1799_v56 = vadd.f32 %v5920_v14, %v1663_v46  ;;  %v5924_v21 = vld [vmem:[#allocation141_spill] sm:$0xff] }
 0x29e   : > { %v1798_v49 = vadd.f32 %v5921_v41, %v1662_v53  ;;  %v2375_v30 = vadd.f32 %v2373_v0, %v2101_v58  ;;  %v1413_v60 = vadd.f32 %v5922_v43, %v1109_v17  ;;  %v1412_v12 = vadd.f32 %v5923_v19, %v1108_v42  ;;  %v2089_v62 = vpop.permute.xlu1 %2088  ;;  %v5925_v53 = vld [vmem:[#allocation142_spill] sm:$0xff] }
 0x29f   : > { %v2374_v28 = vadd.f32 %v2373_v0, %v2100_v32  ;;  %v1664_v8 = vadd.f32 %v4858_v27, %v1378_v44  ;;  %v2103_v48 = vadd.f32 %v2089_v62, %v1799_v56  ;;  %v1415_v46 = vadd.f32 %v5924_v21, %v1111_v47  ;;  %v5926_v44 = vld [vmem:[#allocation185_spill] sm:$0xff]  ;;  %v5930_v62 = vld [vmem:[#allocation187_spill] sm:$0xff] }
 0x2a0   : > { %v2087_v7 = vpop.permute.xlu0 %2086  ;;  %v2381_v41 = vmax.f32 %v2375_v30, 0.0  ;;  %v1414_v58 = vadd.f32 %v5925_v53, %v1110_v11  ;;  %v5016_v17 = vmul.f32 %v4710_v10, %v4896_v39  ;;  %v5020_v27 = vmul.f32 %v4714_v59, %v4896_v39  ;;  %v5932_v21 = vld [vmem:[#allocation143_spill] sm:$0xff] }
 0x2a1   : > { %v2380_v5 = vmax.f32 %v2374_v28, 0.0  ;;  %v2102_v57 = vadd.f32 %v2087_v7, %v1798_v49  ;;  %v1801_v32 = vadd.f32 %v5926_v44, %v1665_v25  ;;  %v1800_v42 = vadd.f32 %v5927_v2, %v1664_v8 }
 0x2a2   : > { %2388 = vst.msk [vmem:[%s5005_s19 + $0x8] sm:$0xff] %vm2386_vm0, %v2381_v41  ;;  %v2377_v56 = vadd.f32 %v2373_v0, %v2103_v48  ;;  %v1675_v37 = vadd.f32 %v4861_v13, %v1413_v60  ;;  %v1674_v47 = vadd.f32 %v4869_v55, %v1412_v12  ;;  %v5032_v39 = vmul.f32 %v4802_v15, %v4988_v35  ;;  %v2093_v11 = vpop.permute.xlu1 %2092  ;;  %v5928_v13 = vld [vmem:[#allocation95_spill] sm:$0xff]  ;;  %v5929_v55 = vld [vmem:[#allocation96_spill] sm:$0xff] }
 0x2a3   : > { %2387 = vst.msk [vmem:[%s5005_s19] sm:$0xff] %vm2386_vm0, %v2380_v5  ;;  %v2376_v49 = vadd.f32 %v2373_v0, %v2102_v57  ;;  %v5036_v24 = vmul.f32 %v4808_v50, %v4988_v35  ;;  %v2105_v28 = vadd.f32 %v2093_v11, %v1801_v32  ;;  %v1113_v60 = vadd.f32 %v5928_v13, %v4655_v52  ;;  %v5931_v41 = vld [vmem:[#allocation188_spill] sm:$0xff] }
 0x2a4   : > { %v2091_v25 = vpop.permute.xlu0 %2090  ;;  %v2383_v14 = vmax.f32 %v2377_v56, 0.0  ;;  %v1112_v19 = vadd.f32 %v5929_v55, %v4658_v9  ;;  %v1677_v12 = vadd.f32 %v4879_v31, %v1415_v46  ;;  %v1676_v8 = vadd.f32 %v4913_v40, %v1414_v58  ;;  %v5933_v52 = vld [vmem:[#allocation144_spill] sm:$0xff] }
 0x2a5   : > { %v2382_v30 = vmax.f32 %v2376_v49, 0.0  ;;  %v2104_v43 = vadd.f32 %v2091_v25, %v1800_v42  ;;  %v1835_v7 = vadd.f32 %v5930_v62, %v1675_v37  ;;  %v1834_v5 = vadd.f32 %v5931_v41, %v1674_v47  ;;  %v5934_v42 = vld [vmem:[#allocation97_spill] sm:$0xff]  ;;  %v5935_v49 = vld [vmem:[#allocation98_spill] sm:$0xff]  ;;  %v5936_v37 = vld [vmem:[#allocation99_spill] sm:$0xff] }
 0x2a6   : > { %2390 = vst.msk [vmem:[%s5005_s19 + $0x18] sm:$0xff] %vm2386_vm0, %v2383_v14  ;;  %v2379_v48 = vadd.f32 %v2373_v0, %v2105_v28  ;;  %v1417_v53 = vadd.f32 %v5932_v21, %v1113_v60  ;;  %v1416_v44 = vadd.f32 %v5933_v52, %v1112_v19  ;;  %v2395_v9 = vstv %s5010_s20  ;;  %v2123_v31 = vpop.permute.xlu1 %2122  ;;  %v5937_v25 = vld [vmem:[#allocation189_spill] sm:$0xff]  ;;  %v5940_v60 = vld [vmem:[#allocation146_spill] sm:$0xff]  ;;  %v5942_v21 = vld [vmem:[#allocation147_spill] sm:$0xff] }
 0x2a7   : > { %2389 = vst.msk [vmem:[%s5005_s19 + $0x10] sm:$0xff] %vm2386_vm0, %v2382_v30  ;;  %v2378_v57 = vadd.f32 %v2373_v0, %v2104_v43  ;;  %v2139_v32 = vadd.f32 %v2123_v31, %v1835_v7  ;;  %v1147_v56 = vadd.f32 %v5934_v42, %v4673_v23  ;;  %v1146_v0 = vadd.f32 %v5935_v49, %v4676_v61  ;;  %v5938_v30 = vld [vmem:[#allocation190_spill] sm:$0xff]  ;;  %v5939_v61 = vld [vmem:[#allocation145_spill] sm:$0xff] }
 0x2a8   : > { %v2121_v40 = vpop.permute.xlu0 %2120  ;;  %v2385_v46 = vmax.f32 %v2379_v48, 0.0  ;;  %v1149_v47 = vadd.f32 %v5936_v37, %v4679_v1  ;;  %v5061_v11 = vmul.f32 %v4663_v63, %v4988_v35  ;;  %v1837_v14 = vadd.f32 %v5937_v25, %v1677_v12  ;;  %v5941_v48 = vld [vmem:[#allocation100_spill] sm:$0xff] }
 0x2a9   : > { %v2384_v58 = vmax.f32 %v2378_v57, 0.0  ;;  %v2138_v2 = vadd.f32 %v2121_v40, %v1834_v5  ;;  %v1836_v28 = vadd.f32 %v5938_v30, %v1676_v8  ;;  %v2397_v23 = vadd.f32 %v2395_v9, %v2139_v32  ;;  %v5946_v30 = vld [vmem:[#allocation101_spill] sm:$0xff] }
 0x2aa   : > { %2393 = vst.msk [vmem:[%s5005_s19 + $0x28] sm:$0xf] %vm2392_vm1, %v2385_v46  ;;  %v1451_v13 = vadd.f32 %v5939_v61, %v1147_v56  ;;  %v1450_v1 = vadd.f32 %v5940_v60, %v1146_v0  ;;  %v1679_v55 = vadd.f32 %v4930_v33, %v1417_v53  ;;  %v1678_v19 = vadd.f32 %v4933_v16, %v1416_v44  ;;  %v2127_v62 = vpop.permute.xlu1 %2126  ;;  %v5943_v16 = vld [vmem:[#allocation202_spill] sm:$0xff]  ;;  %v5944_v44 = vld [vmem:[#allocation203_spill] sm:$0xff] }
 0x2ab   : > { %2391 = vst.msk [vmem:[%s5005_s19 + $0x20] sm:$0xff] %vm2386_vm0, %v2384_v58  ;;  %v2396_v43 = vadd.f32 %v2395_v9, %v2138_v2  ;;  %v2403_v8 = vmax.f32 %v2397_v23, 0.0  ;;  %v2141_v41 = vadd.f32 %v2127_v62, %v1837_v14  ;;  %v1148_v57 = vadd.f32 %v5941_v48, %v4688_v26  ;;  %v5945_v58 = vld [vmem:[#allocation148_spill] sm:$0xff]  ;;  %v5947_v23 = vld [vmem:[#allocation102_spill] sm:$0xff]  ;;  %v5948_v61 = vld [vmem:[#allocation215_spill] sm:$0xff] }
 0x2ac   : > { %v2125_v12 = vpop.permute.xlu0 %2124  ;;  %v1453_v52 = vadd.f32 %v5942_v21, %v1149_v47  ;;  %v5082_v31 = vmul.f32 %v4667_v36, %v4988_v35  ;;  %v5086_v33 = vmul.f32 %v4710_v10, %v4988_v35  ;;  %v1839_v53 = vadd.f32 %v5943_v16, %v1679_v55  ;;  %v5952_v21 = vld [vmem:[#allocation103_spill] sm:$0xff] }
 0x2ad   : > { %v2402_v7 = vmax.f32 %v2396_v43, 0.0  ;;  %v2140_v5 = vadd.f32 %v2125_v12, %v1836_v28  ;;  %v1838_v40 = vadd.f32 %v5944_v44, %v1678_v19  ;;  %2702 = vst.msk [vmem:[%s5005_s19 + $0x38] sm:$0xff] %vm2386_vm0, %v2403_v8  ;;  %v2399_v26 = vadd.f32 %v2395_v9, %v2141_v41  ;;  %v5950_v19 = vld [vmem:[#allocation149_spill] sm:$0xff] }
 0x2ae   : > { %v1452_v32 = vadd.f32 %v5945_v58, %v1148_v57  ;;  %v1689_v2 = vadd.f32 %v4944_v34, %v1451_v13  ;;  %v1688_v42 = vadd.f32 %v4956_v20, %v1450_v1  ;;  %v5099_v56 = vmul.f32 %v4714_v59, %v4988_v35  ;;  %v2131_v49 = vpop.permute.xlu1 %2130  ;;  %v5949_v13 = vld [vmem:[#allocation216_spill] sm:$0xff] }
 0x2af   : > { %2701 = vst.msk [vmem:[%s5005_s19 + $0x30] sm:$0xff] %vm2386_vm0, %v2402_v7  ;;  %v2398_v46 = vadd.f32 %v2395_v9, %v2140_v5  ;;  %v2405_v37 = vmax.f32 %v2399_v26, 0.0  ;;  %v2143_v25 = vadd.f32 %v2131_v49, %v1839_v53  ;;  %v1151_v28 = vadd.f32 %v5946_v30, %v4691_v4  ;;  %v5951_v4 = vld [vmem:[#allocation150_spill] sm:$0xff]  ;;  %v5954_v53 = vld [vmem:[#allocation105_spill] sm:$0xff] }
 0x2b0   : > { %v2129_v0 = vpop.permute.xlu0 %2128  ;;  %v1150_v34 = vadd.f32 %v5947_v23, %v4724_v22  ;;  %v1691_v43 = vadd.f32 %v4977_v6, %v1453_v52  ;;  %v5107_v20 = vstv %s5063_s21  ;;  %v1873_v35 = vadd.f32 %v5948_v61, %v1689_v2  ;;  %v5957_v2 = vld [vmem:[#allocation151_spill] sm:$0xff]  ;;  %v5959_v23 = vld [vmem:[#allocation106_spill] sm:$0xff] }
 0x2b1   : > { %v2404_v47 = vmax.f32 %v2398_v46, 0.0  ;;  %v2142_v14 = vadd.f32 %v2129_v0, %v1838_v40  ;;  %v1872_v60 = vadd.f32 %v5949_v13, %v1688_v42  ;;  %2704 = vst.msk [vmem:[%s5005_s19 + $0x48] sm:$0xff] %vm2386_vm0, %v2405_v37  ;;  %v2401_v1 = vadd.f32 %v2395_v9, %v2143_v25  ;;  %v5956_v46 = vld [vmem:[#allocation230_spill] sm:$0xff] }
 0x2b2   : > { %v1455_v62 = vadd.f32 %v5950_v19, %v1151_v28  ;;  %v1454_v12 = vadd.f32 %v5951_v4, %v1150_v34  ;;  %v1690_v22 = vadd.f32 %v4981_v18, %v1452_v32  ;;  %v2416_v6 = vstv %s5075_s22  ;;  %v2161_v8 = vpop.permute.xlu1 %2160  ;;  %v5955_v18 = vld [vmem:[#allocation229_spill] sm:$0xff]  ;;  %v5963_v19 = vld [vmem:[#allocation154_spill] sm:$0xff] }
 0x2b3   : > { %2703 = vst.msk [vmem:[%s5005_s19 + $0x40] sm:$0xff] %vm2386_vm0, %v2404_v47  ;;  %v2400_v55 = vadd.f32 %v2395_v9, %v2142_v14  ;;  %v2407_v41 = vmax.f32 %v2401_v1, 0.0  ;;  %v2177_v48 = vadd.f32 %v2161_v8, %v1873_v35  ;;  %v1185_v52 = vadd.f32 %v5952_v21, %v4733_v51  ;;  %v5953_v9 = vld [vmem:[#allocation104_spill] sm:$0xff]  ;;  %v5961_v35 = vld [vmem:[#allocation239_spill] sm:$0xff] }
 0x2b4   : > { %v2159_v7 = vpop.permute.xlu0 %2158  ;;  %v1184_v16 = vadd.f32 %v5953_v9, %v4736_v3  ;;  %v1187_v44 = vadd.f32 %v5954_v53, %v4747_v54  ;;  %v5127_v40 = vmul.f32 %v4802_v15, %v5107_v20  ;;  %v1875_v26 = vadd.f32 %v5955_v18, %v1691_v43  ;;  %v5958_v3 = vld [vmem:[#allocation152_spill] sm:$0xff]  ;;  %v5960_v43 = vld [vmem:[#allocation153_spill] sm:$0xff]  ;;  %v5964_v21 = vld [vmem:[#allocation107_spill] sm:$0xff] }
 0x2b5   : > { %v2406_v5 = vmax.f32 %v2400_v55, 0.0  ;;  %v2176_v57 = vadd.f32 %v2159_v7, %v1872_v60  ;;  %v1874_v58 = vadd.f32 %v5956_v46, %v1690_v22  ;;  %2706 = vst.msk [vmem:[%s5005_s19 + $0x58] sm:$0xf] %vm2392_vm1, %v2407_v41  ;;  %v2418_v32 = vadd.f32 %v2416_v6, %v2177_v48  ;;  %v5962_v60 = vld [vmem:[#allocation240_spill] sm:$0xff] }
 0x2b6   : > { %v1489_v42 = vadd.f32 %v5957_v2, %v1185_v52  ;;  %v1488_v49 = vadd.f32 %v5958_v3, %v1184_v16  ;;  %v1693_v54 = vadd.f32 %v5016_v17, %v1455_v62  ;;  %v1692_v0 = vadd.f32 %v5020_v27, %v1454_v12  ;;  %v2165_v37 = vpop.permute.xlu1 %2164  ;;  %v5965_v9 = vld [vmem:[#allocation212_spill] sm:$0xff] }
 0x2b7   : > { %2705 = vst.msk [vmem:[%s5005_s19 + $0x50] sm:$0xff] %vm2386_vm0, %v2406_v5  ;;  %v2417_v51 = vadd.f32 %v2416_v6, %v2176_v57  ;;  %v2424_v25 = vmax.f32 %v2418_v32, 0.0  ;;  %v2179_v30 = vadd.f32 %v2165_v37, %v1875_v26  ;;  %v1186_v34 = vadd.f32 %v5959_v23, %v4750_v29  ;;  %v5966_v16 = vld [vmem:[#allocation108_spill] sm:$0xff]  ;;  %v5969_v32 = vld [vmem:[#allocation155_spill] sm:$0xff]  ;;  %v5973_v23 = vld [vmem:[#allocation213_spill] sm:$0xff] }
 0x2b8   : > { %v2163_v47 = vpop.permute.xlu0 %2162  ;;  %v1491_v61 = vadd.f32 %v5960_v43, %v1187_v44  ;;  %v5146_v17 = vmul.f32 %v4808_v50, %v5107_v20  ;;  %v5150_v27 = vmul.f32 %v4663_v63, %v5107_v20  ;;  %v1877_v13 = vadd.f32 %v5961_v35, %v1693_v54  ;;  %v5967_v44 = vld [vmem:[#allocation243_spill] sm:$0xff]  ;;  %v5968_v26 = vld [vmem:[#allocation244_spill] sm:$0xff]  ;;  %v5975_v43 = vld [vmem:[#allocation29_spill] sm:$0xff] }
 0x2b9   : > { %v2423_v14 = vmax.f32 %v2417_v51, 0.0  ;;  %v2178_v28 = vadd.f32 %v2163_v47, %v1874_v58  ;;  %v1876_v1 = vadd.f32 %v5962_v60, %v1692_v0  ;;  %2709 = vst.msk [vmem:[%s5005_s19 + $0x68] sm:$0xff] %vm2386_vm0, %v2424_v25  ;;  %v2420_v29 = vadd.f32 %v2416_v6, %v2179_v30  ;;  %v5970_v2 = vld [vmem:[#allocation156_spill] sm:$0xff]  ;;  %v5972_v30 = vld [vmem:[#allocation109_spill] sm:$0xff] }
 0x2ba   : > { %v1490_v62 = vadd.f32 %v5963_v19, %v1186_v34  ;;  %v1703_v4 = vadd.f32 %v5032_v39, %v1489_v42  ;;  %v1702_v12 = vadd.f32 %v5036_v24, %v1488_v49  ;;  %v5165_v22 = vmul.f32 %v4667_v36, %v5107_v20  ;;  %v2169_v8 = vpop.permute.xlu1 %2168  ;;  %v5977_v60 = vld [vmem:[#allocation252_spill] sm:$0xff] }
 0x2bb   : > { %2708 = vst.msk [vmem:[%s5005_s19 + $0x60] sm:$0xff] %vm2386_vm0, %v2423_v14  ;;  %v2419_v55 = vadd.f32 %v2416_v6, %v2178_v28  ;;  %v2426_v41 = vmax.f32 %v2420_v29, 0.0  ;;  %v2181_v48 = vadd.f32 %v2169_v8, %v1877_v13  ;;  %v1189_v52 = vadd.f32 %v5964_v21, %v4753_v38  ;;  %v5971_v14 = vld [vmem:[#allocation28_spill] sm:$0xff] }
 0x2bc   : > { %v2167_v7 = vpop.permute.xlu0 %2166  ;;  %v1188_v39 = vadd.f32 %v5966_v16, %v5965_v9  ;;  %v1705_v53 = vadd.f32 %v5061_v11, %v1491_v61  ;;  %v5174_v24 = vmul.f32 %v4710_v10, %v5107_v20  ;;  %v1911_v18 = vadd.f32 %v5967_v44, %v1703_v4  ;;  %v5976_v61 = vld [vmem:[#allocation111_spill] sm:$0xff]  ;;  %v5981_v16 = vld [vmem:[#allocation37_spill] sm:$0xff] }
 0x2bd   : > { %v2425_v5 = vmax.f32 %v2419_v55, 0.0  ;;  %v2180_v57 = vadd.f32 %v2167_v7, %v1876_v1  ;;  %v1910_v46 = vadd.f32 %v5968_v26, %v1702_v12  ;;  %2711 = vst.msk [vmem:[%s5005_s19 + $0x78] sm:$0xff] %vm2386_vm0, %v2426_v41  ;;  %v2422_v58 = vadd.f32 %v2416_v6, %v2181_v48  ;;  %v5978_v1 = vld [vmem:[#allocation253_spill] sm:$0xff]  ;;  %v5980_v12 = vld [vmem:[#allocation158_spill] sm:$0xff]  ;;  %v5983_v44 = vld [vmem:[#allocation159_spill] sm:$0xff] }
 0x2be   : > { %v1493_v51 = vadd.f32 %v5969_v32, %v1189_v52  ;;  %v1492_v11 = vadd.f32 %v5970_v2, %v1188_v39  ;;  %v1704_v42 = vadd.f32 %v5082_v31, %v1490_v62  ;;  %v2437_v3 = vstv %s5139_s23  ;;  %v2199_v49 = vpop.permute.xlu1 %2198  ;;  %v5979_v62 = vld [vmem:[#allocation157_spill] sm:$0xff]  ;;  %v5982_v39 = vld [vmem:[#allocation112_spill] sm:$0xff] }
 0x2bf   : > { %2710 = vst.msk [vmem:[%s5005_s19 + $0x70] sm:$0xff] %vm2386_vm0, %v2425_v5  ;;  %v2421_v38 = vadd.f32 %v2416_v6, %v2180_v57  ;;  %v2428_v0 = vmax.f32 %v2422_v58, 0.0  ;;  %v2215_v47 = vadd.f32 %v2199_v49, %v1911_v18  ;;  %v1223_v28 = vadd.f32 %v5972_v30, %v5971_v14  ;;  %v5974_v6 = vld [vmem:[#allocation110_spill] sm:$0xff]  ;;  %v5986_v2 = vld [vmem:[#allocation160_spill] sm:$0xff] }
 0x2c0   : > { %v2197_v54 = vpop.permute.xlu0 %2196  ;;  %v1222_v34 = vadd.f32 %v5974_v6, %v5973_v23  ;;  %v1225_v35 = vadd.f32 %v5976_v61, %v5975_v43  ;;  %v5193_v13 = vstv %s5152_s24  ;;  %v1913_v31 = vadd.f32 %v5977_v60, %v1705_v53  ;;  %v5985_v58 = vld [vmem:[#allocation258_spill] sm:$0xff]  ;;  %v5991_v61 = vld [vmem:[#allocation195_spill] sm:$0xff]  ;;  %v5992_v60 = vld [vmem:[#allocation13_spill] sm:$0xff] }
 0x2c1   : > { %v2427_v37 = vmax.f32 %v2421_v38, 0.0  ;;  %v2214_v25 = vadd.f32 %v2197_v54, %v1910_v46  ;;  %v1912_v29 = vadd.f32 %v5978_v1, %v1704_v42  ;;  %2713 = vst.msk [vmem:[%s5005_s19 + $0x88] sm:$0xf] %vm2392_vm1, %v2428_v0  ;;  %v2439_v55 = vadd.f32 %v2437_v3, %v2215_v47  ;;  %v5987_v30 = vld [vmem:[#allocation38_spill] sm:$0xff] }
 0x2c2   : > { %v1527_v4 = vadd.f32 %v5979_v62, %v1223_v28  ;;  %v1526_v8 = vadd.f32 %v5980_v12, %v1222_v34  ;;  %v1707_v7 = vadd.f32 %v5086_v33, %v1493_v51  ;;  %v1706_v41 = vadd.f32 %v5099_v56, %v1492_v11  ;;  %v2203_v5 = vpop.permute.xlu1 %2202  ;;  %v5984_v56 = vld [vmem:[#allocation9_spill] sm:$0xff]  ;;  %v5989_v6 = vld [vmem:[#allocation214_spill] sm:$0xff] }
 0x2c3   : > { %2712 = vst.msk [vmem:[%s5005_s19 + $0x80] sm:$0xff] %vm2386_vm0, %v2427_v37  ;;  %v2438_v19 = vadd.f32 %v2437_v3, %v2214_v25  ;;  %v2445_v57 = vmax.f32 %v2439_v55, 0.0  ;;  %v2217_v52 = vadd.f32 %v2203_v5, %v1913_v31  ;;  %v1224_v53 = vadd.f32 %v5982_v39, %v5981_v16  ;;  %v5988_v28 = vld [vmem:[#allocation113_spill] sm:$0xff]  ;;  %v5990_v34 = vld [vmem:[#allocation114_spill] sm:$0xff]  ;;  %v5997_v16 = vld [vmem:[#allocation39_spill] sm:$0xff] }
 0x2c4   : > { %v2201_v48 = vpop.permute.xlu0 %2200  ;;  %v1529_v18 = vadd.f32 %v5983_v44, %v1225_v35  ;;  %v1714_v26 = vmul.f32 %v4714_v59, %v5107_v20  ;;  %v5214_v33 = vmul.f32 %v4802_v15, %v5193_v13  ;;  %v1915_v46 = vadd.f32 %v5984_v56, %v1707_v7  ;;  %v5993_v55 = vld [vmem:[#allocation161_spill] sm:$0xff]  ;;  %v5994_v62 = vld [vmem:[#allocation162_spill] sm:$0xff] }
 0x2c5   : > { %v2444_v21 = vmax.f32 %v2438_v19, 0.0  ;;  %v2216_v9 = vadd.f32 %v2201_v48, %v1912_v29  ;;  %v1914_v38 = vadd.f32 %v5985_v58, %v1706_v41  ;;  %2716 = vst.msk [vmem:[%s5005_s19 + $0x98] sm:$0xff] %vm2386_vm0, %v2445_v57  ;;  %v2441_v32 = vadd.f32 %v2437_v3, %v2217_v52  ;;  %v5996_v52 = vld [vmem:[#allocation115_spill] sm:$0xff]  ;;  %v6000_v44 = vld [vmem:[#allocation117_spill] sm:$0xff]  ;;  %v6002_v58 = vld [vmem:[#allocation18_spill] sm:$0xff] }
 0x2c6   : > { %v1528_v11 = vadd.f32 %v5986_v2, %v1224_v53  ;;  %v1717_v42 = vadd.f32 %v5127_v40, %v1527_v4  ;;  %v1716_v20 = vadd.f32 %v5146_v17, %v1526_v8  ;;  %v1724_v49 = vmul.f32 %v4808_v50, %v5193_v13  ;;  %v2207_v54 = vpop.permute.xlu1 %2206  ;;  %v5999_v53 = vld [vmem:[#allocation40_spill] sm:$0xff]  ;;  %v6003_v2 = vld [vmem:[#allocation163_spill] sm:$0xff] }
 0x2c7   : > { %2715 = vst.msk [vmem:[%s5005_s19 + $0x90] sm:$0xff] %vm2386_vm0, %v2444_v21  ;;  %v2440_v51 = vadd.f32 %v2437_v3, %v2216_v9  ;;  %v2447_v37 = vmax.f32 %v2441_v32, 0.0  ;;  %v2219_v25 = vadd.f32 %v2207_v54, %v1915_v46  ;;  %v1227_v23 = vadd.f32 %v5988_v28, %v5987_v30  ;;  %v5995_v21 = vld [vmem:[#allocation31_spill] sm:$0xff] }
 0x2c8   : > { %v2205_v0 = vpop.permute.xlu0 %2204  ;;  %v1226_v40 = vadd.f32 %v5990_v34, %v5989_v6  ;;  %v1719_v43 = vadd.f32 %v5150_v27, %v1529_v18  ;;  %v1727_v17 = vmul.f32 %v4663_v63, %v5193_v13  ;;  %v1949_v35 = vadd.f32 %v5991_v61, %v1717_v42  ;;  %v6004_v42 = vld [vmem:[#allocation164_spill] sm:$0xff]  ;;  %v6006_v6 = vld [vmem:[#allocation118_spill] sm:$0xff] }
 0x2c9   : > { %v2446_v47 = vmax.f32 %v2440_v51, 0.0  ;;  %v2218_v14 = vadd.f32 %v2205_v0, %v1914_v38  ;;  %v1948_v31 = vadd.f32 %v5992_v60, %v1716_v20  ;;  %2718 = vst.msk [vmem:[%s5005_s19 + $0xa8] sm:$0xff] %vm2386_vm0, %v2447_v37  ;;  %v2443_v1 = vadd.f32 %v2437_v3, %v2219_v25  ;;  %v6009_v60 = vld [vmem:[#allocation207_spill] sm:$0xff] }
 0x2ca   : > { %v1531_v19 = vadd.f32 %v5993_v55, %v1227_v23  ;;  %v1530_v27 = vadd.f32 %v5994_v62, %v1226_v40  ;;  %v1718_v4 = vadd.f32 %v5165_v22, %v1528_v11  ;;  %v2458_v12 = vstv %s5205_s25  ;;  %v2237_v8 = vpop.permute.xlu1 %2236  ;;  %v6001_v22 = vld [vmem:[#allocation200_spill] sm:$0xff]  ;;  %v6005_v23 = vld [vmem:[#allocation218_spill] sm:$0xff]  ;;  %v6007_v40 = vld [vmem:[#allocation165_spill] sm:$0xff] }
 0x2cb   : > { %2717 = vst.msk [vmem:[%s5005_s19 + $0xa0] sm:$0xff] %vm2386_vm0, %v2446_v47  ;;  %v2442_v29 = vadd.f32 %v2437_v3, %v2218_v14  ;;  %v2449_v41 = vmax.f32 %v2443_v1, 0.0  ;;  %v2253_v48 = vadd.f32 %v2237_v8, %v1949_v35  ;;  %v1261_v9 = vadd.f32 %v5996_v52, %v5995_v21  ;;  %v5998_v3 = vld [vmem:[#allocation116_spill] sm:$0xff]  ;;  %v6010_v55 = vld [vmem:[#allocation166_spill] sm:$0xff]  ;;  %v6011_v21 = vld [vmem:[#allocation33_spill] sm:$0xff] }
 0x2cc   : > { %v2235_v7 = vpop.permute.xlu0 %2234  ;;  %v1260_v39 = vadd.f32 %v5998_v3, %v5997_v16  ;;  %v1263_v18 = vadd.f32 %v6000_v44, %v5999_v53  ;;  %v1726_v56 = vmul.f32 %v4667_v36, %v5193_v13  ;;  %v1951_v46 = vadd.f32 %v6001_v22, %v1719_v43  ;;  %v6012_v52 = vld [vmem:[#allocation119_spill] sm:$0xff]  ;;  %v6013_v16 = vld [vmem:[#allocation220_spill] sm:$0xff] }
 0x2cd   : > { %v2448_v5 = vmax.f32 %v2442_v29, 0.0  ;;  %v2252_v57 = vadd.f32 %v2235_v7, %v1948_v31  ;;  %v1950_v38 = vadd.f32 %v6002_v58, %v1718_v4  ;;  %2720 = vst.msk [vmem:[%s5005_s19 + $0xb8] sm:$0xf] %vm2392_vm1, %v2449_v41  ;;  %v2460_v32 = vadd.f32 %v2458_v12, %v2253_v48  ;;  %v6014_v3 = vld [vmem:[#allocation120_spill] sm:$0xff]  ;;  %v6017_v58 = vld [vmem:[#allocation167_spill] sm:$0xff] }
 0x2ce   : > { %v1565_v11 = vadd.f32 %v6003_v2, %v1261_v9  ;;  %v1564_v20 = vadd.f32 %v6004_v42, %v1260_v39  ;;  %v1721_v54 = vadd.f32 %v5174_v24, %v1531_v19  ;;  %v1720_v0 = vadd.f32 %v1714_v26, %v1530_v27  ;;  %v2241_v37 = vpop.permute.xlu1 %2240  ;;  %v6008_v24 = vld [vmem:[#allocation22_spill] sm:$0xff] }
 0x2cf   : > { %2719 = vst.msk [vmem:[%s5005_s19 + $0xb0] sm:$0xff] %vm2386_vm0, %v2448_v5  ;;  %v2459_v51 = vadd.f32 %v2458_v12, %v2252_v57  ;;  %v2466_v25 = vmax.f32 %v2460_v32, 0.0  ;;  %v2255_v30 = vadd.f32 %v2241_v37, %v1951_v46  ;;  %v1262_v34 = vadd.f32 %v6006_v6, %v6005_v23  ;;  %v6018_v32 = vld [vmem:[#allocation168_spill] sm:$0xff]  ;;  %v6023_v23 = vld [vmem:[#allocation35_spill] sm:$0xff] }
 0x2d0   : > { %v2239_v47 = vpop.permute.xlu0 %2238  ;;  %v1567_v43 = vadd.f32 %v6007_v40, %v1263_v18  ;;  %v1729_v61 = vmul.f32 %v4710_v10, %v5193_v13  ;;  %v5271_v35 = vstv %s5234_s27  ;;  %v1953_v26 = vadd.f32 %v6008_v24, %v1721_v54  ;;  %v6024_v6 = vld [vmem:[#allocation123_spill] sm:$0xff]  ;;  %v6026_v24 = vld [vmem:[#allocation25_spill] sm:$0xff] }
 0x2d1   : > { %v2465_v14 = vmax.f32 %v2459_v51, 0.0  ;;  %v2254_v28 = vadd.f32 %v2239_v47, %v1950_v38  ;;  %v1952_v31 = vadd.f32 %v6009_v60, %v1720_v0  ;;  %2723 = vst.msk [vmem:[%s5005_s19 + $0xc8] sm:$0xff] %vm2386_vm0, %v2466_v25  ;;  %v2462_v1 = vadd.f32 %v2458_v12, %v2255_v30  ;;  %v6019_v47 = vld [vmem:[#allocation34_spill] sm:$0xff]  ;;  %v6020_v25 = vld [vmem:[#allocation121_spill] sm:$0xff] }
 0x2d2   : > { %v1566_v19 = vadd.f32 %v6010_v55, %v1262_v34  ;;  %v1731_v62 = vadd.f32 %v5214_v33, %v1565_v11  ;;  %v1730_v27 = vadd.f32 %v1724_v49, %v1564_v20  ;;  %v1728_v4 = vmul.f32 %v4714_v59, %v5193_v13  ;;  %v2245_v8 = vpop.permute.xlu1 %2244  ;;  %v6015_v49 = vld [vmem:[#allocation208_spill] sm:$0xff]  ;;  %v6021_v30 = vld [vmem:[#allocation221_spill] sm:$0xff]  ;;  %v6028_v55 = vld [vmem:[#allocation170_spill] sm:$0xff] }
 0x2d3   : > { %2722 = vst.msk [vmem:[%s5005_s19 + $0xc0] sm:$0xff] %vm2386_vm0, %v2465_v14  ;;  %v2461_v29 = vadd.f32 %v2458_v12, %v2254_v28  ;;  %v2468_v41 = vmax.f32 %v2462_v1, 0.0  ;;  %v2257_v48 = vadd.f32 %v2245_v8, %v1953_v26  ;;  %v1265_v9 = vadd.f32 %v6012_v52, %v6011_v21  ;;  %v6016_v13 = vld [vmem:[#allocation24_spill] sm:$0xff]  ;;  %v6022_v28 = vld [vmem:[#allocation122_spill] sm:$0xff]  ;;  %v6027_v1 = vld [vmem:[#allocation169_spill] sm:$0xff] }
 0x2d4   : > { %v2243_v7 = vpop.permute.xlu0 %2242  ;;  %v1264_v39 = vadd.f32 %v6014_v3, %v6013_v16  ;;  %v1733_v53 = vadd.f32 %v1727_v17, %v1567_v43  ;;  %v1739_v33 = vmul.f32 %v4802_v15, %v5271_v35  ;;  %v1987_v44 = vadd.f32 %v6015_v49, %v1731_v62  ;;  %v6029_v21 = vld [vmem:[#allocation222_spill] sm:$0xff]  ;;  %v6030_v52 = vld [vmem:[#allocation124_spill] sm:$0xff]  ;;  %v6031_v16 = vld [vmem:[#allocation171_spill] sm:$0xff] }
 0x2d5   : > { %v2467_v5 = vmax.f32 %v2461_v29, 0.0  ;;  %v2256_v57 = vadd.f32 %v2243_v7, %v1952_v31  ;;  %v1986_v18 = vadd.f32 %v6016_v13, %v1730_v27  ;;  %2725 = vst.msk [vmem:[%s5005_s19 + $0xd8] sm:$0xff] %vm2386_vm0, %v2468_v41  ;;  %v2464_v22 = vadd.f32 %v2458_v12, %v2257_v48  ;;  %v6033_v49 = vld [vmem:[#allocation26_spill] sm:$0xff] }
 0x2d6   : > { %v1569_v38 = vadd.f32 %v6017_v58, %v1265_v9  ;;  %v1568_v51 = vadd.f32 %v6018_v32, %v1264_v39  ;;  %v1732_v17 = vadd.f32 %v1726_v56, %v1566_v19  ;;  %v2479_v2 = vstv %s5263_s28  ;;  %v2275_v11 = vpop.permute.xlu1 %2274  ;;  %v6025_v56 = vld [vmem:[#allocation209_spill] sm:$0xff] }
 0x2d7   : > { %2724 = vst.msk [vmem:[%s5005_s19 + $0xd0] sm:$0xff] %vm2386_vm0, %v2467_v5  ;;  %v2463_v46 = vadd.f32 %v2458_v12, %v2256_v57  ;;  %v2470_v20 = vmax.f32 %v2464_v22, 0.0  ;;  %v2291_v0 = vadd.f32 %v2275_v11, %v1987_v44  ;;  %v1299_v14 = vadd.f32 %v6020_v25, %v6019_v47  ;;  %v6034_v22 = vld [vmem:[#allocation172_spill] sm:$0xff]  ;;  %v6038_v47 = vld [vmem:[#allocation126_spill] sm:$0xff] }
 0x2d8   : > { %v2273_v42 = vpop.permute.xlu0 %2272  ;;  %v1298_v12 = vadd.f32 %v6022_v28, %v6021_v30  ;;  %v1301_v34 = vadd.f32 %v6024_v6, %v6023_v23  ;;  %v1738_v40 = vmul.f32 %v4808_v50, %v5271_v35  ;;  %v1989_v43 = vadd.f32 %v6025_v56, %v1733_v53  ;;  %v6039_v30 = vld [vmem:[#allocation211_spill] sm:$0xff]  ;;  %v6042_v56 = vld [vmem:[#allocation174_spill] sm:$0xff] }
 0x2d9   : > { %v2469_v54 = vmax.f32 %v2463_v46, 0.0  ;;  %v2290_v37 = vadd.f32 %v2273_v42, %v1986_v18  ;;  %v1988_v26 = vadd.f32 %v6026_v24, %v1732_v17  ;;  %2727 = vst.msk [vmem:[%s5005_s19 + $0xe8] sm:$0xf] %vm2392_vm1, %v2470_v20  ;;  %v2481_v60 = vadd.f32 %v2479_v2, %v2291_v0  ;;  %v6035_v20 = vld [vmem:[#allocation224_spill] sm:$0xff] }
 0x2da   : > { %v1603_v29 = vadd.f32 %v6027_v1, %v1299_v14  ;;  %v1602_v19 = vadd.f32 %v6028_v55, %v1298_v12  ;;  %v1735_v62 = vadd.f32 %v1729_v61, %v1569_v38  ;;  %v1734_v27 = vadd.f32 %v1728_v4, %v1568_v51  ;;  %v2279_v8 = vpop.permute.xlu1 %2278  ;;  %v6032_v4 = vld [vmem:[#allocation210_spill] sm:$0xff] }
 0x2db   : > { %2726 = vst.msk [vmem:[%s5005_s19 + $0xe0] sm:$0xff] %vm2386_vm0, %v2469_v54  ;;  %v2480_v31 = vadd.f32 %v2479_v2, %v2290_v37  ;;  %v2487_v41 = vmax.f32 %v2481_v60, 0.0  ;;  %v2293_v48 = vadd.f32 %v2279_v8, %v1989_v43  ;;  %v1300_v9 = vadd.f32 %v6030_v52, %v6029_v21  ;;  %v6036_v54 = vld [vmem:[#allocation125_spill] sm:$0xff]  ;;  %v6043_v55 = vld [vmem:[#allocation226_spill] sm:$0xff]  ;;  %v6046_v8 = vld [vmem:[#allocation128_spill] sm:$0xff] }
 0x2dc   : > { %v2277_v7 = vpop.permute.xlu0 %2276  ;;  %v1605_v3 = vadd.f32 %v6031_v16, %v1301_v34  ;;  %v1741_v39 = vmul.f32 %v4663_v63, %v5271_v35  ;;  %v1740_v61 = vmul.f32 %v4667_v36, %v5271_v35  ;;  %v1991_v53 = vadd.f32 %v6032_v4, %v1735_v62  ;;  %v6037_v37 = vld [vmem:[#allocation225_spill] sm:$0xff] }
 0x2dd   : > { %v2486_v5 = vmax.f32 %v2480_v31, 0.0  ;;  %v2292_v57 = vadd.f32 %v2277_v7, %v1988_v26  ;;  %v1990_v44 = vadd.f32 %v6033_v49, %v1734_v27  ;;  %2730 = vst.msk [vmem:[%s5005_s19 + $0xf8] sm:$0xff] %vm2386_vm0, %v2487_v41  ;;  %v2483_v13 = vadd.f32 %v2479_v2, %v2293_v48  ;;  %v6041_v34 = vld [vmem:[#allocation173_spill] sm:$0xff]  ;;  %v6045_v27 = vld [vmem:[#allocation44_spill] sm:$0xff]  ;;  %v6047_v7 = vld [vmem:[#allocation223_spill] sm:$0xff] }
 0x2de   : > { %v1604_v46 = vadd.f32 %v6034_v22, %v1300_v9  ;;  %v1745_v58 = vadd.f32 %v1739_v33, %v1603_v29  ;;  %v1744_v38 = vadd.f32 %v1738_v40, %v1602_v19  ;;  %v1743_v63 = vmul.f32 %v4710_v10, %v5271_v35  ;;  %v2283_v36 = vpop.permute.xlu1 %2282  ;;  %v6040_v10 = vld [vmem:[#allocation27_spill] sm:$0xff]  ;;  %v6048_v48 = vld [vmem:[#allocation30_spill] sm:$0xff]  ;;  %v6049_v21 = vld [vmem:[#allocation217_spill] sm:$0xff] }
 0x2df   : > { %2729 = vst.msk [vmem:[%s5005_s19 + $0xf0] sm:$0xff] %vm2386_vm0, %v2486_v5  ;;  %v2482_v18 = vadd.f32 %v2479_v2, %v2292_v57  ;;  %v2489_v51 = vmax.f32 %v2483_v13, 0.0  ;;  %v2295_v11 = vadd.f32 %v2283_v36, %v1991_v53  ;;  %v1303_v0 = vadd.f32 %v6036_v54, %v6035_v20  ;;  %v6044_v19 = vld [vmem:[#allocation127_spill] sm:$0xff]  ;;  %v6054_v36 = vld [vmem:[#allocation130_spill] sm:$0xff] }
 0x2e0   : > { %v2281_v32 = vpop.permute.xlu0 %2280  ;;  %v1302_v25 = vadd.f32 %v6038_v47, %v6037_v37  ;;  %v1747_v14 = vadd.f32 %v1741_v39, %v1605_v3  ;;  %v1742_v33 = vmul.f32 %v4714_v59, %v5271_v35  ;;  %v2025_v28 = vadd.f32 %v6039_v30, %v1745_v58  ;;  %v6050_v3 = vld [vmem:[#allocation175_spill] sm:$0xff]  ;;  %v6057_v47 = vld [vmem:[#allocation177_spill] sm:$0xff] }
 0x2e1   : > { %v2488_v17 = vmax.f32 %v2482_v18, 0.0  ;;  %v2294_v42 = vadd.f32 %v2281_v32, %v1990_v44  ;;  %v2024_v12 = vadd.f32 %v6040_v10, %v1744_v38  ;;  %2732 = vst.msk [vmem:[%s5005_s19 + $0x108] sm:$0xff] %vm2386_vm0, %v2489_v51  ;;  %v2485_v23 = vadd.f32 %v2479_v2, %v2295_v11  ;;  %v6053_v38 = vld [vmem:[#allocation47_spill] sm:$0xff] }
 0x2e2   : > { %v1607_v40 = vadd.f32 %v6041_v34, %v1303_v0  ;;  %v1606_v43 = vadd.f32 %v6042_v56, %v1302_v25  ;;  %v1746_v24 = vadd.f32 %v1740_v61, %v1604_v46  ;;  %v2500_v26 = vstv %s5314_s29  ;;  %v2313_v60 = vpop.permute.xlu1 %2312  ;;  %v6051_v61 = vld [vmem:[#allocation176_spill] sm:$0xff]  ;;  %v6052_v46 = vld [vmem:[#allocation129_spill] sm:$0xff]  ;;  %v6056_v54 = vld [vmem:[#allocation219_spill] sm:$0xff] }
 0x2e3   : > { %2731 = vst.msk [vmem:[%s5005_s19 + $0x100] sm:$0xff] %vm2386_vm0, %v2488_v17  ;;  %v2484_v6 = vadd.f32 %v2479_v2, %v2294_v42  ;;  %v2491_v35 = vmax.f32 %v2485_v23, 0.0  ;;  %v2329_v1 = vadd.f32 %v2313_v60, %v2025_v28  ;;  %v1337_v62 = vadd.f32 %v6044_v19, %v6043_v55  ;;  %v2802_v51 = vld [vmem:[%s2941_s15 + $0x1a] sm:$0xff]  ;;  %v2803_v17 = vld [vmem:[%s2941_s15 + $0x12] sm:$0xff] }
 0x2e4   : > { %v2311_v59 = vpop.permute.xlu0 %2310  ;;  %v1336_v2 = vadd.f32 %v6046_v8, %v6045_v27  ;;  %v1753_v41 = vmul.f32 %v4802_v15, %v6047_v7  ;;  %v1752_v5 = vmul.f32 %v4808_v50, %v6047_v7  ;;  %v2027_v57 = vadd.f32 %v6048_v48, %v1747_v14  ;;  %v6055_v42 = vld [vmem:[#allocation32_spill] sm:$0xff]  ;;  %v6058_v14 = vld [vmem:[#allocation178_spill] sm:$0xff] }
 0x2e5   : > { %v2490_v31 = vmax.f32 %v2484_v6, 0.0  ;;  %v2328_v29 = vadd.f32 %v2311_v59, %v2024_v12  ;;  %v2026_v52 = vadd.f32 %v6049_v21, %v1746_v24  ;;  %2734 = vst.msk [vmem:[%s5005_s19 + $0x118] sm:$0xf] %vm2392_vm1, %v2491_v35  ;;  %v2502_v9 = vadd.f32 %v2500_v26, %v2329_v1  ;;  %v6059_v56 = vld [vmem:[#allocation36_spill] sm:$0xff]  ;;  %v6060_v24 = vld [vmem:[#allocation41_spill] sm:$0xff] }
 0x2e6   : > { %v1641_v39 = vadd.f32 %v6050_v3, %v1337_v62  ;;  %v1640_v4 = vadd.f32 %v6051_v61, %v1336_v2  ;;  %v1749_v15 = vadd.f32 %v1743_v63, %v1607_v40  ;;  %v1748_v53 = vadd.f32 %v1742_v33, %v1606_v43  ;;  %v2317_v50 = vpop.permute.xlu1 %2316 }
 0x2e7   : > { %2733 = vst.msk [vmem:[%s5005_s19 + $0x110] sm:$0xff] %vm2386_vm0, %v2490_v31  ;;  %v2501_v16 = vadd.f32 %v2500_v26, %v2328_v29  ;;  %v2508_v44 = vmax.f32 %v2502_v9, 0.0  ;;  %v2331_v18 = vadd.f32 %v2317_v50, %v2027_v57  ;;  %v1339_v58 = vadd.f32 %v6052_v46, %v4967_v45 }
 0x2e8   : > { %v2315_v49 = vpop.permute.xlu0 %2314  ;;  %v1338_v32 = vadd.f32 %v6054_v36, %v6053_v38  ;;  %v1755_v63 = vmul.f32 %v2802_v51, %v6047_v7  ;;  %v1754_v11 = vmul.f32 %v2803_v17, %v6047_v7  ;;  %v2029_v20 = vadd.f32 %v6055_v42, %v1749_v15  ;;  %v6061_v7 = vld [vmem:[#allocation42_spill] sm:$0xff] }
 0x2e9   : > { %v2507_v13 = vmax.f32 %v2501_v16, 0.0  ;;  %v2330_v22 = vadd.f32 %v2315_v49, %v2026_v52  ;;  %v2028_v0 = vadd.f32 %v6056_v54, %v1748_v53  ;;  %2737 = vst.msk [vmem:[%s5005_s19 + $0x128] sm:$0xff] %vm2386_vm0, %v2508_v44  ;;  %v2504_v45 = vadd.f32 %v2500_v26, %v2331_v18  ;;  %v6063_v44 = vld [vmem:[#allocation45_spill] sm:$0xff]  ;;  %v6064_v18 = vld [vmem:[#allocation46_spill] sm:$0xff] }
 0x2ea   : > { %v1643_v25 = vadd.f32 %v6057_v47, %v1339_v58  ;;  %v1642_v33 = vadd.f32 %v6058_v14, %v1338_v32  ;;  %v1759_v30 = vadd.f32 %v1753_v41, %v1641_v39  ;;  %v1758_v28 = vadd.f32 %v1752_v5, %v1640_v4  ;;  %v2321_v10 = vpop.permute.xlu1 %2320  ;;  %v6062_v5 = vld [vmem:[#allocation43_spill] sm:$0xff] }
 0x2eb   : > { %2736 = vst.msk [vmem:[%s5005_s19 + $0x120] sm:$0xff] %vm2386_vm0, %v2507_v13  ;;  %v2503_v37 = vadd.f32 %v2500_v26, %v2330_v22  ;;  %v2510_v23 = vmax.f32 %v2504_v45, 0.0  ;;  %v2333_v34 = vadd.f32 %v2321_v10, %v2029_v20  ;;  %v2521_v29 = vstv %s5363_s30 }
 0x2ec   : > { %v2319_v12 = vpop.permute.xlu0 %2318  ;;  %v2063_v43 = vadd.f32 %v6059_v56, %v1759_v30  ;;  %v2062_v60 = vadd.f32 %v6060_v24, %v1758_v28  ;;  %v1761_v31 = vadd.f32 %v1755_v63, %v1643_v25  ;;  %v1760_v1 = vadd.f32 %v1754_v11, %v1642_v33 }
 0x2ed   : > { %v2509_v6 = vmax.f32 %v2503_v37, 0.0  ;;  %v2332_v40 = vadd.f32 %v2319_v12, %v2028_v0  ;;  %2739 = vst.msk [vmem:[%s5005_s19 + $0x138] sm:$0xff] %vm2386_vm0, %v2510_v23  ;;  %v2506_v59 = vadd.f32 %v2500_v26, %v2333_v34 }
 0x2ee   : > { %v2351_v55 = vpop.permute.xlu1 %2350  ;;  %v2065_v41 = vadd.f32 %v6061_v7, %v1761_v31  ;;  %v2064_v48 = vadd.f32 %v6062_v5, %v1760_v1 }
 0x2ef   : > { %2738 = vst.msk [vmem:[%s5005_s19 + $0x130] sm:$0xff] %vm2386_vm0, %v2509_v6  ;;  %v2505_v35 = vadd.f32 %v2500_v26, %v2332_v40  ;;  %v2512_v62 = vmax.f32 %v2506_v59, 0.0  ;;  %v2367_v8 = vadd.f32 %v2351_v55, %v2063_v43 }
 0x2f0   : > { %v2349_v19 = vpop.permute.xlu0 %2348 }
 0x2f1   : > { %v2511_v27 = vmax.f32 %v2505_v35, 0.0  ;;  %v2366_v2 = vadd.f32 %v2349_v19, %v2062_v60  ;;  %2741 = vst.msk [vmem:[%s5005_s19 + $0x148] sm:$0xf] %vm2392_vm1, %v2512_v62  ;;  %v2523_v26 = vadd.f32 %v2521_v29, %v2367_v8 }
 0x2f2   : > { %v2355_v21 = vpop.permute.xlu1 %2354 }
 0x2f3   : > { %2740 = vst.msk [vmem:[%s5005_s19 + $0x140] sm:$0xff] %vm2386_vm0, %v2511_v27  ;;  %v2522_v57 = vadd.f32 %v2521_v29, %v2366_v2  ;;  %v2529_v9 = vmax.f32 %v2523_v26, 0.0  ;;  %v2369_v3 = vadd.f32 %v2355_v21, %v2065_v41 }
 0x2f4   : > { %v2353_v52 = vpop.permute.xlu0 %2352 }
 0x2f5   : > { %v2528_v16 = vmax.f32 %v2522_v57, 0.0  ;;  %v2368_v39 = vadd.f32 %v2353_v52, %v2064_v48  ;;  %2744 = vst.msk [vmem:[%s5005_s19 + $0x158] sm:$0xff] %vm2386_vm0, %v2529_v9  ;;  %v2525_v61 = vadd.f32 %v2521_v29, %v2369_v3 }
 0x2f6   : > { %v2359_v15 = vpop.permute.xlu1 %2358 }
 0x2f7   : > { %2743 = vst.msk [vmem:[%s5005_s19 + $0x150] sm:$0xff] %vm2386_vm0, %v2528_v16  ;;  %v2524_v4 = vadd.f32 %v2521_v29, %v2368_v39  ;;  %v2531_v50 = vmax.f32 %v2525_v61, 0.0  ;;  %v2371_v13 = vadd.f32 %v2359_v15, %v6063_v44 }
 0x2f8   : > { %v2357_v53 = vpop.permute.xlu0 %2356 }
 0x2f9   : > { %v2530_v49 = vmax.f32 %v2524_v4, 0.0  ;;  %v2370_v22 = vadd.f32 %v2357_v53, %v6064_v18  ;;  %2746 = vst.msk [vmem:[%s5005_s19 + $0x168] sm:$0xff] %vm2386_vm0, %v2531_v50  ;;  %v2527_v46 = vadd.f32 %v2521_v29, %v2371_v13 }
 0x2fb   : > { %2745 = vst.msk [vmem:[%s5005_s19 + $0x160] sm:$0xff] %vm2386_vm0, %v2530_v49  ;;  %v2526_v58 = vadd.f32 %v2521_v29, %v2370_v22  ;;  %v2533_v38 = vmax.f32 %v2527_v46, 0.0 }
 0x2fd   : > { %v2532_v36 = vmax.f32 %v2526_v58, 0.0  ;;  %2748 = vst.msk [vmem:[%s5005_s19 + $0x178] sm:$0xf] %vm2392_vm1, %v2533_v38 }
 0x2ff   : > { %2747 = vst.msk [vmem:[%s5005_s19 + $0x170] sm:$0xff] %vm2386_vm0, %v2532_v36 }
 0x300 PF: > { %s15_s12 = sadd.s32 1, %s2844_s12  }
 0x301   : > { %p12_p2 = scmp.ge.s32.totalorder %s15_s12, 10  }
 0x303   :  { %14 = sbr.rel (!%p12_p2) target bundleno = 2 (0x2), region = 78 }
 0x30a   :  { %2562 = vsyncpa [#allocation3], 1 }
 0x30b   :  { %2564 = vsyncpa [#allocation3 + $0x1], 1 }
 0x30c   :  { %2565 = vsyncpa [#allocation5], 1 }

</bundles_post_ra>
